<compile_context>
chip_gen: v6e
topology: v6e:2x2x1
jax: 0.10.0
libtpu: 0.0.40
codegen_flags: <defaults>
</compile_context>

<pallas_src>
import jax
import jax.numpy as jnp
from jax.experimental import pallas as pl
from jax.experimental.pallas import tpu as pltpu

LANE = 128


def _round_up(v, m):
    return (v + m - 1) // m * m


def _mxu_k():
    """MXU contraction depth: 256 on v6e/v7x-class chips, 128 on v5e and older."""
    try:
        kind = jax.devices()[0].device_kind.lower()
    except Exception:
        return 256
    return 128 if any(t in kind for t in ("v2", "v3", "v4", "v5")) else 256


def _vmem_budget():
    """Per-kernel scoped-VMEM limit: ~3/4 of physical VMEM, capped at 100 MiB."""
    try:
        cap = int(pltpu.get_tpu_info().vmem_capacity_bytes)
    except Exception:
        cap = 64 * 1024 * 1024
    return int(max(32 * 1024 * 1024, min(cap * 3 // 4, 100 * 1024 * 1024)))


def _group_taps(taps, w_t, pack_k):
    """Optionally fuse pairs of conv taps along the contraction (K) axis.

    taps: list of (kh, kw); w_t: (n_taps, K, cout_p), one K-slab per tap.
    With pack_k each MXU GEMM sees 2*K (fills the 256-deep v6e/v7x MXU when K == 128);
    an odd tap count is padded with a zero-weight dummy tap.
    """
    if not pack_k:
        return [(t,) for t in taps], w_t
    taps = list(taps)
    w_list = [w_t[i] for i in range(len(taps))]
    if len(taps) % 2:
        taps.append(taps[0])                       # dummy tap, zero weights
        w_list.append(jnp.zeros_like(w_list[0]))
    n_g = len(taps) // 2
    groups = [(taps[2 * g], taps[2 * g + 1]) for g in range(n_g)]
    w_g = jnp.stack([jnp.concatenate([w_list[2 * g], w_list[2 * g + 1]], axis=0)
                     for g in range(n_g)], axis=0)
    return groups, w_g


# ----------------------------- Pallas kernels ------------------------------------

def _make_conv1_kernel(hin, win, ho, wo, groups, stride, cin_p):
    """Fused BN1+ReLU (bf16, cached in VMEM once per batch element) -> grouped-tap conv1
    GEMMs (bf16 MXU, f32 VMEM accumulator) -> +BN2 shift, ReLU -> store into a spatially
    pre-padded bf16 output block (zero halo used by conv2 as its conv padding)."""
    n_phases = 1 if stride == 1 else 4
    cin_eff = n_phases * cin_p

    def gemms(act_scr, w_ref, acc_scr, c_off):
        for g, group in enumerate(groups):
            parts = [act_scr[kh:kh + ho, kw + c_off:kw + c_off + wo, :]
                     .reshape(ho * wo, cin_eff) for kh, kw in group]
            a = parts[0] if len(parts) == 1 else jnp.concatenate(parts, axis=-1)
            r = jnp.dot(a, w_ref[g], preferred_element_type=jnp.float32)
            if g == 0:
                acc_scr[...] = r
            else:
                acc_scr[...] += r

    def epilogue(b2_ref, o_ref, acc_scr):
        tco = o_ref.shape[-1]
        out = jnp.maximum(acc_scr[...] + b2_ref[...], 0.0)       # BN2 shift + ReLU
        o_ref[0] = jnp.zeros((ho + 2, wo + 4, tco), o_ref.dtype)  # zero halo for conv2
        o_ref[0, 1:1 + ho, 2:2 + wo, :] = out.reshape(ho, wo, tco).astype(o_ref.dtype)

    if stride == 1:
        def kernel(x_ref, s1_ref, b1_ref, w_ref, b2_ref, o_ref, act_scr, acc_scr):
            @pl.when(pl.program_id(1) == 0)        # compute activation once per batch elem
            def _():
                act_scr[...] = jnp.zeros((hin + 2, win + 4, cin_p), jnp.bfloat16)
                s = s1_ref[...].reshape(1, 1, cin_p)
                b = b1_ref[...].reshape(1, 1, cin_p)
                a = jnp.maximum(x_ref[0].astype(jnp.float32) * s + b, 0.0)
                act_scr[1:1 + hin, 2:2 + win, :] = a.astype(jnp.bfloat16)
            gemms(act_scr, w_ref, acc_scr, c_off=1)
            epilogue(b2_ref, o_ref, acc_scr)
    else:
        def kernel(x_ref, s1_ref, b1_ref, m_ref, w_ref, b2_ref, o_ref, act_scr, acc_scr):
            @pl.when(pl.program_id(1) == 0)
            def _():
                x = x_ref[0]                                     # (hin, win, 4*cin_p) bf16
                for ph in range(n_phases):
                    sl = slice(ph * cin_p, (ph + 1) * cin_p)
                    s = s1_ref[:, sl].reshape(1, 1, cin_p)
                    b = b1_ref[:, sl].reshape(1, 1, cin_p)
                    a = jnp.maximum(x[:, :, sl].astype(jnp.float32) * s + b, 0.0)
                    a = a * m_ref[0, :, :, ph:ph + 1]            # zero BN(conv padding)
                    act_scr[:, :, sl] = a.astype(jnp.bfloat16)
            gemms(act_scr, w_ref, acc_scr, c_off=0)
            epilogue(b2_ref, o_ref, acc_scr)
    return kernel


def _make_conv2_kernel(ho, wo, groups, fuse_shortcut):
    """conv2 (3x3, stride 1) on the pre-padded bf16 conv1 output, fused residual epilogue.

    fuse_shortcut=False: epilogue adds the raw (bf16) input tile (equal-in/out path).
    fuse_shortcut=True : epilogue adds convShortcut(relu(bn1(x))) computed in-kernel as a
                         single 1x1 GEMM on the stride-decimated raw input.
    """
    def gemms(x_ref, w_ref, acc_scr):
        cmid = x_ref.shape[-1]
        for g, group in enumerate(groups):
            parts = [x_ref[0, kh:kh + ho, kw + 1:kw + 1 + wo, :]   # bf16, no upcast
                     .reshape(ho * wo, cmid) for kh, kw in group]
            a = parts[0] if len(parts) == 1 else jnp.concatenate(parts, axis=-1)
            r = jnp.dot(a, w_ref[g], preferred_element_type=jnp.float32)
            if g == 0:
                acc_scr[...] = r
            else:
                acc_scr[...] += r

    if not fuse_shortcut:
        def kernel(x_ref, w_ref, res_ref, o_ref, acc_scr):
            gemms(x_ref, w_ref, acc_scr)
            tco = o_ref.shape[-1]
            out = acc_scr[...].reshape(ho, wo, tco) + res_ref[0].astype(jnp.float32)
            o_ref[0] = out.astype(o_ref.dtype)
    else:
        def kernel(x_ref, w_ref, xs_ref, s1_ref, b1_ref, wsc_ref, o_ref, acc_scr):
            gemms(x_ref, w_ref, acc_scr)
            cin_p = xs_ref.shape[-1]
            s = s1_ref[...].reshape(1, 1, cin_p)
            b = b1_ref[...].reshape(1, 1, cin_p)
            a1 = jnp.maximum(xs_ref[0].astype(jnp.float32) * s + b, 0.0)
            a1 = a1.reshape(ho * wo, cin_p).astype(jnp.bfloat16)
            acc_scr[...] += jnp.dot(a1, wsc_ref[...], preferred_element_type=jnp.float32)
            tco = o_ref.shape[-1]
            o_ref[0] = acc_scr[...].reshape(ho, wo, tco).astype(o_ref.dtype)
    return kernel


# ----------------------------- pallas_call wrappers -------------------------------

def _conv1_call(x_in, s1e, b1e, mask, w_g, b2, *, groups, ho, wo, stride, cin_p,
                tco, vmem_limit):
    n, hin, win, cin_eff = x_in.shape
    n_groups, gk, cout_p = w_g.shape
    kernel = _make_conv1_kernel(hin, win, ho, wo, groups, stride, cin_p)

    in_specs = [
        pl.BlockSpec((1, hin, win, cin_eff), lambda i, j: (i, 0, 0, 0)),
        pl.BlockSpec((1, cin_eff), lambda i, j: (0, 0)),
        pl.BlockSpec((1, cin_eff), lambda i, j: (0, 0)),
    ]
    args = [x_in, s1e, b1e]
    if stride == 2:
        in_specs.append(pl.BlockSpec((1, hin, win, 4), lambda i, j: (0, 0, 0, 0)))
        args.append(mask)
    in_specs += [
        pl.BlockSpec((n_groups, gk, tco), lambda i, j: (0, 0, j)),
        pl.BlockSpec((1, tco), lambda i, j: (0, j)),
    ]
    args += [w_g, b2]

    act_shape = (hin + 2, win + 4, cin_p) if stride == 1 else (hin, win, cin_eff)
    return pl.pallas_call(
        kernel,
        out_shape=jax.ShapeDtypeStruct((n, ho + 2, wo + 4, cout_p), jnp.bfloat16),
        grid=(n, cout_p // tco),
        in_specs=in_specs,
        out_specs=pl.BlockSpec((1, ho + 2, wo + 4, tco), lambda i, j: (i, 0, 0, j)),
        scratch_shapes=[pltpu.VMEM(act_shape, jnp.bfloat16),
                        pltpu.VMEM((ho * wo, tco), jnp.float32)],
        compiler_params=pltpu.CompilerParams(
            # Cout-tile axis must stay "arbitrary": the bf16 activation cache is filled at
            # j == 0 and reused by the remaining Cout tiles of the same batch element.
            dimension_semantics=("parallel", "arbitrary"),
            vmem_limit_bytes=vmem_limit),
    )(*args)


def _conv2_add_call(x1, w_g, res, *, groups, ho, wo, tco, vmem_limit):
    n, hp, wp, cmid = x1.shape
    n_groups, gk, cout_p = w_g.shape
    kernel = _make_conv2_kernel(ho, wo, groups, fuse_shortcut=False)
    return pl.pallas_call(
        kernel,
        out_shape=jax.ShapeDtypeStruct((n, ho, wo, cout_p), jnp.bfloat16),
        grid=(n, cout_p // tco),
        in_specs=[
            pl.BlockSpec((1, hp, wp, cmid), lambda i, j: (i, 0, 0, 0)),
            pl.BlockSpec((n_groups, gk, tco), lambda i, j: (0, 0, j)),
            pl.BlockSpec((1, ho, wo, tco), lambda i, j: (i, 0, 0, j)),
        ],
        out_specs=pl.BlockSpec((1, ho, wo, tco), lambda i, j: (i, 0, 0, j)),
        scratch_shapes=[pltpu.VMEM((ho * wo, tco), jnp.float32)],
        compiler_params=pltpu.CompilerParams(
            dimension_semantics=("parallel", "parallel"),
            vmem_limit_bytes=vmem_limit),
    )(x1, w_g, res)


def _conv2_shortcut_call(x1, w_g, xs, s1, b1, wsc, *, groups, ho, wo, tco, vmem_limit):
    n, hp, wp, cmid = x1.shape
    n_groups, gk, cout_p = w_g.shape
    cin_p = xs.shape[-1]
    kernel = _make_conv2_kernel(ho, wo, groups, fuse_shortcut=True)
    return pl.pallas_call(
        kernel,
        out_shape=jax.ShapeDtypeStruct((n, ho, wo, cout_p), jnp.bfloat16),
        grid=(n, cout_p // tco),
        in_specs=[
            pl.BlockSpec((1, hp, wp, cmid), lambda i, j: (i, 0, 0, 0)),
            pl.BlockSpec((n_groups, gk, tco), lambda i, j: (0, 0, j)),
            pl.BlockSpec((1, ho, wo, cin_p), lambda i, j: (i, 0, 0, 0)),
            pl.BlockSpec((1, cin_p), lambda i, j: (0, 0)),
            pl.BlockSpec((1, cin_p), lambda i, j: (0, 0)),
            pl.BlockSpec((cin_p, tco), lambda i, j: (0, j)),
        ],
        out_specs=pl.BlockSpec((1, ho, wo, tco), lambda i, j: (i, 0, 0, j)),
        scratch_shapes=[pltpu.VMEM((ho * wo, tco), jnp.float32)],
        compiler_params=pltpu.CompilerParams(
            dimension_semantics=("parallel", "parallel"),
            vmem_limit_bytes=vmem_limit),
    )(x1, w_g, xs, s1, b1, wsc)


# ----------------------------- forward (wrapper glue) ------------------------------

def basic_block_forward(x_nchw, p, stride, equal_in_out, eps=1e-5):
    assert stride in (1, 2)
    n, cin, h, w = x_nchw.shape
    cout = p["conv1_w"].shape[0]
    if equal_in_out:
        assert cin == cout and stride == 1, "equal-in/out path requires stride 1"
    if stride == 2:
        assert h % 2 == 0 and w % 2 == 0
    cin_p = _round_up(cin, LANE)
    cout_p = _round_up(cout, LANE)
    ho, wo = h // stride, w // stride
    mxu_k = _mxu_k()
    tco = 256 if (cout_p % 256 == 0 and mxu_k >= 256) else 128
    vmem_limit = _vmem_budget()

    # NHWC, lane-dense channel padding + bf16 cast (one fused XLA pass); pad channels stay 0
    x = jnp.transpose(x_nchw, (0, 2, 3, 1))
    xc = jnp.pad(x, ((0, 0), (0, 0), (0, 0), (0, cin_p - cin))).astype(jnp.bfloat16)

    # folded (inference) BatchNorm affine parameters
    s1 = p["bn1_gamma"] * jax.lax.rsqrt(p["bn1_var"] + eps)
    b1 = p["bn1_beta"] - p["bn1_mean"] * s1
    s2 = p["bn2_gamma"] * jax.lax.rsqrt(p["bn2_var"] + eps)
    b2 = p["bn2_beta"] - p["bn2_mean"] * s2
    s1p = jnp.pad(s1, (0, cin_p - cin)).reshape(1, cin_p)
    b1p = jnp.pad(b1, (0, cin_p - cin)).reshape(1, cin_p)
    b2p = jnp.pad(b2, (0, cout_p - cout)).reshape(1, cout_p)

    # conv1 weights: OIHW -> HWIO, fold BN2 scale into output channels, pad
    w1 = jnp.transpose(p["conv1_w"], (2, 3, 1, 0)) * s2[None, None, None, :]
    w1 = jnp.pad(w1, ((0, 0), (0, 0), (0, cin_p - cin), (0, cout_p - cout)))

    if stride == 1:
        conv1_in, s1e, b1e, mask = xc, s1p, b1p, None
        taps1 = [(kh, kw) for kh in range(3) for kw in range(3)]
        w1_t = w1.reshape(9, cin_p, cout_p)
        cin_eff = cin_p
    else:
        # stride-2 3x3 conv == stride-1 2x2 conv on a space-to-depth transform of the
        # spatially padded input (K = 4*cin_p fills the MXU well).
        xsp = jnp.pad(xc, ((0, 0), (1, 1), (1, 1), (0, 0)))
        hs, ws = (h + 2) // 2, (w + 2) // 2
        conv1_in = (xsp.reshape(n, hs, 2, ws, 2, cin_p)
                    .transpose(0, 1, 3, 2, 4, 5)
                    .reshape(n, hs, ws, 4 * cin_p))
        s1e = jnp.tile(s1p, (1, 4))
        b1e = jnp.tile(b1p, (1, 4))
        # tiny per-phase validity mask: zeroes the BN+ReLU of conv zero-padding positions
        r = jnp.arange(hs)[:, None, None]
        c = jnp.arange(ws)[None, :, None]
        ph = jnp.arange(4)[None, None, :]
        i_src = 2 * r + ph // 2
        j_src = 2 * c + ph % 2
        mask = ((i_src >= 1) & (i_src <= h) & (j_src >= 1) & (j_src <= w))
        mask = mask.astype(jnp.float32)[None]                      # (1, hs, ws, 4)
        taps1 = [(dr, dc) for dr in range(2) for dc in range(2)]
        w1p = jnp.pad(w1, ((0, 1), (0, 1), (0, 0), (0, 0)))        # (4,4,Cin_p,Cout_p)
        w1_t = (w1p.reshape(2, 2, 2, 2, cin_p, cout_p)
                .transpose(0, 2, 1, 3, 4, 5)
                .reshape(4, 4 * cin_p, cout_p))
        cin_eff = 4 * cin_p

    groups1, w1_g = _group_taps(taps1, w1_t, pack_k=(cin_eff < mxu_k))
    w1_g = w1_g.astype(jnp.bfloat16)

    out1 = _conv1_call(conv1_in, s1e, b1e, mask, w1_g, b2p,
                       groups=groups1, ho=ho, wo=wo, stride=stride, cin_p=cin_p,
                       tco=tco, vmem_limit=vmem_limit)

    # conv2 (3x3, stride 1) fused with the residual branch
    w2 = jnp.transpose(p["conv2_w"], (2, 3, 1, 0))
    w2 = jnp.pad(w2, ((0, 0), (0, 0), (0, cout_p - cout), (0, cout_p - cout)))
    w2_t = w2.reshape(9, cout_p, cout_p)
    taps2 = [(kh, kw) for kh in range(3) for kw in range(3)]
    groups2, w2_g = _group_taps(taps2, w2_t, pack_k=(cout_p < mxu_k))
    w2_g = w2_g.astype(jnp.bfloat16)

    if equal_in_out:
        y = _conv2_add_call(out1, w2_g, xc, groups=groups2, ho=ho, wo=wo,
                            tco=tco, vmem_limit=vmem_limit)
    else:
        x_dec = xc[:, ::stride, ::stride, :]                       # 1x1/stride-s input
        wsc = p["convsc_w"].reshape(cout, cin).T                   # (Cin, Cout)
        wsc = jnp.pad(wsc, ((0, cin_p - cin), (0, cout_p - cout))).astype(jnp.bfloat16)
        y = _conv2_shortcut_call(out1, w2_g, x_dec, s1p, b1p, wsc,
                                 groups=groups2, ho=ho, wo=wo,
                                 tco=tco, vmem_limit=vmem_limit)

    y = y[..., :cout].astype(x_nchw.dtype)
    return jnp.transpose(y, (0, 3, 1, 2))                          # back to NCHW


# ----------------------------- parameters / reference -------------------------------

def init_basic_block_params(key, in_planes, out_planes):
    ks = jax.random.split(key, 11)

    def conv_w(k, cout, cin, kh, kw):
        fan = cin * kh * kw
        return (2.0 / fan) ** 0.5 * jax.random.normal(k, (cout, cin, kh, kw), jnp.float32)

    return dict(
        bn1_gamma=1.0 + 0.1 * jax.random.normal(ks[0], (in_planes,), jnp.float32),
        bn1_beta=0.1 * jax.random.normal(ks[1], (in_planes,), jnp.float32),
        bn1_mean=0.1 * jax.random.normal(ks[2], (in_planes,), jnp.float32),
        bn1_var=jax.random.uniform(ks[3], (in_planes,), jnp.float32, 0.5, 1.5),
        conv1_w=conv_w(ks[4], out_planes, in_planes, 3, 3),
        bn2_gamma=1.0 + 0.1 * jax.random.normal(ks[5], (out_planes,), jnp.float32),
        bn2_beta=0.1 * jax.random.normal(ks[6], (out_planes,), jnp.float32),
        bn2_mean=0.1 * jax.random.normal(ks[7], (out_planes,), jnp.float32),
        bn2_var=jax.random.uniform(ks[8], (out_planes,), jnp.float32, 0.5, 1.5),
        conv2_w=conv_w(ks[9], out_planes, out_planes, 3, 3),
        convsc_w=conv_w(ks[10], out_planes, in_planes, 1, 1),
    )


def reference_forward(x_nchw, p, stride, equal_in_out, eps=1e-5):
    # pure-JAX (XLA) reference mirroring the PyTorch forward, for correctness check
    def bn_relu(x, g, b, m, v):
        s = g / jnp.sqrt(v + eps)
        return jnp.maximum(x * s[None, :, None, None] + (b - m * s)[None, :, None, None], 0.0)

    def conv(x, w, st, pad):
        return jax.lax.conv_general_dilated(
            x, w, (st, st), [(pad, pad), (pad, pad)],
            dimension_numbers=("NCHW", "OIHW", "NCHW"),
            precision=jax.lax.Precision.HIGHEST)

    act1 = bn_relu(x_nchw, p["bn1_gamma"], p["bn1_beta"], p["bn1_mean"], p["bn1_var"])
    short = x_nchw if equal_in_out else conv(act1, p["convsc_w"], stride, 0)
    out = conv(act1, p["conv1_w"], stride, 1)
    out = bn_relu(out, p["bn2_gamma"], p["bn2_beta"], p["bn2_mean"], p["bn2_var"])
    out = conv(out, p["conv2_w"], 1, 1)
    return short + out


# ----------------------------- main ----------------------------------------------

if __name__ == "__main__":
    key = jax.random.PRNGKey(0)
    kx1, kx2, kp1, kp2 = jax.random.split(key, 4)
    fwd = jax.jit(basic_block_forward, static_argnums=(2, 3))

    # case 1: in_planes != out_planes, stride 2 (space-to-depth conv1 + fused 1x1 shortcut)
    x1 = jax.random.normal(kx1, (2, 4, 16, 16), jnp.float32)
    p1 = init_basic_block_params(kp1, in_planes=4, out_planes=8)
    y1 = jax.block_until_ready(fwd(x1, p1, 2, False))
    r1 = reference_forward(x1, p1, stride=2, equal_in_out=False)
    assert y1.shape == (2, 8, 8, 8), y1.shape
    assert jnp.allclose(y1, r1, rtol=5e-2, atol=5e-2), "mismatch (not-equal path)"

    # case 2: in_planes == out_planes, stride 1 (fused BN1 conv1 + fused residual add)
    x2 = jax.random.normal(kx2, (2, 8, 16, 16), jnp.float32)
    p2 = init_basic_block_params(kp2, in_planes=8, out_planes=8)
    y2 = jax.block_until_ready(fwd(x2, p2, 1, True))
    r2 = reference_forward(x2, p2, stride=1, equal_in_out=True)
    assert y2.shape == (2, 8, 16, 16), y2.shape
    assert jnp.allclose(y2, r2, rtol=5e-2, atol=5e-2), "mismatch (equal path)"

    print("KERNEL_OK")
</pallas_src>

<mosaic_0001>
module attributes {stable_mosaic.version = 11 : i64} {
  func.func @kernel(%arg0: i32, %arg1: i32, %arg2: memref<1x9x9x512xbf16, #tpu.memory_space<vmem>>, %arg3: memref<1x512xf32, #tpu.memory_space<vmem>>, %arg4: memref<1x512xf32, #tpu.memory_space<vmem>>, %arg5: memref<1x9x9x4xf32, #tpu.memory_space<vmem>>, %arg6: memref<4x512x128xbf16, #tpu.memory_space<vmem>>, %arg7: memref<1x128xf32, #tpu.memory_space<vmem>>, %arg8: memref<1x10x12x128xbf16, #tpu.memory_space<vmem>>, %arg9: memref<9x9x512xbf16, #tpu.memory_space<vmem>>, %arg10: memref<64x128xf32, #tpu.memory_space<vmem>>) attributes {dimension_semantics = [#tpu.dimension_semantics<parallel>, #tpu.dimension_semantics<arbitrary>], iteration_bounds = array<i64: 2, 1>, scalar_prefetch = 0 : i64, scratch_operands = 2 : i64, tpu.core_type = #tpu.core_type<tc>, window_params = [{transform_indices = @transform_0, window_bounds = array<i64: 1, 9, 9, 512>}, {pipeline_mode = #tpu.pipeline_mode<synchronous>, transform_indices = @transform_1, window_bounds = array<i64: 1, 512>}, {pipeline_mode = #tpu.pipeline_mode<synchronous>, transform_indices = @transform_2, window_bounds = array<i64: 1, 512>}, {pipeline_mode = #tpu.pipeline_mode<synchronous>, transform_indices = @transform_3, window_bounds = array<i64: 1, 9, 9, 4>}, {transform_indices = @transform_4, window_bounds = array<i64: 4, 512, 128>}, {transform_indices = @transform_5, window_bounds = array<i64: 1, 128>}, {transform_indices = @transform_6, window_bounds = array<i64: 1, 10, 12, 128>}]} {
    %c0_i32 = arith.constant 0 : i32
    %0 = arith.cmpi eq, %arg1, %c0_i32 : i32
    %1 = arith.extui %0 : i1 to i32
    %c0_i32_0 = arith.constant 0 : i32
    %2 = arith.cmpi ne, %1, %c0_i32_0 : i32
    scf.if %2 {
      %c0_52 = arith.constant 0 : index
      %c0_53 = arith.constant 0 : index
      %c0_54 = arith.constant 0 : index
      %c0_55 = arith.constant 0 : index
      %48 = vector.load %arg2[%c0_52, %c0_53, %c0_54, %c0_55] : memref<1x9x9x512xbf16, #tpu.memory_space<vmem>>, vector<1x9x9x512xbf16>
      %49 = vector.shape_cast %48 : vector<1x9x9x512xbf16> to vector<9x9x512xbf16>
      %c0_56 = arith.constant 0 : index
      %c0_57 = arith.constant 0 : index
      %50 = vector.load %arg3[%c0_56, %c0_57] : memref<1x512xf32, #tpu.memory_space<vmem>>, vector<1x128xf32>
      %51 = vector.shape_cast %50 : vector<1x128xf32> to vector<1x1x128xf32>
      %c0_58 = arith.constant 0 : index
      %c0_59 = arith.constant 0 : index
      %52 = vector.load %arg4[%c0_58, %c0_59] : memref<1x512xf32, #tpu.memory_space<vmem>>, vector<1x128xf32>
      %53 = vector.shape_cast %52 : vector<1x128xf32> to vector<1x1x128xf32>
      %54 = vector.extract_strided_slice %49 {offsets = [0, 0, 0], sizes = [9, 9, 128], strides = [1, 1, 1]} : vector<9x9x512xbf16> to vector<9x9x128xbf16>
      %55 = arith.extf %54 : vector<9x9x128xbf16> to vector<9x9x128xf32>
      %56 = vector.broadcast %51 : vector<1x1x128xf32> to vector<9x9x128xf32>
      %57 = arith.mulf %55, %56 : vector<9x9x128xf32>
      %58 = vector.broadcast %53 : vector<1x1x128xf32> to vector<9x9x128xf32>
      %59 = arith.addf %57, %58 : vector<9x9x128xf32>
      %cst_60 = arith.constant 0.000000e+00 : f32
      %60 = vector.broadcast %cst_60 : f32 to vector<9x9x128xf32>
      %61 = arith.maximumf %59, %60 : vector<9x9x128xf32>
      %c0_61 = arith.constant 0 : index
      %c0_62 = arith.constant 0 : index
      %c0_63 = arith.constant 0 : index
      %c0_64 = arith.constant 0 : index
      %62 = vector.load %arg5[%c0_61, %c0_62, %c0_63, %c0_64] : memref<1x9x9x4xf32, #tpu.memory_space<vmem>>, vector<1x9x9x1xf32>
      %63 = vector.shape_cast %62 : vector<1x9x9x1xf32> to vector<9x9x1xf32>
      %64 = vector.broadcast %63 : vector<9x9x1xf32> to vector<9x9x128xf32>
      %65 = arith.mulf %61, %64 : vector<9x9x128xf32>
      %66 = arith.truncf %65 : vector<9x9x128xf32> to vector<9x9x128xbf16>
      %c0_65 = arith.constant 0 : index
      %c0_66 = arith.constant 0 : index
      %c0_67 = arith.constant 0 : index
      %67 = vector.load %arg9[%c0_65, %c0_66, %c0_67] : memref<9x9x512xbf16, #tpu.memory_space<vmem>>, vector<9x9x128xbf16>
      tpu.vector_store %arg9[%c0_65, %c0_66, %c0_67], %66 {strides = array<i32>} : memref<9x9x512xbf16, #tpu.memory_space<vmem>>, vector<9x9x128xbf16>,
      %c0_68 = arith.constant 0 : index
      %c128 = arith.constant 128 : index
      %68 = vector.load %arg3[%c0_68, %c128] : memref<1x512xf32, #tpu.memory_space<vmem>>, vector<1x128xf32>
      %69 = vector.shape_cast %68 : vector<1x128xf32> to vector<1x1x128xf32>
      %c0_69 = arith.constant 0 : index
      %c128_70 = arith.constant 128 : index
      %70 = vector.load %arg4[%c0_69, %c128_70] : memref<1x512xf32, #tpu.memory_space<vmem>>, vector<1x128xf32>
      %71 = vector.shape_cast %70 : vector<1x128xf32> to vector<1x1x128xf32>
      %72 = vector.extract_strided_slice %49 {offsets = [0, 0, 128], sizes = [9, 9, 128], strides = [1, 1, 1]} : vector<9x9x512xbf16> to vector<9x9x128xbf16>
      %73 = arith.extf %72 : vector<9x9x128xbf16> to vector<9x9x128xf32>
      %74 = vector.broadcast %69 : vector<1x1x128xf32> to vector<9x9x128xf32>
      %75 = arith.mulf %73, %74 : vector<9x9x128xf32>
      %76 = vector.broadcast %71 : vector<1x1x128xf32> to vector<9x9x128xf32>
      %77 = arith.addf %75, %76 : vector<9x9x128xf32>
      %cst_71 = arith.constant 0.000000e+00 : f32
      %78 = vector.broadcast %cst_71 : f32 to vector<9x9x128xf32>
      %79 = arith.maximumf %77, %78 : vector<9x9x128xf32>
      %c0_72 = arith.constant 0 : index
      %c0_73 = arith.constant 0 : index
      %c0_74 = arith.constant 0 : index
      %c1_75 = arith.constant 1 : index
      %80 = vector.load %arg5[%c0_72, %c0_73, %c0_74, %c1_75] : memref<1x9x9x4xf32, #tpu.memory_space<vmem>>, vector<1x9x9x1xf32>
      %81 = vector.shape_cast %80 : vector<1x9x9x1xf32> to vector<9x9x1xf32>
      %82 = vector.broadcast %81 : vector<9x9x1xf32> to vector<9x9x128xf32>
      %83 = arith.mulf %79, %82 : vector<9x9x128xf32>
      %84 = arith.truncf %83 : vector<9x9x128xf32> to vector<9x9x128xbf16>
      %c0_76 = arith.constant 0 : index
      %c0_77 = arith.constant 0 : index
      %c128_78 = arith.constant 128 : index
      %85 = vector.load %arg9[%c0_76, %c0_77, %c128_78] : memref<9x9x512xbf16, #tpu.memory_space<vmem>>, vector<9x9x128xbf16>
      tpu.vector_store %arg9[%c0_76, %c0_77, %c128_78], %84 {strides = array<i32>} : memref<9x9x512xbf16, #tpu.memory_space<vmem>>, vector<9x9x128xbf16>,
      %c0_79 = arith.constant 0 : index
      %c256 = arith.constant 256 : index
      %86 = vector.load %arg3[%c0_79, %c256] : memref<1x512xf32, #tpu.memory_space<vmem>>, vector<1x128xf32>
      %87 = vector.shape_cast %86 : vector<1x128xf32> to vector<1x1x128xf32>
      %c0_80 = arith.constant 0 : index
      %c256_81 = arith.constant 256 : index
      %88 = vector.load %arg4[%c0_80, %c256_81] : memref<1x512xf32, #tpu.memory_space<vmem>>, vector<1x128xf32>
      %89 = vector.shape_cast %88 : vector<1x128xf32> to vector<1x1x128xf32>
      %90 = vector.extract_strided_slice %49 {offsets = [0, 0, 256], sizes = [9, 9, 128], strides = [1, 1, 1]} : vector<9x9x512xbf16> to vector<9x9x128xbf16>
      %91 = arith.extf %90 : vector<9x9x128xbf16> to vector<9x9x128xf32>
      %92 = vector.broadcast %87 : vector<1x1x128xf32> to vector<9x9x128xf32>
      %93 = arith.mulf %91, %92 : vector<9x9x128xf32>
      %94 = vector.broadcast %89 : vector<1x1x128xf32> to vector<9x9x128xf32>
      %95 = arith.addf %93, %94 : vector<9x9x128xf32>
      %cst_82 = arith.constant 0.000000e+00 : f32
      %96 = vector.broadcast %cst_82 : f32 to vector<9x9x128xf32>
      %97 = arith.maximumf %95, %96 : vector<9x9x128xf32>
      %c0_83 = arith.constant 0 : index
      %c0_84 = arith.constant 0 : index
      %c0_85 = arith.constant 0 : index
      %c2_86 = arith.constant 2 : index
      %98 = vector.load %arg5[%c0_83, %c0_84, %c0_85, %c2_86] : memref<1x9x9x4xf32, #tpu.memory_space<vmem>>, vector<1x9x9x1xf32>
      %99 = vector.shape_cast %98 : vector<1x9x9x1xf32> to vector<9x9x1xf32>
      %100 = vector.broadcast %99 : vector<9x9x1xf32> to vector<9x9x128xf32>
      %101 = arith.mulf %97, %100 : vector<9x9x128xf32>
      %102 = arith.truncf %101 : vector<9x9x128xf32> to vector<9x9x128xbf16>
      %c0_87 = arith.constant 0 : index
      %c0_88 = arith.constant 0 : index
      %c256_89 = arith.constant 256 : index
      %103 = vector.load %arg9[%c0_87, %c0_88, %c256_89] : memref<9x9x512xbf16, #tpu.memory_space<vmem>>, vector<9x9x128xbf16>
      tpu.vector_store %arg9[%c0_87, %c0_88, %c256_89], %102 {strides = array<i32>} : memref<9x9x512xbf16, #tpu.memory_space<vmem>>, vector<9x9x128xbf16>,
      %c0_90 = arith.constant 0 : index
      %c384 = arith.constant 384 : index
      %104 = vector.load %arg3[%c0_90, %c384] : memref<1x512xf32, #tpu.memory_space<vmem>>, vector<1x128xf32>
      %105 = vector.shape_cast %104 : vector<1x128xf32> to vector<1x1x128xf32>
      %c0_91 = arith.constant 0 : index
      %c384_92 = arith.constant 384 : index
      %106 = vector.load %arg4[%c0_91, %c384_92] : memref<1x512xf32, #tpu.memory_space<vmem>>, vector<1x128xf32>
      %107 = vector.shape_cast %106 : vector<1x128xf32> to vector<1x1x128xf32>
      %108 = vector.extract_strided_slice %49 {offsets = [0, 0, 384], sizes = [9, 9, 128], strides = [1, 1, 1]} : vector<9x9x512xbf16> to vector<9x9x128xbf16>
      %109 = arith.extf %108 : vector<9x9x128xbf16> to vector<9x9x128xf32>
      %110 = vector.broadcast %105 : vector<1x1x128xf32> to vector<9x9x128xf32>
      %111 = arith.mulf %109, %110 : vector<9x9x128xf32>
      %112 = vector.broadcast %107 : vector<1x1x128xf32> to vector<9x9x128xf32>
      %113 = arith.addf %111, %112 : vector<9x9x128xf32>
      %cst_93 = arith.constant 0.000000e+00 : f32
      %114 = vector.broadcast %cst_93 : f32 to vector<9x9x128xf32>
      %115 = arith.maximumf %113, %114 : vector<9x9x128xf32>
      %c0_94 = arith.constant 0 : index
      %c0_95 = arith.constant 0 : index
      %c0_96 = arith.constant 0 : index
      %c3_97 = arith.constant 3 : index
      %116 = vector.load %arg5[%c0_94, %c0_95, %c0_96, %c3_97] : memref<1x9x9x4xf32, #tpu.memory_space<vmem>>, vector<1x9x9x1xf32>
      %117 = vector.shape_cast %116 : vector<1x9x9x1xf32> to vector<9x9x1xf32>
      %118 = vector.broadcast %117 : vector<9x9x1xf32> to vector<9x9x128xf32>
      %119 = arith.mulf %115, %118 : vector<9x9x128xf32>
      %120 = arith.truncf %119 : vector<9x9x128xf32> to vector<9x9x128xbf16>
      %c0_98 = arith.constant 0 : index
      %c0_99 = arith.constant 0 : index
      %c384_100 = arith.constant 384 : index
      %121 = vector.load %arg9[%c0_98, %c0_99, %c384_100] : memref<9x9x512xbf16, #tpu.memory_space<vmem>>, vector<9x9x128xbf16>
      tpu.vector_store %arg9[%c0_98, %c0_99, %c384_100], %120 {strides = array<i32>} : memref<9x9x512xbf16, #tpu.memory_space<vmem>>, vector<9x9x128xbf16>,
    } else {
    }
    %c0 = arith.constant 0 : index
    %c0_1 = arith.constant 0 : index
    %c0_2 = arith.constant 0 : index
    %3 = vector.load %arg9[%c0, %c0_1, %c0_2] : memref<9x9x512xbf16, #tpu.memory_space<vmem>>, vector<8x8x512xbf16>
    %4 = vector.shape_cast %3 : vector<8x8x512xbf16> to vector<64x512xbf16>
    %c0_3 = arith.constant 0 : index
    %c0_4 = arith.constant 0 : index
    %c0_5 = arith.constant 0 : index
    %5 = vector.load %arg6[%c0_3, %c0_4, %c0_5] : memref<4x512x128xbf16, #tpu.memory_space<vmem>>, vector<1x512x128xbf16>
    %6 = vector.shape_cast %5 : vector<1x512x128xbf16> to vector<512x128xbf16>
    %cst = arith.constant dense<0.000000e+00> : vector<64x128xf32>
    %7 = tpu.matmul %4, %6, %cst {dimension_numbers = #tpu.dot_dimension_numbers<[1], [0], [0], [1], [0, 0, 1, 1], [], []>} : vector<64x512xbf16>, vector<512x128xbf16>, vector<64x128xf32> -> vector<64x128xf32>
    %c0_6 = arith.constant 0 : index
    %c0_7 = arith.constant 0 : index
    %8 = vector.load %arg10[%c0_6, %c0_7] : memref<64x128xf32, #tpu.memory_space<vmem>>, vector<64x128xf32>
    tpu.vector_store %arg10[%c0_6, %c0_7], %7 {strides = array<i32>} : memref<64x128xf32, #tpu.memory_space<vmem>>, vector<64x128xf32>,
    %c0_8 = arith.constant 0 : index
    %c1 = arith.constant 1 : index
    %c0_9 = arith.constant 0 : index
    %9 = vector.load %arg9[%c0_8, %c1, %c0_9] : memref<9x9x512xbf16, #tpu.memory_space<vmem>>, vector<8x8x512xbf16>
    %10 = vector.shape_cast %9 : vector<8x8x512xbf16> to vector<64x512xbf16>
    %c1_10 = arith.constant 1 : index
    %c0_11 = arith.constant 0 : index
    %c0_12 = arith.constant 0 : index
    %11 = vector.load %arg6[%c1_10, %c0_11, %c0_12] : memref<4x512x128xbf16, #tpu.memory_space<vmem>>, vector<1x512x128xbf16>
    %12 = vector.shape_cast %11 : vector<1x512x128xbf16> to vector<512x128xbf16>
    %cst_13 = arith.constant dense<0.000000e+00> : vector<64x128xf32>
    %13 = tpu.matmul %10, %12, %cst_13 {dimension_numbers = #tpu.dot_dimension_numbers<[1], [0], [0], [1], [0, 0, 1, 1], [], []>} : vector<64x512xbf16>, vector<512x128xbf16>, vector<64x128xf32> -> vector<64x128xf32>
    %c0_14 = arith.constant 0 : index
    %c0_15 = arith.constant 0 : index
    %14 = vector.load %arg10[%c0_14, %c0_15] : memref<64x128xf32, #tpu.memory_space<vmem>>, vector<64x128xf32>
    %15 = arith.addf %14, %13 : vector<64x128xf32>
    %c0_16 = arith.constant 0 : index
    %c0_17 = arith.constant 0 : index
    %16 = vector.load %arg10[%c0_16, %c0_17] : memref<64x128xf32, #tpu.memory_space<vmem>>, vector<64x128xf32>
    tpu.vector_store %arg10[%c0_16, %c0_17], %15 {strides = array<i32>} : memref<64x128xf32, #tpu.memory_space<vmem>>, vector<64x128xf32>,
    %c1_18 = arith.constant 1 : index
    %c0_19 = arith.constant 0 : index
    %c0_20 = arith.constant 0 : index
    %17 = vector.load %arg9[%c1_18, %c0_19, %c0_20] : memref<9x9x512xbf16, #tpu.memory_space<vmem>>, vector<8x8x512xbf16>
    %18 = vector.shape_cast %17 : vector<8x8x512xbf16> to vector<64x512xbf16>
    %c2 = arith.constant 2 : index
    %c0_21 = arith.constant 0 : index
    %c0_22 = arith.constant 0 : index
    %19 = vector.load %arg6[%c2, %c0_21, %c0_22] : memref<4x512x128xbf16, #tpu.memory_space<vmem>>, vector<1x512x128xbf16>
    %20 = vector.shape_cast %19 : vector<1x512x128xbf16> to vector<512x128xbf16>
    %cst_23 = arith.constant dense<0.000000e+00> : vector<64x128xf32>
    %21 = tpu.matmul %18, %20, %cst_23 {dimension_numbers = #tpu.dot_dimension_numbers<[1], [0], [0], [1], [0, 0, 1, 1], [], []>} : vector<64x512xbf16>, vector<512x128xbf16>, vector<64x128xf32> -> vector<64x128xf32>
    %c0_24 = arith.constant 0 : index
    %c0_25 = arith.constant 0 : index
    %22 = vector.load %arg10[%c0_24, %c0_25] : memref<64x128xf32, #tpu.memory_space<vmem>>, vector<64x128xf32>
    %23 = arith.addf %22, %21 : vector<64x128xf32>
    %c0_26 = arith.constant 0 : index
    %c0_27 = arith.constant 0 : index
    %24 = vector.load %arg10[%c0_26, %c0_27] : memref<64x128xf32, #tpu.memory_space<vmem>>, vector<64x128xf32>
    tpu.vector_store %arg10[%c0_26, %c0_27], %23 {strides = array<i32>} : memref<64x128xf32, #tpu.memory_space<vmem>>, vector<64x128xf32>,
    %c1_28 = arith.constant 1 : index
    %c1_29 = arith.constant 1 : index
    %c0_30 = arith.constant 0 : index
    %25 = vector.load %arg9[%c1_28, %c1_29, %c0_30] : memref<9x9x512xbf16, #tpu.memory_space<vmem>>, vector<8x8x512xbf16>
    %26 = vector.shape_cast %25 : vector<8x8x512xbf16> to vector<64x512xbf16>
    %c3 = arith.constant 3 : index
    %c0_31 = arith.constant 0 : index
    %c0_32 = arith.constant 0 : index
    %27 = vector.load %arg6[%c3, %c0_31, %c0_32] : memref<4x512x128xbf16, #tpu.memory_space<vmem>>, vector<1x512x128xbf16>
    %28 = vector.shape_cast %27 : vector<1x512x128xbf16> to vector<512x128xbf16>
    %cst_33 = arith.constant dense<0.000000e+00> : vector<64x128xf32>
    %29 = tpu.matmul %26, %28, %cst_33 {dimension_numbers = #tpu.dot_dimension_numbers<[1], [0], [0], [1], [0, 0, 1, 1], [], []>} : vector<64x512xbf16>, vector<512x128xbf16>, vector<64x128xf32> -> vector<64x128xf32>
    %c0_34 = arith.constant 0 : index
    %c0_35 = arith.constant 0 : index
    %30 = vector.load %arg10[%c0_34, %c0_35] : memref<64x128xf32, #tpu.memory_space<vmem>>, vector<64x128xf32>
    %31 = arith.addf %30, %29 : vector<64x128xf32>
    %c0_36 = arith.constant 0 : index
    %c0_37 = arith.constant 0 : index
    %32 = vector.load %arg10[%c0_36, %c0_37] : memref<64x128xf32, #tpu.memory_space<vmem>>, vector<64x128xf32>
    tpu.vector_store %arg10[%c0_36, %c0_37], %31 {strides = array<i32>} : memref<64x128xf32, #tpu.memory_space<vmem>>, vector<64x128xf32>,
    %c0_38 = arith.constant 0 : index
    %c0_39 = arith.constant 0 : index
    %33 = vector.load %arg10[%c0_38, %c0_39] : memref<64x128xf32, #tpu.memory_space<vmem>>, vector<64x128xf32>
    %c0_40 = arith.constant 0 : index
    %c0_41 = arith.constant 0 : index
    %34 = vector.load %arg7[%c0_40, %c0_41] : memref<1x128xf32, #tpu.memory_space<vmem>>, vector<1x128xf32>
    %35 = vector.broadcast %34 : vector<1x128xf32> to vector<64x128xf32>
    %36 = arith.addf %33, %35 : vector<64x128xf32>
    %cst_42 = arith.constant 0.000000e+00 : f32
    %37 = vector.broadcast %cst_42 : f32 to vector<64x128xf32>
    %38 = arith.maximumf %36, %37 : vector<64x128xf32>
    %cst_43 = arith.constant 0.000000e+00 : bf16
    %39 = vector.broadcast %cst_43 : bf16 to vector<10x12x128xbf16>
    %c0_44 = arith.constant 0 : index
    %c0_45 = arith.constant 0 : index
    %c0_46 = arith.constant 0 : index
    %c0_47 = arith.constant 0 : index
    %40 = vector.load %arg8[%c0_44, %c0_45, %c0_46, %c0_47] : memref<1x10x12x128xbf16, #tpu.memory_space<vmem>>, vector<1x10x12x128xbf16>
    %41 = vector.shape_cast %40 : vector<1x10x12x128xbf16> to vector<10x12x128xbf16>
    %42 = vector.shape_cast %39 : vector<10x12x128xbf16> to vector<1x10x12x128xbf16>
    tpu.vector_store %arg8[%c0_44, %c0_45, %c0_46, %c0_47], %42 {strides = array<i32>} : memref<1x10x12x128xbf16, #tpu.memory_space<vmem>>, vector<1x10x12x128xbf16>,
    %43 = vector.shape_cast %38 : vector<64x128xf32> to vector<8x8x128xf32>
    %44 = arith.truncf %43 : vector<8x8x128xf32> to vector<8x8x128xbf16>
    %c0_48 = arith.constant 0 : index
    %c1_49 = arith.constant 1 : index
    %c2_50 = arith.constant 2 : index
    %c0_51 = arith.constant 0 : index
    %45 = vector.load %arg8[%c0_48, %c1_49, %c2_50, %c0_51] : memref<1x10x12x128xbf16, #tpu.memory_space<vmem>>, vector<1x8x8x128xbf16>
    %46 = vector.shape_cast %45 : vector<1x8x8x128xbf16> to vector<8x8x128xbf16>
    %47 = vector.shape_cast %44 : vector<8x8x128xbf16> to vector<1x8x8x128xbf16>
    tpu.vector_store %arg8[%c0_48, %c1_49, %c2_50, %c0_51], %47 {strides = array<i32>} : memref<1x10x12x128xbf16, #tpu.memory_space<vmem>>, vector<1x8x8x128xbf16>,
    return
  }
  func.func @transform_0(%arg0: i32, %arg1: i32) -> (i32, i32, i32, i32) {
    %c0_i32 = arith.constant 0 : i32
    %c0_i32_0 = arith.constant 0 : i32
    %c0_i32_1 = arith.constant 0 : i32
    %c0_i32_2 = arith.constant 0 : i32
    return %arg0, %c0_i32, %c0_i32_0, %c0_i32_1 : i32, i32, i32, i32
  }
  func.func @transform_1(%arg0: i32, %arg1: i32) -> (i32, i32) {
    %c0_i32 = arith.constant 0 : i32
    %c0_i32_0 = arith.constant 0 : i32
    %c0_i32_1 = arith.constant 0 : i32
    return %c0_i32, %c0_i32_0 : i32, i32
  }
  func.func @transform_2(%arg0: i32, %arg1: i32) -> (i32, i32) {
    %c0_i32 = arith.constant 0 : i32
    %c0_i32_0 = arith.constant 0 : i32
    %c0_i32_1 = arith.constant 0 : i32
    return %c0_i32, %c0_i32_0 : i32, i32
  }
  func.func @transform_3(%arg0: i32, %arg1: i32) -> (i32, i32, i32, i32) {
    %c0_i32 = arith.constant 0 : i32
    %c0_i32_0 = arith.constant 0 : i32
    %c0_i32_1 = arith.constant 0 : i32
    %c0_i32_2 = arith.constant 0 : i32
    %c0_i32_3 = arith.constant 0 : i32
    return %c0_i32, %c0_i32_0, %c0_i32_1, %c0_i32_2 : i32, i32, i32, i32
  }
  func.func @transform_4(%arg0: i32, %arg1: i32) -> (i32, i32, i32) {
    %c0_i32 = arith.constant 0 : i32
    %c0_i32_0 = arith.constant 0 : i32
    %c0_i32_1 = arith.constant 0 : i32
    return %c0_i32, %c0_i32_0, %arg1 : i32, i32, i32
  }
  func.func @transform_5(%arg0: i32, %arg1: i32) -> (i32, i32) {
    %c0_i32 = arith.constant 0 : i32
    %c0_i32_0 = arith.constant 0 : i32
    return %c0_i32, %arg1 : i32, i32
  }
  func.func @transform_6(%arg0: i32, %arg1: i32) -> (i32, i32, i32, i32) {
    %c0_i32 = arith.constant 0 : i32
    %c0_i32_0 = arith.constant 0 : i32
    %c0_i32_1 = arith.constant 0 : i32
    return %arg0, %c0_i32, %c0_i32_0, %arg1 : i32, i32, i32, i32
  }
}

module attributes {stable_mosaic.version = 11 : i64} {
  func.func @kernel(%arg0: i32, %arg1: i32, %arg2: memref<1x10x12x128xbf16, #tpu.memory_space<vmem>>, %arg3: memref<5x256x128xbf16, #tpu.memory_space<vmem>>, %arg4: memref<1x8x8x128xbf16, #tpu.memory_space<vmem>>, %arg5: memref<1x128xf32, #tpu.memory_space<vmem>>, %arg6: memref<1x128xf32, #tpu.memory_space<vmem>>, %arg7: memref<128x128xbf16, #tpu.memory_space<vmem>>, %arg8: memref<1x8x8x128xbf16, #tpu.memory_space<vmem>>, %arg9: memref<64x128xf32, #tpu.memory_space<vmem>>) attributes {dimension_semantics = [#tpu.dimension_semantics<parallel>, #tpu.dimension_semantics<parallel>], iteration_bounds = array<i64: 2, 1>, scalar_prefetch = 0 : i64, scratch_operands = 1 : i64, tpu.core_type = #tpu.core_type<tc>, window_params = [{transform_indices = @transform_0, window_bounds = array<i64: 1, 10, 12, 128>}, {transform_indices = @transform_1, window_bounds = array<i64: 5, 256, 128>}, {transform_indices = @transform_2, window_bounds = array<i64: 1, 8, 8, 128>}, {pipeline_mode = #tpu.pipeline_mode<synchronous>, transform_indices = @transform_3, window_bounds = array<i64: 1, 128>}, {pipeline_mode = #tpu.pipeline_mode<synchronous>, transform_indices = @transform_4, window_bounds = array<i64: 1, 128>}, {transform_indices = @transform_5, window_bounds = array<i64: 128, 128>}, {transform_indices = @transform_6, window_bounds = array<i64: 1, 8, 8, 128>}]} {
    %c0 = arith.constant 0 : index
    %c0_0 = arith.constant 0 : index
    %c1 = arith.constant 1 : index
    %c0_1 = arith.constant 0 : index
    %0 = vector.load %arg2[%c0, %c0_0, %c1, %c0_1] : memref<1x10x12x128xbf16, #tpu.memory_space<vmem>>, vector<1x8x8x128xbf16>
    %1 = vector.shape_cast %0 : vector<1x8x8x128xbf16> to vector<8x8x128xbf16>
    %2 = vector.shape_cast %1 : vector<8x8x128xbf16> to vector<64x128xbf16>
    %c0_2 = arith.constant 0 : index
    %c0_3 = arith.constant 0 : index
    %c2 = arith.constant 2 : index
    %c0_4 = arith.constant 0 : index
    %3 = vector.load %arg2[%c0_2, %c0_3, %c2, %c0_4] : memref<1x10x12x128xbf16, #tpu.memory_space<vmem>>, vector<1x8x8x128xbf16>
    %4 = vector.shape_cast %3 : vector<1x8x8x128xbf16> to vector<8x8x128xbf16>
    %5 = vector.shape_cast %4 : vector<8x8x128xbf16> to vector<64x128xbf16>
    %6 = tpu.concatenate %2, %5 in 1 : vector<64x128xbf16>, vector<64x128xbf16> -> vector<64x256xbf16>
    %c0_5 = arith.constant 0 : index
    %c0_6 = arith.constant 0 : index
    %c0_7 = arith.constant 0 : index
    %7 = vector.load %arg3[%c0_5, %c0_6, %c0_7] : memref<5x256x128xbf16, #tpu.memory_space<vmem>>, vector<1x256x128xbf16>
    %8 = vector.shape_cast %7 : vector<1x256x128xbf16> to vector<256x128xbf16>
    %cst = arith.constant dense<0.000000e+00> : vector<64x128xf32>
    %9 = tpu.matmul %6, %8, %cst {dimension_numbers = #tpu.dot_dimension_numbers<[1], [0], [0], [1], [0, 0, 1, 1], [], []>} : vector<64x256xbf16>, vector<256x128xbf16>, vector<64x128xf32> -> vector<64x128xf32>
    %c0_8 = arith.constant 0 : index
    %c0_9 = arith.constant 0 : index
    %10 = vector.load %arg9[%c0_8, %c0_9] : memref<64x128xf32, #tpu.memory_space<vmem>>, vector<64x128xf32>
    tpu.vector_store %arg9[%c0_8, %c0_9], %9 {strides = array<i32>} : memref<64x128xf32, #tpu.memory_space<vmem>>, vector<64x128xf32>,
    %c0_10 = arith.constant 0 : index
    %c0_11 = arith.constant 0 : index
    %c3 = arith.constant 3 : index
    %c0_12 = arith.constant 0 : index
    %11 = vector.load %arg2[%c0_10, %c0_11, %c3, %c0_12] : memref<1x10x12x128xbf16, #tpu.memory_space<vmem>>, vector<1x8x8x128xbf16>
    %12 = vector.shape_cast %11 : vector<1x8x8x128xbf16> to vector<8x8x128xbf16>
    %13 = vector.shape_cast %12 : vector<8x8x128xbf16> to vector<64x128xbf16>
    %c0_13 = arith.constant 0 : index
    %c1_14 = arith.constant 1 : index
    %c1_15 = arith.constant 1 : index
    %c0_16 = arith.constant 0 : index
    %14 = vector.load %arg2[%c0_13, %c1_14, %c1_15, %c0_16] : memref<1x10x12x128xbf16, #tpu.memory_space<vmem>>, vector<1x8x8x128xbf16>
    %15 = vector.shape_cast %14 : vector<1x8x8x128xbf16> to vector<8x8x128xbf16>
    %16 = vector.shape_cast %15 : vector<8x8x128xbf16> to vector<64x128xbf16>
    %17 = tpu.concatenate %13, %16 in 1 : vector<64x128xbf16>, vector<64x128xbf16> -> vector<64x256xbf16>
    %c1_17 = arith.constant 1 : index
    %c0_18 = arith.constant 0 : index
    %c0_19 = arith.constant 0 : index
    %18 = vector.load %arg3[%c1_17, %c0_18, %c0_19] : memref<5x256x128xbf16, #tpu.memory_space<vmem>>, vector<1x256x128xbf16>
    %19 = vector.shape_cast %18 : vector<1x256x128xbf16> to vector<256x128xbf16>
    %cst_20 = arith.constant dense<0.000000e+00> : vector<64x128xf32>
    %20 = tpu.matmul %17, %19, %cst_20 {dimension_numbers = #tpu.dot_dimension_numbers<[1], [0], [0], [1], [0, 0, 1, 1], [], []>} : vector<64x256xbf16>, vector<256x128xbf16>, vector<64x128xf32> -> vector<64x128xf32>
    %c0_21 = arith.constant 0 : index
    %c0_22 = arith.constant 0 : index
    %21 = vector.load %arg9[%c0_21, %c0_22] : memref<64x128xf32, #tpu.memory_space<vmem>>, vector<64x128xf32>
    %22 = arith.addf %21, %20 : vector<64x128xf32>
    %c0_23 = arith.constant 0 : index
    %c0_24 = arith.constant 0 : index
    %23 = vector.load %arg9[%c0_23, %c0_24] : memref<64x128xf32, #tpu.memory_space<vmem>>, vector<64x128xf32>
    tpu.vector_store %arg9[%c0_23, %c0_24], %22 {strides = array<i32>} : memref<64x128xf32, #tpu.memory_space<vmem>>, vector<64x128xf32>,
    %c0_25 = arith.constant 0 : index
    %c1_26 = arith.constant 1 : index
    %c2_27 = arith.constant 2 : index
    %c0_28 = arith.constant 0 : index
    %24 = vector.load %arg2[%c0_25, %c1_26, %c2_27, %c0_28] : memref<1x10x12x128xbf16, #tpu.memory_space<vmem>>, vector<1x8x8x128xbf16>
    %25 = vector.shape_cast %24 : vector<1x8x8x128xbf16> to vector<8x8x128xbf16>
    %26 = vector.shape_cast %25 : vector<8x8x128xbf16> to vector<64x128xbf16>
    %c0_29 = arith.constant 0 : index
    %c1_30 = arith.constant 1 : index
    %c3_31 = arith.constant 3 : index
    %c0_32 = arith.constant 0 : index
    %27 = vector.load %arg2[%c0_29, %c1_30, %c3_31, %c0_32] : memref<1x10x12x128xbf16, #tpu.memory_space<vmem>>, vector<1x8x8x128xbf16>
    %28 = vector.shape_cast %27 : vector<1x8x8x128xbf16> to vector<8x8x128xbf16>
    %29 = vector.shape_cast %28 : vector<8x8x128xbf16> to vector<64x128xbf16>
    %30 = tpu.concatenate %26, %29 in 1 : vector<64x128xbf16>, vector<64x128xbf16> -> vector<64x256xbf16>
    %c2_33 = arith.constant 2 : index
    %c0_34 = arith.constant 0 : index
    %c0_35 = arith.constant 0 : index
    %31 = vector.load %arg3[%c2_33, %c0_34, %c0_35] : memref<5x256x128xbf16, #tpu.memory_space<vmem>>, vector<1x256x128xbf16>
    %32 = vector.shape_cast %31 : vector<1x256x128xbf16> to vector<256x128xbf16>
    %cst_36 = arith.constant dense<0.000000e+00> : vector<64x128xf32>
    %33 = tpu.matmul %30, %32, %cst_36 {dimension_numbers = #tpu.dot_dimension_numbers<[1], [0], [0], [1], [0, 0, 1, 1], [], []>} : vector<64x256xbf16>, vector<256x128xbf16>, vector<64x128xf32> -> vector<64x128xf32>
    %c0_37 = arith.constant 0 : index
    %c0_38 = arith.constant 0 : index
    %34 = vector.load %arg9[%c0_37, %c0_38] : memref<64x128xf32, #tpu.memory_space<vmem>>, vector<64x128xf32>
    %35 = arith.addf %34, %33 : vector<64x128xf32>
    %c0_39 = arith.constant 0 : index
    %c0_40 = arith.constant 0 : index
    %36 = vector.load %arg9[%c0_39, %c0_40] : memref<64x128xf32, #tpu.memory_space<vmem>>, vector<64x128xf32>
    tpu.vector_store %arg9[%c0_39, %c0_40], %35 {strides = array<i32>} : memref<64x128xf32, #tpu.memory_space<vmem>>, vector<64x128xf32>,
    %c0_41 = arith.constant 0 : index
    %c2_42 = arith.constant 2 : index
    %c1_43 = arith.constant 1 : index
    %c0_44 = arith.constant 0 : index
    %37 = vector.load %arg2[%c0_41, %c2_42, %c1_43, %c0_44] : memref<1x10x12x128xbf16, #tpu.memory_space<vmem>>, vector<1x8x8x128xbf16>
    %38 = vector.shape_cast %37 : vector<1x8x8x128xbf16> to vector<8x8x128xbf16>
    %39 = vector.shape_cast %38 : vector<8x8x128xbf16> to vector<64x128xbf16>
    %c0_45 = arith.constant 0 : index
    %c2_46 = arith.constant 2 : index
    %c2_47 = arith.constant 2 : index
    %c0_48 = arith.constant 0 : index
    %40 = vector.load %arg2[%c0_45, %c2_46, %c2_47, %c0_48] : memref<1x10x12x128xbf16, #tpu.memory_space<vmem>>, vector<1x8x8x128xbf16>
    %41 = vector.shape_cast %40 : vector<1x8x8x128xbf16> to vector<8x8x128xbf16>
    %42 = vector.shape_cast %41 : vector<8x8x128xbf16> to vector<64x128xbf16>
    %43 = tpu.concatenate %39, %42 in 1 : vector<64x128xbf16>, vector<64x128xbf16> -> vector<64x256xbf16>
    %c3_49 = arith.constant 3 : index
    %c0_50 = arith.constant 0 : index
    %c0_51 = arith.constant 0 : index
    %44 = vector.load %arg3[%c3_49, %c0_50, %c0_51] : memref<5x256x128xbf16, #tpu.memory_space<vmem>>, vector<1x256x128xbf16>
    %45 = vector.shape_cast %44 : vector<1x256x128xbf16> to vector<256x128xbf16>
    %cst_52 = arith.constant dense<0.000000e+00> : vector<64x128xf32>
    %46 = tpu.matmul %43, %45, %cst_52 {dimension_numbers = #tpu.dot_dimension_numbers<[1], [0], [0], [1], [0, 0, 1, 1], [], []>} : vector<64x256xbf16>, vector<256x128xbf16>, vector<64x128xf32> -> vector<64x128xf32>
    %c0_53 = arith.constant 0 : index
    %c0_54 = arith.constant 0 : index
    %47 = vector.load %arg9[%c0_53, %c0_54] : memref<64x128xf32, #tpu.memory_space<vmem>>, vector<64x128xf32>
    %48 = arith.addf %47, %46 : vector<64x128xf32>
    %c0_55 = arith.constant 0 : index
    %c0_56 = arith.constant 0 : index
    %49 = vector.load %arg9[%c0_55, %c0_56] : memref<64x128xf32, #tpu.memory_space<vmem>>, vector<64x128xf32>
    tpu.vector_store %arg9[%c0_55, %c0_56], %48 {strides = array<i32>} : memref<64x128xf32, #tpu.memory_space<vmem>>, vector<64x128xf32>,
    %c0_57 = arith.constant 0 : index
    %c2_58 = arith.constant 2 : index
    %c3_59 = arith.constant 3 : index
    %c0_60 = arith.constant 0 : index
    %50 = vector.load %arg2[%c0_57, %c2_58, %c3_59, %c0_60] : memref<1x10x12x128xbf16, #tpu.memory_space<vmem>>, vector<1x8x8x128xbf16>
    %51 = vector.shape_cast %50 : vector<1x8x8x128xbf16> to vector<8x8x128xbf16>
    %52 = vector.shape_cast %51 : vector<8x8x128xbf16> to vector<64x128xbf16>
    %c0_61 = arith.constant 0 : index
    %c0_62 = arith.constant 0 : index
    %c1_63 = arith.constant 1 : index
    %c0_64 = arith.constant 0 : index
    %53 = vector.load %arg2[%c0_61, %c0_62, %c1_63, %c0_64] : memref<1x10x12x128xbf16, #tpu.memory_space<vmem>>, vector<1x8x8x128xbf16>
    %54 = vector.shape_cast %53 : vector<1x8x8x128xbf16> to vector<8x8x128xbf16>
    %55 = vector.shape_cast %54 : vector<8x8x128xbf16> to vector<64x128xbf16>
    %56 = tpu.concatenate %52, %55 in 1 : vector<64x128xbf16>, vector<64x128xbf16> -> vector<64x256xbf16>
    %c4 = arith.constant 4 : index
    %c0_65 = arith.constant 0 : index
    %c0_66 = arith.constant 0 : index
    %57 = vector.load %arg3[%c4, %c0_65, %c0_66] : memref<5x256x128xbf16, #tpu.memory_space<vmem>>, vector<1x256x128xbf16>
    %58 = vector.shape_cast %57 : vector<1x256x128xbf16> to vector<256x128xbf16>
    %cst_67 = arith.constant dense<0.000000e+00> : vector<64x128xf32>
    %59 = tpu.matmul %56, %58, %cst_67 {dimension_numbers = #tpu.dot_dimension_numbers<[1], [0], [0], [1], [0, 0, 1, 1], [], []>} : vector<64x256xbf16>, vector<256x128xbf16>, vector<64x128xf32> -> vector<64x128xf32>
    %c0_68 = arith.constant 0 : index
    %c0_69 = arith.constant 0 : index
    %60 = vector.load %arg9[%c0_68, %c0_69] : memref<64x128xf32, #tpu.memory_space<vmem>>, vector<64x128xf32>
    %61 = arith.addf %60, %59 : vector<64x128xf32>
    %c0_70 = arith.constant 0 : index
    %c0_71 = arith.constant 0 : index
    %62 = vector.load %arg9[%c0_70, %c0_71] : memref<64x128xf32, #tpu.memory_space<vmem>>, vector<64x128xf32>
    tpu.vector_store %arg9[%c0_70, %c0_71], %61 {strides = array<i32>} : memref<64x128xf32, #tpu.memory_space<vmem>>, vector<64x128xf32>,
    %c0_72 = arith.constant 0 : index
    %c0_73 = arith.constant 0 : index
    %63 = vector.load %arg5[%c0_72, %c0_73] : memref<1x128xf32, #tpu.memory_space<vmem>>, vector<1x128xf32>
    %64 = vector.shape_cast %63 : vector<1x128xf32> to vector<1x1x128xf32>
    %c0_74 = arith.constant 0 : index
    %c0_75 = arith.constant 0 : index
    %65 = vector.load %arg6[%c0_74, %c0_75] : memref<1x128xf32, #tpu.memory_space<vmem>>, vector<1x128xf32>
    %66 = vector.shape_cast %65 : vector<1x128xf32> to vector<1x1x128xf32>
    %c0_76 = arith.constant 0 : index
    %c0_77 = arith.constant 0 : index
    %c0_78 = arith.constant 0 : index
    %c0_79 = arith.constant 0 : index
    %67 = vector.load %arg4[%c0_76, %c0_77, %c0_78, %c0_79] : memref<1x8x8x128xbf16, #tpu.memory_space<vmem>>, vector<1x8x8x128xbf16>
    %68 = vector.shape_cast %67 : vector<1x8x8x128xbf16> to vector<8x8x128xbf16>
    %69 = arith.extf %68 : vector<8x8x128xbf16> to vector<8x8x128xf32>
    %70 = vector.broadcast %64 : vector<1x1x128xf32> to vector<8x8x128xf32>
    %71 = arith.mulf %69, %70 : vector<8x8x128xf32>
    %72 = vector.broadcast %66 : vector<1x1x128xf32> to vector<8x8x128xf32>
    %73 = arith.addf %71, %72 : vector<8x8x128xf32>
    %cst_80 = arith.constant 0.000000e+00 : f32
    %74 = vector.broadcast %cst_80 : f32 to vector<8x8x128xf32>
    %75 = arith.maximumf %73, %74 : vector<8x8x128xf32>
    %76 = vector.shape_cast %75 : vector<8x8x128xf32> to vector<64x128xf32>
    %77 = arith.truncf %76 : vector<64x128xf32> to vector<64x128xbf16>
    %c0_81 = arith.constant 0 : index
    %c0_82 = arith.constant 0 : index
    %78 = vector.load %arg9[%c0_81, %c0_82] : memref<64x128xf32, #tpu.memory_space<vmem>>, vector<64x128xf32>
    %c0_83 = arith.constant 0 : index
    %c0_84 = arith.constant 0 : index
    %79 = vector.load %arg7[%c0_83, %c0_84] : memref<128x128xbf16, #tpu.memory_space<vmem>>, vector<128x128xbf16>
    %cst_85 = arith.constant dense<0.000000e+00> : vector<64x128xf32>
    %80 = tpu.matmul %77, %79, %cst_85 {dimension_numbers = #tpu.dot_dimension_numbers<[1], [0], [0], [1], [0, 0, 1, 1], [], []>} : vector<64x128xbf16>, vector<128x128xbf16>, vector<64x128xf32> -> vector<64x128xf32>
    %81 = arith.addf %78, %80 : vector<64x128xf32>
    %c0_86 = arith.constant 0 : index
    %c0_87 = arith.constant 0 : index
    %82 = vector.load %arg9[%c0_86, %c0_87] : memref<64x128xf32, #tpu.memory_space<vmem>>, vector<64x128xf32>
    tpu.vector_store %arg9[%c0_86, %c0_87], %81 {strides = array<i32>} : memref<64x128xf32, #tpu.memory_space<vmem>>, vector<64x128xf32>,
    %c0_88 = arith.constant 0 : index
    %c0_89 = arith.constant 0 : index
    %83 = vector.load %arg9[%c0_88, %c0_89] : memref<64x128xf32, #tpu.memory_space<vmem>>, vector<64x128xf32>
    %84 = vector.shape_cast %83 : vector<64x128xf32> to vector<8x8x128xf32>
    %85 = arith.truncf %84 : vector<8x8x128xf32> to vector<8x8x128xbf16>
    %c0_90 = arith.constant 0 : index
    %c0_91 = arith.constant 0 : index
    %c0_92 = arith.constant 0 : index
    %c0_93 = arith.constant 0 : index
    %86 = vector.load %arg8[%c0_90, %c0_91, %c0_92, %c0_93] : memref<1x8x8x128xbf16, #tpu.memory_space<vmem>>, vector<1x8x8x128xbf16>
    %87 = vector.shape_cast %86 : vector<1x8x8x128xbf16> to vector<8x8x128xbf16>
    %88 = vector.shape_cast %85 : vector<8x8x128xbf16> to vector<1x8x8x128xbf16>
    tpu.vector_store %arg8[%c0_90, %c0_91, %c0_92, %c0_93], %88 {strides = array<i32>} : memref<1x8x8x128xbf16, #tpu.memory_space<vmem>>, vector<1x8x8x128xbf16>,
    return
  }
  func.func @transform_0(%arg0: i32, %arg1: i32) -> (i32, i32, i32, i32) {
    %c0_i32 = arith.constant 0 : i32
    %c0_i32_0 = arith.constant 0 : i32
    %c0_i32_1 = arith.constant 0 : i32
    %c0_i32_2 = arith.constant 0 : i32
    return %arg0, %c0_i32, %c0_i32_0, %c0_i32_1 : i32, i32, i32, i32
  }
  func.func @transform_1(%arg0: i32, %arg1: i32) -> (i32, i32, i32) {
    %c0_i32 = arith.constant 0 : i32
    %c0_i32_0 = arith.constant 0 : i32
    %c0_i32_1 = arith.constant 0 : i32
    return %c0_i32, %c0_i32_0, %arg1 : i32, i32, i32
  }
  func.func @transform_2(%arg0: i32, %arg1: i32) -> (i32, i32, i32, i32) {
    %c0_i32 = arith.constant 0 : i32
    %c0_i32_0 = arith.constant 0 : i32
    %c0_i32_1 = arith.constant 0 : i32
    %c0_i32_2 = arith.constant 0 : i32
    return %arg0, %c0_i32, %c0_i32_0, %c0_i32_1 : i32, i32, i32, i32
  }
  func.func @transform_3(%arg0: i32, %arg1: i32) -> (i32, i32) {
    %c0_i32 = arith.constant 0 : i32
    %c0_i32_0 = arith.constant 0 : i32
    %c0_i32_1 = arith.constant 0 : i32
    return %c0_i32, %c0_i32_0 : i32, i32
  }
  func.func @transform_4(%arg0: i32, %arg1: i32) -> (i32, i32) {
    %c0_i32 = arith.constant 0 : i32
    %c0_i32_0 = arith.constant 0 : i32
    %c0_i32_1 = arith.constant 0 : i32
    return %c0_i32, %c0_i32_0 : i32, i32
  }
  func.func @transform_5(%arg0: i32, %arg1: i32) -> (i32, i32) {
    %c0_i32 = arith.constant 0 : i32
    %c0_i32_0 = arith.constant 0 : i32
    return %c0_i32, %arg1 : i32, i32
  }
  func.func @transform_6(%arg0: i32, %arg1: i32) -> (i32, i32, i32, i32) {
    %c0_i32 = arith.constant 0 : i32
    %c0_i32_0 = arith.constant 0 : i32
    %c0_i32_1 = arith.constant 0 : i32
    return %arg0, %c0_i32, %c0_i32_0, %arg1 : i32, i32, i32, i32
  }
}

</mosaic_0001>

<bundles_post_ra>
// kernel: basic_block_forward.3
= control target key start
LH: loop header
LB: loop body
LE: loop exit
PB: predicated region body
PF: predicated region fallthrough
CT: control target
= control target key end

     0   :  { %s3914_s21 = smov 0   ;;  %s3916_s22 = smov 0   ;;  %s4722_s0 = inlined_call_operand.vmem [shape: bf16[2,10,12,128], index: 0, kind: input, shape index: {}]   ;;  %s4723_s1 = inlined_call_operand.vmem [shape: bf16[5,256,128], index: 1, kind: input, shape index: {}]   ;;  %s4724_s2 = inlined_call_operand.vmem [shape: bf16[2,8,8,128], index: 2, kind: input, shape index: {}]   ;;  %s4725_s3 = inlined_call_operand.vmem [shape: f32[1,128], index: 3, kind: input, shape index: {}]   ;;  %s4726_s4 = inlined_call_operand.vmem [shape: f32[1,128], index: 4, kind: input, shape index: {}]   ;;  %s4727_s5 = inlined_call_operand.vmem [shape: bf16[128,128], index: 5, kind: input, shape index: {}]   ;;  %s4728_s6 = inlined_call_operand.vmem [shape: bf16[2,8,8,128], index: 6, kind: output, shape index: {}]  }
   0x1   :  { %s3918_s23 = smov 0  }
   0x2 LB: > { %s28_s24 = sadd.s32 1, %s3873_s22  ;;  %p3092_p0 = scmp.ge.s32.totalorder %s3877_s23, 1  ;;  %s3877_s23 = sphi %s3918_s23, %s16_s23   ;;  %s3873_s22 = sphi %s3916_s22, %s4736_s22   ;;  %s3869_s21 = sphi %s3914_s21, %s4735_s21  }
   0x3   : > { %p30_p1 = scmp.ge.s32.totalorder %s28_s24, 2  ;;  %p254_p2 = scmp.lt.s32.totalorder %s3877_s23, 3 }
   0x5   : > { %s4738_s24 = smov (%p30_p1, %s28_s24), 0  ;;  %p255_p3 = pnand %p3092_p0, %p254_p2 }
   0x6   : > { %p300_p4 = scmp.lt.s32.totalorder (!%p255_p3), %s3869_s21, 1 }
   0x7   : > { %258 = sbr.rel (%p255_p3) target bundleno = 420 (0x1a4), region = 44 }
   0xc   : > { %v3767_v0 = vld [vmem:[%s4723_s1 + $0x78] sm:$0xff]   ;;  %v3771_v4 = vld [vmem:[%s4723_s1 + $0x70] sm:$0xff]   ;;  %v3775_v8 = vld [vmem:[%s4723_s1 + $0x68] sm:$0xff]   ;;  %s4740_s21 = smov (!%p300_p4, %s3869_s21), 1  ;;  %vm482_vm0 = vcmask 1042432   ;;  %vm483_vm1 = vcmask 1046532  }
   0xd   : > { %v3768_v1 = vld [vmem:[%s4723_s1 + $0xf8] sm:$0xff]   ;;  %3506 = vmatprep.subr.bf16.mxu0 %v3767_v0  ;;  %v3772_v5 = vld [vmem:[%s4723_s1 + $0xf0] sm:$0xff]   ;;  %v3776_v9 = vld [vmem:[%s4723_s1 + $0xe8] sm:$0xff]   ;;  %s3742_s17 = smul.u32 80, %s4740_s21  ;;  %vm343_vm3 = vsmask.f32 3328 }
   0xe   : > { %v3769_v2 = vld [vmem:[%s4723_s1 + $0x38] sm:$0xff]   ;;  %3546 = vmatprep.subr.bf16.mxu1 %v3768_v1  ;;  %v3773_v6 = vld [vmem:[%s4723_s1 + $0x30] sm:$0xff]   ;;  %v3777_v10 = vld [vmem:[%s4723_s1 + $0x28] sm:$0xff]   ;;  %vm344_vm4 = vsmask.f32 7440  ;;  %s3462_s30 = sshll.u32 %s4740_s21, 5 }
   0xf   : > { %v3770_v3 = vld [vmem:[%s4723_s1 + $0xb8] sm:$0xff]   ;;  %3507 = vmatpush3.bf16.msra.mxu0 %v3769_v2  ;;  %v3774_v7 = vld [vmem:[%s4723_s1 + $0xb0] sm:$0xff]   ;;  %v3778_v11 = vld [vmem:[%s4723_s1 + $0xa8] sm:$0xff]   ;;  %s4038_s8 = scalar_lea.vmem %s4722_s0, %s3742_s17  ;;  %vm766_vm6 = vsmask.f32 2304  ;;  %s4457_s10 = scalar_lea.vmem %s4724_s2, %s3462_s30 }
  0x10   : > { %3547 = vmatpush3.bf16.msra.mxu1 %v3770_v3  ;;  %3508 = vmatprep.subr.bf16.mxu0 %v3771_v4  ;;  %v3779_v12 = vld [vmem:[%s4723_s1 + $0x60] sm:$0xff]   ;;  %v3783_v16 = vld [vmem:[%s4723_s1 + $0x58] sm:$0xff]   ;;  %v3787_v20 = vld [vmem:[%s4723_s1 + $0x50] sm:$0xff]   ;;  %vm767_vm7 = vsmask.f32 6416  ;;  %s4686_s16 = scalar_lea.vmem %s4728_s6, %s3462_s30 }
  0x11   : > { %3548 = vmatprep.subr.bf16.mxu1 %v3772_v5  ;;  %v3780_v13 = vld [vmem:[%s4723_s1 + $0xe0] sm:$0xff]   ;;  %v3784_v17 = vld [vmem:[%s4723_s1 + $0xd8] sm:$0xff]   ;;  %v3788_v21 = vld [vmem:[%s4723_s1 + $0xd0] sm:$0xff]  }
  0x12   : > { %v3781_v14 = vld [vmem:[%s4723_s1 + $0x20] sm:$0xff]   ;;  %v3785_v18 = vld [vmem:[%s4723_s1 + $0x18] sm:$0xff]   ;;  %v3789_v22 = vld [vmem:[%s4723_s1 + $0x10] sm:$0xff]  }
  0x13   : > { %3509 = vmatpush3.bf16.msra.mxu0 %v3773_v6  ;;  %v3782_v15 = vld [vmem:[%s4723_s1 + $0xa0] sm:$0xff]   ;;  %v3786_v19 = vld [vmem:[%s4723_s1 + $0x98] sm:$0xff]   ;;  %v3790_v23 = vld [vmem:[%s4723_s1 + $0x90] sm:$0xff]  }
  0x14   : > { %3549 = vmatpush3.bf16.msra.mxu1 %v3774_v7  ;;  %3510 = vmatprep.subr.bf16.mxu0 %v3775_v8  ;;  %v3791_v24 = vld [vmem:[%s4723_s1 + $0x48] sm:$0xff]   ;;  %v3795_v28 = vld [vmem:[%s4723_s1 + $0x40] sm:$0xff]   ;;  %vm4044_vm2 = vmor %vm482_vm0, %vm483_vm1 }
  0x15   : > { %3550 = vmatprep.subr.bf16.mxu1 %v3776_v9  ;;  %v3792_v25 = vld [vmem:[%s4723_s1 + $0xc8] sm:$0xff]   ;;  %v3796_v29 = vld [vmem:[%s4723_s1 + $0xc0] sm:$0xff]   ;;  %v3132_v48 = vld [vmem:[%s4038_s8 + $0x10] sm:$0xf] }
  0x16   : > { %v3793_v26 = vld [vmem:[%s4723_s1 + $0x8] sm:$0xff]   ;;  %v3797_v30 = vld [vmem:[%s4723_s1] sm:$0xff]   ;;  %v3133_v49 = vld [vmem:[%s4038_s8 + $0x14] sm:$0x1]  ;;  %v945_v54 = vshrl.u32 %v3132_v48, 16  ;;  %v948_v55 = vshll.u32 %v3132_v48, 16 }
  0x17   : > { %3511 = vmatpush3.bf16.msra.mxu0 %v3777_v10  ;;  %v3794_v27 = vld [vmem:[%s4723_s1 + $0x88] sm:$0xff]   ;;  %v3798_v31 = vld [vmem:[%s4723_s1 + $0x80] sm:$0xff]   ;;  %v3799_v57 = vld [vmem:[%s4723_s1 + $0x178] sm:$0xff]   ;;  %v954_v60 = vshll.u32 %v3133_v49, 16 }
  0x18   : > { %3551 = vmatpush3.bf16.msra.mxu1 %v3778_v11  ;;  %3512 = vmatprep.subr.bf16.mxu0 %v3779_v12  ;;  %v328_v32 = vld [vmem:[%s4038_s8 + $0x4] sm:$0x1]  ;;  %v330_v33 = vld [vmem:[%s4038_s8 + $0xc] sm:$0x1]  ;;  %v458_v34 = vld [vmem:[%s4038_s8] sm:$0xe] }
  0x19   : > { %3552 = vmatprep.subr.bf16.mxu1 %v3780_v13  ;;  %v356_v35 = vshll.u32 %v328_v32, 16  ;;  %v459_v36 = vld [vmem:[%s4038_s8 + $0x8] sm:$0xe]  ;;  %v3098_v38 = vrot.slane %v458_v34, 9  ;;  %v487_v39 = vrot.slane %v328_v32, 5  ;;  %v491_v41 = vrot.slane %v330_v33, 5  ;;  %vm4066_vm5 = vmor %vm343_vm3, %vm344_vm4 }
  0x1a   : > { %v3099_v40 = vrot.slane %v459_v36, 9  ;;  %v370_v43 = vshll.u32 %v330_v33, 16  ;;  %v3130_v45 = vld [vmem:[%s4038_s8 + $0x8] sm:$0xf]  ;;  %v3131_v46 = vld [vmem:[%s4038_s8 + $0xc] sm:$0x1]  ;;  %vm4090_vm8 = vmor %vm766_vm6, %vm767_vm7 }
  0x1b   : > { %3513 = vmatpush3.bf16.msra.mxu0 %v3781_v14  ;;  %v4048_v42 = vrot.slane %v356_v35, 5  ;;  %v488_v44 = vsel %vm4044_vm2, %v3098_v38, %v487_v39  ;;  %v931_v50 = vshrl.u32 %v3130_v45, 16  ;;  %v934_v51 = vshll.u32 %v3130_v45, 16  ;;  %v327_v56 = vld [vmem:[%s4038_s8] sm:$0xf] }
  0x1c   : > { %3553 = vmatpush3.bf16.msra.mxu1 %v3782_v15  ;;  %3514 = vmatprep.subr.bf16.mxu0 %v3783_v16  ;;  %v492_v47 = vsel %vm4044_vm2, %v3099_v40, %v491_v41  ;;  %v940_v53 = vshll.u32 %v3131_v46, 16  ;;  %v329_v61 = vld [vmem:[%s4038_s8 + $0x8] sm:$0xf]  ;;  %v347_v62 = vshrl.u32 %v327_v56, 16  ;;  %v372_v63 = vrot.slane %v370_v43, 5  ;;  %v3800_v40 = vld [vmem:[%s4723_s1 + $0x138] sm:$0xff]  }
  0x1d   : > { %3554 = vmatprep.subr.bf16.mxu1 %v3784_v17  ;;  %v3110_v52 = vcombine.low %v488_v44, %v492_v47  ;;  %v933_v58 = vrot.slane %v931_v50, 4  ;;  %v936_v59 = vrot.slane %v934_v51, 5  ;;  %v947_v0 = vrot.slane %v945_v54, 4  ;;  %v750_v7 = vld [vmem:[%s4038_s8] sm:$0xe] }
  0x1e   : > { %v950_v1 = vrot.slane %v948_v55, 5  ;;  %v350_v2 = vshll.u32 %v327_v56, 16  ;;  %v942_v4 = vrot.slane %v940_v53, 5  ;;  %v349_v5 = vrot.slane %v347_v62, 4  ;;  %v751_v13 = vld [vmem:[%s4038_s8 + $0x4] sm:$0x3] }
  0x1f   : > { %3515 = vmatpush3.bf16.msra.mxu0 %v3785_v18  ;;  %709 = vmatprep.mubr.bf16.mxu0 %v3110_v52  ;;  %v937_v3 = vor.u32 %v936_v59, %v933_v58  ;;  %v361_v6 = vshrl.u32 %v329_v61, 16  ;;  %v956_v10 = vrot.slane %v954_v60, 5  ;;  %v364_v12 = vshll.u32 %v329_v61, 16  ;;  %v752_v16 = vld [vmem:[%s4038_s8 + $0x8] sm:$0xe]  ;;  %v3803_v53 = vld [vmem:[%s4723_s1 + $0x170] sm:$0xff]  }
  0x20   : > { %3555 = vmatpush3.bf16.msra.mxu1 %v3786_v19  ;;  %3516 = vmatprep.subr.bf16.mxu0 %v3787_v20  ;;  %v951_v9 = vor.u32 %v950_v1, %v947_v0  ;;  %v352_v11 = vrot.slane %v350_v2, 5  ;;  %v753_v20 = vld [vmem:[%s4038_s8 + $0xc] sm:$0x3]  ;;  %v788_v38 = vshrl.u32 %v752_v16, 16  ;;  %v791_v39 = vshll.u32 %v752_v16, 16  ;;  %v3804_v55 = vld [vmem:[%s4723_s1 + $0x130] sm:$0xff]  }
  0x21   : > { %3556 = vmatprep.subr.bf16.mxu1 %v3788_v21  ;;  %v938_v14 = vrot.slane %v937_v3, 4  ;;  %v363_v15 = vrot.slane %v361_v6, 4  ;;  %v366_v19 = vrot.slane %v364_v12, 5  ;;  %v770_v21 = vshrl.u32 %v750_v7, 16  ;;  %v332_v58 = vld [vmem:[%s4038_s8 + $0x14] sm:$0x1] }
  0x22   : > { %v952_v17 = vrot.slane %v951_v9, 4  ;;  %v353_v18 = vor.u32 %v352_v11, %v349_v5  ;;  %v797_v44 = vshrl.u32 %v753_v20, 16  ;;  %v800_v45 = vshll.u32 %v753_v20, 16  ;;  %v4104_v59 = vld [vmem:[%s4038_s8 + $0x1c] sm:$0x1]  ;;  %v3805_v3 = vld [vmem:[%s4723_s1 + $0x1f0] sm:$0xff]  }
  0x23   : > { %3517 = vmatpush3.bf16.msra.mxu0 %v3789_v22  ;;  %v3801_v22 = vld [vmem:[%s4723_s1 + $0x1f8] sm:$0xff]   ;;  %v790_v47 = vrot.slane %v788_v38, 5  ;;  %v793_v48 = vrot.slane %v791_v39, 6  ;;  %v460_v60 = vld [vmem:[%s4038_s8 + $0x10] sm:$0xe]  ;;  %v495_v1 = vrot.slane %v332_v58, 5 }
  0x24   : > { %3557 = vmatpush3.bf16.msra.mxu1 %v3790_v23  ;;  %3518 = vmatprep.subr.bf16.mxu0 %v3791_v24  ;;  %v943_v23 = vsel %vm4066_vm5, %v938_v14, %v942_v4  ;;  %v773_v24 = vshll.u32 %v750_v7, 16  ;;  %v799_v51 = vrot.slane %v797_v44, 5  ;;  %v802_v52 = vrot.slane %v800_v45, 6  ;;  %v3802_v62 = vld [vmem:[%s4723_s1 + $0x1b8] sm:$0xff]   ;;  %v3137_v11 = vld [vmem:[%s4038_s8 + $0x24] sm:$0x1] }
  0x25   : > { %3558 = vmatprep.subr.bf16.mxu1 %v3792_v25  ;;  %v779_v25 = vshrl.u32 %v751_v13, 16  ;;  %v794_v54 = vor.u32 %v793_v48, %v790_v47  ;;  %v3100_v0 = vrot.slane %v460_v60, 9  ;;  %v499_v2 = vrot.slane %v4104_v59, 5  ;;  %v3134_v5 = vld [vmem:[%s4038_s8 + $0x18] sm:$0xf]  ;;  %v3809_v47 = vld [vmem:[%s4723_s1 + $0x1e8] sm:$0xff]  }
  0x26   : > { %v775_v32 = vrot.slane %v773_v24, 6  ;;  %v3135_v6 = vld [vmem:[%s4038_s8 + $0x1c] sm:$0x1]  ;;  %v959_v12 = vshrl.u32 %v3134_v5, 16  ;;  %v3807_v24 = vld [vmem:[%s4723_s1 + $0x168] sm:$0xff]  }
  0x27   : > { %3519 = vmatpush3.bf16.msra.mxu0 %v3793_v26  ;;  %v782_v26 = vshll.u32 %v751_v13, 16  ;;  %v781_v33 = vrot.slane %v779_v25, 5  ;;  %v795_v61 = vrot.slane %v794_v54, 4  ;;  %v496_v9 = vsel %vm4044_vm2, %v3100_v0, %v495_v1 }
  0x28   : > { %3559 = vmatpush3.bf16.msra.mxu1 %v3794_v27  ;;  %3520 = vmatprep.subr.bf16.mxu0 %v3795_v28  ;;  %v957_v27 = vsel %vm4066_vm5, %v952_v17, %v956_v10  ;;  %v354_v28 = vrot.slane %v353_v18, 4  ;;  %v3136_v10 = vld [vmem:[%s4038_s8 + $0x20] sm:$0xf]  ;;  %v962_v13 = vshll.u32 %v3134_v5, 16  ;;  %v968_v16 = vshll.u32 %v3135_v6, 16 }
  0x29   : > { %3560 = vmatprep.subr.bf16.mxu1 %v3796_v29  ;;  %v367_v29 = vor.u32 %v366_v19, %v363_v15  ;;  %v784_v34 = vrot.slane %v782_v26, 6  ;;  %v973_v17 = vshrl.u32 %v3136_v10, 16  ;;  %v961_v19 = vrot.slane %v959_v12, 4 }
  0x2a   : > { %v359_v35 = vsel %vm4066_vm5, %v354_v28, %v4048_v42  ;;  %v964_v20 = vrot.slane %v962_v13, 5  ;;  %v970_v25 = vrot.slane %v968_v16, 5  ;;  %v333_v28 = vld [vmem:[%s4038_s8 + $0x18] sm:$0xf] }
  0x2b   : > { %3521 = vmatpush3.bf16.msra.mxu0 %v3797_v30  ;;  %v772_v30 = vrot.slane %v770_v21, 5  ;;  %v368_v36 = vrot.slane %v367_v29, 4  ;;  %v785_v43 = vor.u32 %v784_v34, %v781_v33  ;;  %v976_v21 = vshll.u32 %v3136_v10, 16  ;;  %v754_v34 = vld [vmem:[%s4038_s8 + $0x10] sm:$0xe] }
  0x2c   : > { %3561 = vmatpush3.bf16.msra.mxu1 %v3798_v31  ;;  %3586 = vmatprep.subr.bf16.mxu0 %v3799_v57  ;;  %v3150_v31 = vcombine.low %v943_v23, %v957_v27  ;;  %v803_v57 = vor.u32 %v802_v52, %v799_v51  ;;  %v331_v23 = vld [vmem:[%s4038_s8 + $0x10] sm:$0xf]  ;;  %v975_v26 = vrot.slane %v973_v17, 4  ;;  %v982_v27 = vshll.u32 %v3137_v11, 16  ;;  %v756_v51 = vld [vmem:[%s4038_s8 + $0x18] sm:$0xe] }
  0x2d   : > { %3626 = vmatprep.subr.bf16.mxu1 %v3801_v22  ;;  %v776_v41 = vor.u32 %v775_v32, %v772_v30  ;;  %v373_v46 = vsel %vm4066_vm5, %v368_v36, %v372_v63  ;;  %v461_v63 = vld [vmem:[%s4038_s8 + $0x18] sm:$0xe]  ;;  %v3806_v22 = vld [vmem:[%s4723_s1 + $0x1b0] sm:$0xff]   ;;  %v375_v29 = vshrl.u32 %v331_v23, 16  ;;  %v965_v30 = vor.u32 %v964_v20, %v961_v19 }
  0x2e   : > { %1235 = vmatprep.mubr.bf16.mxu1 %v3150_v31  ;;  %v3106_v49 = vcombine.low %v359_v35, %v373_v46  ;;  %v3101_v4 = vrot.slane %v461_v63, 9  ;;  %v804_v7 = vsel %vm4090_vm8, %v795_v61, %v803_v57  ;;  %v978_v31 = vrot.slane %v976_v21, 5  ;;  %v3808_v35 = vld [vmem:[%s4723_s1 + $0x128] sm:$0xff]   ;;  %v755_v46 = vld [vmem:[%s4038_s8 + $0x14] sm:$0x3] }
  0x2f   : > { %v777_v50 = vrot.slane %v776_v41, 4  ;;  %v378_v32 = vshll.u32 %v331_v23, 16  ;;  %v384_v33 = vshll.u32 %v332_v58, 16  ;;  %v984_v36 = vrot.slane %v982_v27, 5  ;;  %v3810_v63 = vld [vmem:[%s4723_s1 + $0x1a8] sm:$0xff]  }
  0x30   : > { %710 = vmatmul.mubr.bf16.vlgmr.msra.gmra.mxu0 %v3106_v49  ;;  %v500_v15 = vsel %vm4044_vm2, %v3101_v4, %v499_v2  ;;  %v377_v38 = vrot.slane %v375_v29, 4  ;;  %v389_v39 = vshrl.u32 %v333_v28, 16  ;;  %v966_v41 = vrot.slane %v965_v30, 4  ;;  %v4168_v29 = vld [vmem:[%s4038_s8 + $0x2c] sm:$0x1] }
  0x31   : > { %v786_v56 = vsel %vm4090_vm8, %v777_v50, %v785_v43  ;;  %3587 = vmatpush3.bf16.msra.mxu0 %v3800_v40  ;;  %v3111_v18 = vcombine.low %v496_v9, %v500_v15  ;;  %v392_v40 = vshll.u32 %v333_v28, 16  ;;  %v979_v43 = vor.u32 %v978_v31, %v975_v26  ;;  %v3812_v9 = vld [vmem:[%s4723_s1 + $0x120] sm:$0xff]   ;;  %v463_v31 = vld [vmem:[%s4038_s8 + $0x28] sm:$0xe] }
  0x32   : > { %3588 = vmatprep.subr.bf16.mxu0 %v3803_v53  ;;  %v3146_v14 = vcombine.low %v786_v56, %v804_v7  ;;  %v380_v44 = vrot.slane %v378_v32, 5  ;;  %v386_v45 = vrot.slane %v384_v33, 5  ;;  %v391_v48 = vrot.slane %v389_v39, 4  ;;  %v757_v56 = vld [vmem:[%s4038_s8 + $0x1c] sm:$0x3] }
  0x33   : > { %717 = vmatprep.mubr.bf16.mxu0 %v3111_v18  ;;  %v394_v49 = vrot.slane %v392_v40, 5  ;;  %v398_v50 = vshll.u32 %v4104_v59, 16  ;;  %v806_v52 = vshrl.u32 %v754_v34, 16  ;;  %v971_v53 = vsel %vm4066_vm5, %v966_v41, %v970_v25  ;;  %v3813_v18 = vld [vmem:[%s4723_s1 + $0x1e0] sm:$0xff]   ;;  %v3139_v39 = vld [vmem:[%s4038_s8 + $0x2c] sm:$0x1] }
  0x34   : > { %1236 = vmatmul.mubr.bf16.vlgmr.msra.gmra.mxu1 %v3146_v14  ;;  %v980_v54 = vrot.slane %v979_v43, 4  ;;  %v809_v57 = vshll.u32 %v754_v34, 16  ;;  %v818_v2 = vshll.u32 %v755_v46, 16  ;;  %v824_v7 = vshrl.u32 %v756_v51, 16  ;;  %v336_v26 = vld [vmem:[%s4038_s8 + $0x24] sm:$0x1] }
  0x35   : > { %3589 = vmatpush3.bf16.msra.mxu0 %v3804_v55  ;;  %3627 = vmatpush3.bf16.msra.mxu1 %v3802_v62  ;;  %v381_v55 = vor.u32 %v380_v44, %v377_v38  ;;  %v395_v58 = vor.u32 %v394_v49, %v391_v48  ;;  %v400_v60 = vrot.slane %v398_v50, 5  ;;  %v808_v61 = vrot.slane %v806_v52, 5  ;;  %v462_v30 = vld [vmem:[%s4038_s8 + $0x20] sm:$0xe]  ;;  %v3140_v40 = vld [vmem:[%s4038_s8 + $0x30] sm:$0xf] }
  0x36   : > { %3628 = vmatprep.subr.bf16.mxu1 %v3805_v3  ;;  %3590 = vmatprep.subr.bf16.mxu0 %v3807_v24  ;;  %v815_v62 = vshrl.u32 %v755_v46, 16  ;;  %v985_v59 = vsel %vm4066_vm5, %v980_v54, %v984_v36  ;;  %v811_v1 = vrot.slane %v809_v57, 6  ;;  %v3811_v3 = vld [vmem:[%s4723_s1 + $0x160] sm:$0xff]   ;;  %v820_v12 = vrot.slane %v818_v2, 6  ;;  %v3138_v36 = vld [vmem:[%s4038_s8 + $0x28] sm:$0xf] }
  0x37   : > { %v382_v0 = vrot.slane %v381_v55, 4  ;;  %v3151_v4 = vcombine.low %v971_v53, %v985_v59  ;;  %v396_v5 = vrot.slane %v395_v58, 4  ;;  %v827_v13 = vshll.u32 %v756_v51, 16  ;;  %v3814_v52 = vld [vmem:[%s4723_s1 + $0x1a0] sm:$0xff]   ;;  %v3815_v53 = vld [vmem:[%s4723_s1 + $0x158] sm:$0xff]  }
  0x38   : > { %v817_v6 = vrot.slane %v815_v62, 5  ;;  %v812_v11 = vor.u32 %v811_v1, %v808_v61  ;;  %v826_v15 = vrot.slane %v824_v7, 5  ;;  %v833_v16 = vshrl.u32 %v757_v56, 16  ;;  %v335_v58 = vld [vmem:[%s4038_s8 + $0x20] sm:$0xf] }
  0x39   : > { %3591 = vmatpush3.bf16.msra.mxu0 %v3808_v35  ;;  %3629 = vmatpush3.bf16.msra.mxu1 %v3806_v22  ;;  %v387_v10 = vsel %vm4066_vm5, %v382_v0, %v386_v45  ;;  %v401_v14 = vsel %vm4066_vm5, %v396_v5, %v400_v60  ;;  %v836_v17 = vshll.u32 %v757_v56, 16  ;;  %v829_v22 = vrot.slane %v827_v13, 6  ;;  %v3141_v45 = vld [vmem:[%s4038_s8 + $0x34] sm:$0x1]  ;;  %v3816_v60 = vld [vmem:[%s4723_s1 + $0x118] sm:$0xff]  }
  0x3a   : > { %3630 = vmatprep.subr.bf16.mxu1 %v3809_v47  ;;  %3592 = vmatprep.subr.bf16.mxu0 %v3811_v3  ;;  %v3107_v19 = vcombine.low %v387_v10, %v401_v14  ;;  %v813_v20 = vrot.slane %v812_v11, 4  ;;  %v821_v21 = vor.u32 %v820_v12, %v817_v6  ;;  %v835_v23 = vrot.slane %v833_v16, 5  ;;  %v758_v5 = vld [vmem:[%s4038_s8 + $0x20] sm:$0xe]  ;;  %v3817_v6 = vld [vmem:[%s4723_s1 + $0x1d8] sm:$0xff]  }
  0x3b   : > { %1243 = vmatprep.mubr.bf16.mxu1 %v3151_v4  ;;  %v838_v24 = vrot.slane %v836_v17, 6  ;;  %v830_v25 = vor.u32 %v829_v22, %v826_v15  ;;  %v3102_v33 = vrot.slane %v462_v30, 9  ;;  %v503_v34 = vrot.slane %v336_v26, 5  ;;  %v759_v12 = vld [vmem:[%s4038_s8 + $0x24] sm:$0x3]  ;;  %v3820_v30 = vld [vmem:[%s4723_s1 + $0x110] sm:$0xff]  }
  0x3c   : > { %718 = vmatmul.mubr.bf16.gmra.mxu0 %v3107_v19  ;;  %v822_v27 = vsel %vm4090_vm8, %v813_v20, %v821_v21  ;;  %v3103_v35 = vrot.slane %v463_v31, 9  ;;  %v507_v38 = vrot.slane %v4168_v29, 5  ;;  %v987_v41 = vshrl.u32 %v3138_v36, 16  ;;  %v760_v17 = vld [vmem:[%s4038_s8 + $0x28] sm:$0xe] }
  0x3d   : > { %3631 = vmatpush3.bf16.msra.mxu1 %v3810_v63  ;;  %3593 = vmatpush3.bf16.msra.mxu0 %v3812_v9  ;;  %v839_v28 = vor.u32 %v838_v24, %v835_v23  ;;  %v831_v32 = vrot.slane %v830_v25, 4  ;;  %v504_v44 = vsel %vm4044_vm2, %v3102_v33, %v503_v34  ;;  %v990_v46 = vshll.u32 %v3138_v36, 16  ;;  %v337_v63 = vld [vmem:[%s4038_s8 + $0x28] sm:$0xf]  ;;  %v761_v22 = vld [vmem:[%s4038_s8 + $0x2c] sm:$0x3] }
  0x3e   : > { %3632 = vmatprep.subr.bf16.mxu1 %v3813_v18  ;;  %v996_v47 = vshll.u32 %v3139_v39, 16  ;;  %v508_v49 = vsel %vm4044_vm2, %v3103_v35, %v507_v38  ;;  %v989_v50 = vrot.slane %v987_v41, 4  ;;  %v1001_v51 = vshrl.u32 %v3140_v40, 16  ;;  %3594 = vmatprep.subr.bf16.mxu0 %v3815_v53  ;;  %v3818_v18 = vld [vmem:[%s4723_s1 + $0x198] sm:$0xff]   ;;  %v3819_v24 = vld [vmem:[%s4723_s1 + $0x150] sm:$0xff]  }
  0x3f   : > { %v840_v43 = vsel %vm4090_vm8, %v831_v32, %v839_v28  ;;  %v3112_v54 = vcombine.low %v504_v44, %v508_v49  ;;  %v992_v55 = vrot.slane %v990_v46, 5  ;;  %v1004_v57 = vshll.u32 %v3140_v40, 16  ;;  %v3821_v34 = vld [vmem:[%s4723_s1 + $0x1d0] sm:$0xff]  }
  0x40   : > { %v3147_v48 = vcombine.low %v822_v27, %v840_v43  ;;  %v998_v56 = vrot.slane %v996_v47, 5  ;;  %v1003_v61 = vrot.slane %v1001_v51, 4  ;;  %v1010_v62 = vshll.u32 %v3141_v45, 16  ;;  %v3822_v40 = vld [vmem:[%s4723_s1 + $0x190] sm:$0xff]  }
  0x41   : > { %v403_v59 = vshrl.u32 %v335_v58, 16  ;;  %v406_v0 = vshll.u32 %v335_v58, 16  ;;  %725 = vmatprep.mubr.bf16.mxu0 %v3112_v54  ;;  %v993_v1 = vor.u32 %v992_v55, %v989_v50  ;;  %v1006_v2 = vrot.slane %v1004_v57, 5  ;;  %3633 = vmatpush3.bf16.msra.mxu1 %v3814_v52  ;;  %v3823_v50 = vld [vmem:[%s4723_s1 + $0x148] sm:$0xff]  }
  0x42   : > { %1244 = vmatmul.mubr.bf16.gmra.mxu1 %v3147_v48  ;;  %v412_v3 = vshll.u32 %v336_v26, 16  ;;  %v417_v4 = vshrl.u32 %v337_v63, 16  ;;  %v1012_v7 = vrot.slane %v1010_v62, 5  ;;  %v420_v11 = vshll.u32 %v337_v63, 16  ;;  %3595 = vmatpush3.bf16.msra.mxu0 %v3816_v60  ;;  %v340_v62 = vld [vmem:[%s4038_s8 + $0x34] sm:$0x1] }
  0x43   : > { %v405_v9 = vrot.slane %v403_v59, 4  ;;  %v408_v10 = vrot.slane %v406_v0, 5  ;;  %v994_v13 = vrot.slane %v993_v1, 4  ;;  %v1007_v14 = vor.u32 %v1006_v2, %v1003_v61  ;;  %3634 = vmatprep.subr.bf16.mxu1 %v3817_v6  ;;  %3596 = vmatprep.subr.bf16.mxu0 %v3819_v24  ;;  %v4232_v0 = vld [vmem:[%s4038_s8 + $0x3c] sm:$0x1] }
  0x44   : > { %v414_v15 = vrot.slane %v412_v3, 5  ;;  %v419_v16 = vrot.slane %v417_v4, 4  ;;  %v422_v20 = vrot.slane %v420_v11, 5  ;;  %v426_v21 = vshll.u32 %v4168_v29, 16  ;;  %v464_v1 = vld [vmem:[%s4038_s8 + $0x30] sm:$0xe] }
  0x45   : > { %v409_v19 = vor.u32 %v408_v10, %v405_v9  ;;  %v842_v23 = vshrl.u32 %v758_v5, 16  ;;  %v999_v25 = vsel %vm4066_vm5, %v994_v13, %v998_v56  ;;  %v1008_v26 = vrot.slane %v1007_v14, 4  ;;  %3635 = vmatpush3.bf16.msra.mxu1 %v3818_v18  ;;  %v465_v2 = vld [vmem:[%s4038_s8 + $0x38] sm:$0xe]  ;;  %v3143_v10 = vld [vmem:[%s4038_s8 + $0x3c] sm:$0x1] }
  0x46   : > { %v845_v27 = vshll.u32 %v758_v5, 16  ;;  %v851_v28 = vshrl.u32 %v759_v12, 16  ;;  %v423_v32 = vor.u32 %v422_v20, %v419_v16  ;;  %v428_v29 = vrot.slane %v426_v21, 5  ;;  %3597 = vmatpush3.bf16.msra.mxu0 %v3820_v30  ;;  %3636 = vmatprep.subr.bf16.mxu1 %v3821_v34  ;;  %v3144_v11 = vld [vmem:[%s4038_s8 + $0x40] sm:$0xf] }
  0x47   : > { %v410_v31 = vrot.slane %v409_v19, 4  ;;  %v844_v33 = vrot.slane %v842_v23, 5  ;;  %v1013_v35 = vsel %vm4066_vm5, %v1008_v26, %v1012_v7  ;;  %v854_v39 = vshll.u32 %v759_v12, 16  ;;  %3598 = vmatprep.subr.bf16.mxu0 %v3823_v50  ;;  %v3142_v7 = vld [vmem:[%s4038_s8 + $0x38] sm:$0xf] }
  0x48   : > { %v847_v36 = vrot.slane %v845_v27, 6  ;;  %v853_v38 = vrot.slane %v851_v28, 5  ;;  %v3152_v41 = vcombine.low %v999_v25, %v1013_v35  ;;  %v424_v44 = vrot.slane %v423_v32, 4  ;;  %v341_v27 = vld [vmem:[%s4038_s8 + $0x38] sm:$0xf]  ;;  %v3824_v28 = vld [vmem:[%s4723_s1 + $0x108] sm:$0xff]  }
  0x49   : > { %v415_v43 = vsel %vm4066_vm5, %v410_v31, %v414_v15  ;;  %v860_v45 = vshrl.u32 %v760_v17, 16  ;;  %v856_v47 = vrot.slane %v854_v39, 6  ;;  %v863_v48 = vshll.u32 %v760_v17, 16  ;;  %3637 = vmatpush3.bf16.msra.mxu1 %v3822_v40  ;;  %v3145_v15 = vld [vmem:[%s4038_s8 + $0x44] sm:$0x1]  ;;  %v3825_v39 = vld [vmem:[%s4723_s1 + $0x1c8] sm:$0xff]  }
  0x4a   : > { %v848_v46 = vor.u32 %v847_v36, %v844_v33  ;;  %v869_v49 = vshrl.u32 %v761_v22, 16  ;;  %1251 = vmatprep.mubr.bf16.mxu1 %v3152_v41  ;;  %v429_v51 = vsel %vm4066_vm5, %v424_v44, %v428_v29  ;;  %v872_v53 = vshll.u32 %v761_v22, 16  ;;  %v339_v22 = vld [vmem:[%s4038_s8 + $0x30] sm:$0xf]  ;;  %3599 = vmatpush3.bf16.msra.mxu0 %v3824_v28  ;;  %v764_v50 = vld [vmem:[%s4038_s8 + $0x38] sm:$0xe] }
  0x4b   : > { %v862_v52 = vrot.slane %v860_v45, 5  ;;  %v3108_v54 = vcombine.low %v415_v43, %v429_v51  ;;  %v857_v56 = vor.u32 %v856_v47, %v853_v38  ;;  %v865_v57 = vrot.slane %v863_v48, 6  ;;  %v762_v38 = vld [vmem:[%s4038_s8 + $0x30] sm:$0xe]  ;;  %v763_v45 = vld [vmem:[%s4038_s8 + $0x34] sm:$0x3]  ;;  %3638 = vmatprep.subr.bf16.mxu1 %v3825_v39 }
  0x4c   : > { %v849_v55 = vrot.slane %v848_v46, 4  ;;  %v871_v58 = vrot.slane %v869_v49, 5  ;;  %v874_v60 = vrot.slane %v872_v53, 6  ;;  %v3104_v4 = vrot.slane %v464_v1, 9  ;;  %v3826_v51 = vld [vmem:[%s4723_s1 + $0x188] sm:$0xff]  }
  0x4d   : > { %726 = vmatmul.mubr.bf16.gmra.mxu0 %v3108_v54  ;;  %v866_v61 = vor.u32 %v865_v57, %v862_v52  ;;  %v511_v5 = vrot.slane %v340_v62, 5  ;;  %v3105_v6 = vrot.slane %v465_v2, 9  ;;  %v515_v9 = vrot.slane %v4232_v0, 5  ;;  %v3827_v57 = vld [vmem:[%s4723_s1 + $0x140] sm:$0xff]   ;;  %3639 = vmatpush3.bf16.msra.mxu1 %v3826_v51  ;;  %v3203_v51 = vld [vmem:[%s4038_s8 + $0xc] sm:$0x1] }
  0x4e   : > { %v858_v63 = vsel %vm4090_vm8, %v849_v55, %v857_v56  ;;  %v875_v59 = vor.u32 %v874_v60, %v871_v58  ;;  %v1015_v12 = vshrl.u32 %v3142_v7, 16  ;;  %v1018_v16 = vshll.u32 %v3142_v7, 16  ;;  %v765_v55 = vld [vmem:[%s4038_s8 + $0x3c] sm:$0x3]  ;;  %3600 = vmatprep.subr.bf16.mxu0 %v3827_v57 }
  0x4f   : > { %v867_v3 = vrot.slane %v866_v61, 4  ;;  %v512_v14 = vsel %vm4044_vm2, %v3104_v4, %v511_v5  ;;  %v1024_v17 = vshll.u32 %v3143_v10, 16  ;;  %v516_v19 = vsel %vm4044_vm2, %v3105_v6, %v515_v9  ;;  %v3830_v9 = vld [vmem:[%s4723_s1 + $0x180] sm:$0xff]  }
  0x50   : > { %v1017_v20 = vrot.slane %v1015_v12, 4  ;;  %v1029_v21 = vshrl.u32 %v3144_v11, 16  ;;  %v3113_v23 = vcombine.low %v512_v14, %v516_v19  ;;  %v1020_v24 = vrot.slane %v1018_v16, 5 }
  0x51   : > { %v876_v13 = vsel %vm4090_vm8, %v867_v3, %v875_v59  ;;  %v1026_v25 = vrot.slane %v1024_v17, 5  ;;  %v1032_v26 = vshll.u32 %v3144_v11, 16  ;;  %v1038_v31 = vshll.u32 %v3145_v15, 16  ;;  %v3829_v3 = vld [vmem:[%s4723_s1 + $0x1c0] sm:$0xff]  }
  0x52   : > { %v3148_v18 = vcombine.low %v858_v63, %v876_v13  ;;  %v1031_v30 = vrot.slane %v1029_v21, 4  ;;  %v431_v32 = vshrl.u32 %v339_v22, 16  ;;  %v434_v29 = vshll.u32 %v339_v22, 16  ;;  %733 = vmatprep.mubr.bf16.mxu0 %v3113_v23  ;;  %v3828_v63 = vld [vmem:[%s4723_s1 + $0x100] sm:$0xff]   ;;  %3640 = vmatprep.subr.bf16.mxu1 %v3829_v3 }
  0x53   : > { %v1021_v33 = vor.u32 %v1020_v24, %v1017_v20  ;;  %v1034_v34 = vrot.slane %v1032_v26, 5  ;;  %v440_v35 = vshll.u32 %v340_v62, 16  ;;  %v445_v36 = vshrl.u32 %v341_v27, 16  ;;  %3601 = vmatpush3.bf16.msra.mxu0 %v3828_v63  ;;  %3641 = vmatpush3.bf16.msra.mxu1 %v3830_v9 }
  0x54   : > { %1252 = vmatmul.mubr.bf16.gmra.mxu1 %v3148_v18  ;;  %v1040_v40 = vrot.slane %v1038_v31, 5  ;;  %v433_v41 = vrot.slane %v431_v32, 4  ;;  %v436_v43 = vrot.slane %v434_v29, 5  ;;  %v448_v44 = vshll.u32 %v341_v27, 16  ;;  %v3831_v18 = vld [vmem:[%s4723_s1 + $0x278] sm:$0xff]  }
  0x55   : > { %v1022_v46 = vrot.slane %v1021_v33, 4  ;;  %v1035_v47 = vor.u32 %v1034_v34, %v1031_v30  ;;  %v442_v48 = vrot.slane %v440_v35, 5  ;;  %v447_v49 = vrot.slane %v445_v36, 4  ;;  %3666 = vmatprep.subr.bf16.mxu0 %v3831_v18  ;;  %v3202_v30 = vld [vmem:[%s4038_s8 + $0x8] sm:$0xe] }
  0x56   : > { %v437_v52 = vor.u32 %v436_v43, %v433_v41  ;;  %v450_v53 = vrot.slane %v448_v44, 5  ;;  %v454_v54 = vshll.u32 %v4232_v0, 16  ;;  %v878_v56 = vshrl.u32 %v762_v38, 16  ;;  %v3204_v31 = vld [vmem:[%s4038_s8 + $0x10] sm:$0xe] }
  0x57   : > { %v1027_v58 = vsel %vm4066_vm5, %v1022_v46, %v1026_v25  ;;  %v1036_v60 = vrot.slane %v1035_v47, 4  ;;  %v881_v61 = vshll.u32 %v762_v38, 16  ;;  %v887_v62 = vshrl.u32 %v763_v45, 16  ;;  %v3226_v35 = vld [vmem:[%s4038_s8 + $0xc] sm:$0x3] }
  0x58   : > { %v438_v59 = vrot.slane %v437_v52, 4  ;;  %v451_v1 = vor.u32 %v450_v53, %v447_v49  ;;  %v456_v0 = vrot.slane %v454_v54, 5  ;;  %v880_v2 = vrot.slane %v878_v56, 5  ;;  %v3227_v36 = vld [vmem:[%s4038_s8 + $0x14] sm:$0x3] }
  0x59   : > { %v1041_v4 = vsel %vm4066_vm5, %v1036_v60, %v1040_v40  ;;  %v883_v5 = vrot.slane %v881_v61, 6  ;;  %v889_v6 = vrot.slane %v887_v62, 5  ;;  %v890_v7 = vshll.u32 %v763_v45, 16  ;;  %v3205_v56 = vld [vmem:[%s4038_s8 + $0x14] sm:$0x1]  ;;  %v4299_v62 = vld [vmem:[%s4727_s5 + $0x38] sm:$0xff]  }
  0x5a   : > { %v3153_v10 = vcombine.low %v1027_v58, %v1041_v4  ;;  %v443_v11 = vsel %vm4066_vm5, %v438_v59, %v442_v48  ;;  %v452_v12 = vrot.slane %v451_v1, 4  ;;  %v896_v13 = vshrl.u32 %v764_v50, 16  ;;  %3718 = vmatprep.subr.bf16.mxu1 %v4299_v62 }
  0x5b   : > { %v884_v14 = vor.u32 %v883_v5, %v880_v2  ;;  %v892_v15 = vrot.slane %v890_v7, 6  ;;  %v899_v16 = vshll.u32 %v764_v50, 16  ;;  %v905_v17 = vshrl.u32 %v765_v55, 16  ;;  %v3293_v5 = vld [vmem:[%s4038_s8 + $0x1c] sm:$0x1] }
  0x5c   : > { %1259 = vmatprep.mubr.bf16.mxu1 %v3153_v10  ;;  %v457_v19 = vsel %vm4066_vm5, %v452_v12, %v456_v0  ;;  %v898_v20 = vrot.slane %v896_v13, 5  ;;  %v908_v21 = vshll.u32 %v765_v55, 16  ;;  %v3218_v33 = vrot.slane %v3202_v30, 9  ;;  %v3291_v0 = vld [vmem:[%s4038_s8 + $0x14] sm:$0x1] }
  0x5d   : > { %v3109_v22 = vcombine.low %v443_v11, %v457_v19  ;;  %v885_v23 = vrot.slane %v884_v14, 4  ;;  %v893_v24 = vor.u32 %v892_v15, %v889_v6  ;;  %v901_v25 = vrot.slane %v899_v16, 6  ;;  %v3306_v11 = vld [vmem:[%s4038_s8 + $0x10] sm:$0xe]  ;;  %v3307_v12 = vld [vmem:[%s4038_s8 + $0x18] sm:$0xe] }
  0x5e   : > { %v907_v26 = vrot.slane %v905_v17, 5  ;;  %v910_v27 = vrot.slane %v908_v21, 6  ;;  %v3219_v34 = vrot.slane %v3204_v31, 9  ;;  %v1365_v39 = vshrl.u32 %v3202_v30, 16  ;;  %v3832_v21 = vld [vmem:[%s4723_s1 + $0x238] sm:$0xff]  }
  0x5f   : > { %734 = vmatmul.mubr.bf16.gmra.mxu0 %v3109_v22  ;;  %v902_v28 = vor.u32 %v901_v25, %v898_v20  ;;  %v894_v32 = vsel %vm4090_vm8, %v885_v23, %v893_v24  ;;  %v1368_v40 = vshll.u32 %v3202_v30, 16  ;;  %v1374_v41 = vshrl.u32 %v3226_v35, 16  ;;  %v3290_v22 = vld [vmem:[%s4038_s8 + $0x10] sm:$0xf]  ;;  %v3292_v25 = vld [vmem:[%s4038_s8 + $0x18] sm:$0xf] }
  0x60   : > { %v911_v29 = vor.u32 %v910_v27, %v907_v26  ;;  %v1377_v43 = vshll.u32 %v3226_v35, 16  ;;  %v1383_v44 = vshrl.u32 %v3204_v31, 16  ;;  %v1386_v45 = vshll.u32 %v3204_v31, 16 }
  0x61   : > { %v903_v38 = vrot.slane %v902_v28, 4  ;;  %v1392_v46 = vshrl.u32 %v3227_v36, 16  ;;  %v1367_v48 = vrot.slane %v1365_v39, 5  ;;  %v1370_v49 = vrot.slane %v1368_v40, 6  ;;  %v3833_v28 = vld [vmem:[%s4723_s1 + $0x270] sm:$0xff]  }
  0x62   : > { %v1376_v50 = vrot.slane %v1374_v41, 5  ;;  %v1379_v53 = vrot.slane %v1377_v43, 6  ;;  %v1385_v54 = vrot.slane %v1383_v44, 5  ;;  %v1388_v55 = vrot.slane %v1386_v45, 6  ;;  %v3835_v40 = vld [vmem:[%s4723_s1 + $0x230] sm:$0xff]  }
  0x63   : > { %v912_v47 = vsel %vm4090_vm8, %v903_v38, %v911_v29  ;;  %v1371_v57 = vor.u32 %v1370_v49, %v1367_v48  ;;  %v1394_v58 = vrot.slane %v1392_v46, 5  ;;  %v1395_v60 = vshll.u32 %v3227_v36, 16  ;;  %v3206_v43 = vld [vmem:[%s4038_s8 + $0x18] sm:$0xe]  ;;  %v3208_v44 = vld [vmem:[%s4038_s8 + $0x20] sm:$0xe] }
  0x64   : > { %v3149_v52 = vcombine.low %v894_v32, %v912_v47  ;;  %v1326_v61 = vrot.slane %v3203_v51, 5  ;;  %v1380_v63 = vor.u32 %v1379_v53, %v1376_v50  ;;  %v1389_v59 = vor.u32 %v1388_v55, %v1385_v54  ;;  %v3228_v45 = vld [vmem:[%s4038_s8 + $0x1c] sm:$0x3]  ;;  %v3229_v47 = vld [vmem:[%s4038_s8 + $0x24] sm:$0x3]  ;;  %v3836_v51 = vld [vmem:[%s4723_s1 + $0x268] sm:$0xff]  }
  0x65   : > { %v1330_v1 = vrot.slane %v3205_v56, 5  ;;  %v1372_v2 = vrot.slane %v1371_v57, 4  ;;  %v1397_v3 = vrot.slane %v1395_v60, 6  ;;  %v1785_v6 = vshll.u32 %v3291_v0, 16  ;;  %v3207_v56 = vld [vmem:[%s4038_s8 + $0x1c] sm:$0x1] }
  0x66   : > { %1260 = vmatmul.mubr.bf16.gmra.mxu1 %v3149_v52  ;;  %v1327_v4 = vsel %vm4044_vm2, %v3218_v33, %v1326_v61  ;;  %v1390_v7 = vrot.slane %v1389_v59, 4  ;;  %v1799_v10 = vshll.u32 %v3293_v5, 16  ;;  %v3314_v18 = vrot.slane %v3306_v11, 9 }
  0x67   : > { %v1331_v9 = vsel %vm4044_vm2, %v3219_v34, %v1330_v1  ;;  %v1381_v13 = vsel %vm4090_vm8, %v1372_v2, %v1380_v63  ;;  %v1398_v14 = vor.u32 %v1397_v3, %v1394_v58  ;;  %v1787_v16 = vrot.slane %v1785_v6, 5  ;;  %v3209_v63 = vld [vmem:[%s4038_s8 + $0x24] sm:$0x1]  ;;  %v3837_v3 = vld [vmem:[%s4727_s5 + $0x30] sm:$0xff]  }
  0x68   : > { %v3234_v15 = vcombine.low %v1327_v4, %v1331_v9  ;;  %v1801_v17 = vrot.slane %v1799_v10, 5  ;;  %v1913_v19 = vrot.slane %v3291_v0, 5  ;;  %v3315_v20 = vrot.slane %v3307_v12, 9  ;;  %v3838_v4 = vld [vmem:[%s4723_s1 + $0x228] sm:$0xff]  }
  0x69   : > { %v1399_v23 = vsel %vm4090_vm8, %v1390_v7, %v1398_v14  ;;  %v1917_v24 = vrot.slane %v3293_v5, 5  ;;  %v1776_v26 = vshrl.u32 %v3290_v22, 16  ;;  %v1779_v27 = vshll.u32 %v3290_v22, 16  ;;  %v3295_v14 = vld [vmem:[%s4038_s8 + $0x24] sm:$0x1] }
  0x6a   : > { %v3238_v30 = vcombine.low %v1381_v13, %v1399_v23  ;;  %v1914_v31 = vsel %vm4044_vm2, %v3314_v18, %v1913_v19  ;;  %v1790_v32 = vshrl.u32 %v3292_v25, 16  ;;  %v1793_v29 = vshll.u32 %v3292_v25, 16 }
  0x6b   : > { %v1918_v33 = vsel %vm4044_vm2, %v3315_v20, %v1917_v24  ;;  %v1778_v34 = vrot.slane %v1776_v26, 4  ;;  %v1781_v35 = vrot.slane %v1779_v27, 5  ;;  %v1401_v48 = vshrl.u32 %v3206_v43, 16  ;;  %v3297_v20 = vld [vmem:[%s4038_s8 + $0x2c] sm:$0x1] }
  0x6c   : > { %1701 = vmatprep.mubr.bf16.mxu0 %v3238_v30  ;;  %v3326_v36 = vcombine.low %v1914_v31, %v1918_v33  ;;  %v1792_v38 = vrot.slane %v1790_v32, 4  ;;  %v1795_v39 = vrot.slane %v1793_v29, 5  ;;  %v1404_v49 = vshll.u32 %v3206_v43, 16  ;;  %v3308_v24 = vld [vmem:[%s4038_s8 + $0x20] sm:$0xe]  ;;  %v3840_v26 = vld [vmem:[%s4727_s5 + $0x28] sm:$0xff]  }
  0x6d   : > { %1702 = vmatmul.mubr.bf16.vlgmr.msra.gmra.mxu0 %v3234_v15  ;;  %v1782_v41 = vor.u32 %v1781_v35, %v1778_v34  ;;  %v1410_v50 = vshrl.u32 %v3228_v45, 16  ;;  %v1413_v53 = vshll.u32 %v3228_v45, 16  ;;  %v1419_v54 = vshrl.u32 %v3208_v44, 16  ;;  %v3839_v15 = vld [vmem:[%s4723_s1 + $0x260] sm:$0xff]   ;;  %v3309_v31 = vld [vmem:[%s4038_s8 + $0x28] sm:$0xe] }
  0x6e   : > { %2136 = vmatprep.mubr.bf16.mxu1 %v3326_v36  ;;  %3667 = vmatpush3.bf16.msra.mxu0 %v3832_v21  ;;  %v1796_v46 = vor.u32 %v1795_v39, %v1792_v38  ;;  %v1422_v55 = vshll.u32 %v3208_v44, 16  ;;  %v1403_v58 = vrot.slane %v1401_v48, 5  ;;  %v1406_v60 = vrot.slane %v1404_v49, 6  ;;  %v3841_v29 = vld [vmem:[%s4723_s1 + $0x220] sm:$0xff]  }
  0x6f   : > { %v1783_v52 = vrot.slane %v1782_v41, 4  ;;  %3668 = vmatprep.subr.bf16.mxu0 %v3833_v28  ;;  %v1412_v61 = vrot.slane %v1410_v50, 5  ;;  %v1415_v1 = vrot.slane %v1413_v53, 6  ;;  %v1421_v0 = vrot.slane %v1419_v54, 5  ;;  %v3294_v35 = vld [vmem:[%s4038_s8 + $0x20] sm:$0xf] }
  0x70   : > { %v1797_v57 = vrot.slane %v1796_v46, 4  ;;  %v1424_v2 = vrot.slane %v1422_v55, 6  ;;  %v1407_v6 = vor.u32 %v1406_v60, %v1403_v58  ;;  %v1428_v7 = vshrl.u32 %v3229_v47, 16  ;;  %v3843_v48 = vld [vmem:[%s4727_s5 + $0x20] sm:$0xff]   ;;  %v3844_v53 = vld [vmem:[%s4723_s1 + $0x218] sm:$0xff]  }
  0x71   : > { %v1788_v59 = vsel %vm4066_vm5, %v1783_v52, %v1787_v16  ;;  %v1431_v9 = vshll.u32 %v3229_v47, 16  ;;  %v1416_v11 = vor.u32 %v1415_v1, %v1412_v61  ;;  %v3220_v13 = vrot.slane %v3206_v43, 9  ;;  %v3842_v43 = vld [vmem:[%s4723_s1 + $0x258] sm:$0xff]   ;;  %v3210_v61 = vld [vmem:[%s4038_s8 + $0x28] sm:$0xe] }
  0x72   : > { %v1802_v5 = vsel %vm4066_vm5, %v1797_v57, %v1801_v17  ;;  %3669 = vmatpush3.bf16.msra.mxu0 %v3835_v40  ;;  %v1425_v12 = vor.u32 %v1424_v2, %v1421_v0  ;;  %v1408_v16 = vrot.slane %v1407_v6, 4  ;;  %v1430_v18 = vrot.slane %v1428_v7, 5  ;;  %v3296_v40 = vld [vmem:[%s4038_s8 + $0x28] sm:$0xf]  ;;  %v3845_v57 = vld [vmem:[%s4723_s1 + $0x250] sm:$0xff]  }
  0x73   : > { %v3322_v10 = vcombine.low %v1788_v59, %v1802_v5  ;;  %3670 = vmatprep.subr.bf16.mxu0 %v3836_v51  ;;  %v1433_v17 = vrot.slane %v1431_v9, 6  ;;  %v1334_v19 = vrot.slane %v3207_v56, 5  ;;  %v3221_v22 = vrot.slane %v3208_v44, 9  ;;  %v3212_v1 = vld [vmem:[%s4038_s8 + $0x30] sm:$0xe]  ;;  %v3846_v9 = vld [vmem:[%s4727_s5 + $0x18] sm:$0xff]  }
  0x74   : > { %v1426_v21 = vrot.slane %v1425_v12, 4  ;;  %v1338_v23 = vrot.slane %v3209_v63, 5  ;;  %v1921_v25 = vrot.slane %v3295_v14, 5  ;;  %v1417_v27 = vsel %vm4090_vm8, %v1408_v16, %v1416_v11  ;;  %v3230_v0 = vld [vmem:[%s4038_s8 + $0x2c] sm:$0x3] }
  0x75   : > { %2137 = vmatmul.mubr.bf16.vlgmr.msra.gmra.mxu1 %v3322_v10  ;;  %v1434_v28 = vor.u32 %v1433_v17, %v1430_v18  ;;  %v1335_v30 = vsel %vm4044_vm2, %v3220_v13, %v1334_v19  ;;  %v3316_v32 = vrot.slane %v3308_v24, 9  ;;  %v1925_v34 = vrot.slane %v3297_v20, 5  ;;  %v3213_v19 = vld [vmem:[%s4038_s8 + $0x34] sm:$0x1] }
  0x76   : > { %3719 = vmatpush3.bf16.msra.mxu1 %v4299_v62  ;;  %3671 = vmatpush3.bf16.msra.mxu0 %v3838_v4  ;;  %v1339_v33 = vsel %vm4044_vm2, %v3221_v22, %v1338_v23  ;;  %v3317_v62 = vrot.slane %v3309_v31, 9  ;;  %v1804_v41 = vshrl.u32 %v3294_v35, 16  ;;  %v1807_v46 = vshll.u32 %v3294_v35, 16  ;;  %v3231_v4 = vld [vmem:[%s4038_s8 + $0x34] sm:$0x3] }
  0x77   : > { %3720 = vmatprep.subr.bf16.mxu1 %v3837_v3  ;;  %3672 = vmatprep.subr.bf16.mxu0 %v3839_v15  ;;  %v1435_v36 = vsel %vm4090_vm8, %v1426_v21, %v1434_v28  ;;  %v3235_v38 = vcombine.low %v1335_v30, %v1339_v33  ;;  %v1922_v39 = vsel %vm4044_vm2, %v3316_v32, %v1921_v25  ;;  %v1813_v47 = vshll.u32 %v3295_v14, 16  ;;  %v3211_v14 = vld [vmem:[%s4038_s8 + $0x2c] sm:$0x1]  ;;  %v3847_v24 = vld [vmem:[%s4723_s1 + $0x210] sm:$0xff]  }
  0x78   : > { %v3239_v44 = vcombine.low %v1417_v27, %v1435_v36  ;;  %v1926_v45 = vsel %vm4044_vm2, %v3317_v62, %v1925_v34  ;;  %v1806_v50 = vrot.slane %v1804_v41, 4  ;;  %v1818_v51 = vshrl.u32 %v3296_v40, 16  ;;  %v3848_v30 = vld [vmem:[%s4723_s1 + $0x248] sm:$0xff]   ;;  %v3299_v62 = vld [vmem:[%s4038_s8 + $0x34] sm:$0x1] }
  0x79   : > { %v3327_v49 = vcombine.low %v1922_v39, %v1926_v45  ;;  %v1821_v52 = vshll.u32 %v3296_v40, 16  ;;  %v1809_v54 = vrot.slane %v1807_v46, 5  ;;  %v1815_v55 = vrot.slane %v1813_v47, 5  ;;  %v3301_v39 = vld [vmem:[%s4038_s8 + $0x3c] sm:$0x1] }
  0x7a   : > { %3721 = vmatpush3.bf16.msra.mxu1 %v3837_v3  ;;  %3673 = vmatpush3.bf16.msra.mxu0 %v3841_v29  ;;  %v1827_v56 = vshll.u32 %v3297_v20, 16  ;;  %v1820_v58 = vrot.slane %v1818_v51, 4  ;;  %v1437_v2 = vshrl.u32 %v3210_v61, 16  ;;  %v1440_v5 = vshll.u32 %v3210_v61, 16 }
  0x7b   : > { %1709 = vmatprep.mubr.bf16.mxu0 %v3239_v44  ;;  %3722 = vmatprep.subr.bf16.mxu1 %v3840_v26  ;;  %v1823_v60 = vrot.slane %v1821_v52, 5  ;;  %v1810_v63 = vor.u32 %v1809_v54, %v1806_v50  ;;  %v1446_v6 = vshrl.u32 %v3230_v0, 16  ;;  %v1449_v7 = vshll.u32 %v3230_v0, 16  ;;  %v3311_v44 = vld [vmem:[%s4038_s8 + $0x38] sm:$0xe] }
  0x7c   : > { %1710 = vmatmul.mubr.bf16.gmra.mxu0 %v3235_v38  ;;  %2144 = vmatprep.mubr.bf16.mxu1 %v3327_v49  ;;  %v1829_v59 = vrot.slane %v1827_v56, 5  ;;  %v1439_v11 = vrot.slane %v1437_v2, 5  ;;  %v1455_v12 = vshrl.u32 %v3212_v1, 16  ;;  %v1458_v13 = vshll.u32 %v3212_v1, 16  ;;  %v3849_v49 = vld [vmem:[%s4727_s5 + $0x10] sm:$0xff]   ;;  %v3851_v2 = vld [vmem:[%s4723_s1 + $0x240] sm:$0xff]  }
  0x7d   : > { %3674 = vmatprep.subr.bf16.mxu0 %v3842_v43  ;;  %v1824_v3 = vor.u32 %v1823_v60, %v1820_v58  ;;  %v1811_v10 = vrot.slane %v1810_v63, 4  ;;  %v1442_v16 = vrot.slane %v1440_v5, 6  ;;  %v1448_v18 = vrot.slane %v1446_v6, 5  ;;  %v3310_v43 = vld [vmem:[%s4038_s8 + $0x30] sm:$0xe] }
  0x7e   : > { %3723 = vmatpush3.bf16.msra.mxu1 %v3840_v26  ;;  %3675 = vmatpush3.bf16.msra.mxu0 %v3844_v53  ;;  %v1451_v17 = vrot.slane %v1449_v7, 6  ;;  %v1457_v21 = vrot.slane %v1455_v12, 5  ;;  %v1460_v22 = vrot.slane %v1458_v13, 6  ;;  %v1464_v23 = vshrl.u32 %v3231_v4, 16  ;;  %v3298_v54 = vld [vmem:[%s4038_s8 + $0x30] sm:$0xf] }
  0x7f   : > { %3724 = vmatprep.subr.bf16.mxu1 %v3843_v48  ;;  %3676 = vmatprep.subr.bf16.mxu0 %v3845_v57  ;;  %v1825_v15 = vrot.slane %v1824_v3, 4  ;;  %v1816_v20 = vsel %vm4066_vm5, %v1811_v10, %v1815_v55  ;;  %v1443_v26 = vor.u32 %v1442_v16, %v1439_v11  ;;  %v1467_v28 = vshll.u32 %v3231_v4, 16  ;;  %v3850_v55 = vld [vmem:[%s4723_s1 + $0x208] sm:$0xff]   ;;  %v3300_v58 = vld [vmem:[%s4038_s8 + $0x38] sm:$0xf]  ;;  %v3853_v12 = vld [vmem:[%s4723_s1 + $0x200] sm:$0xff]  }
  0x80   : > { %v1452_v27 = vor.u32 %v1451_v17, %v1448_v18  ;;  %v1461_v32 = vor.u32 %v1460_v22, %v1457_v21  ;;  %v1466_v29 = vrot.slane %v1464_v23, 5  ;;  %v3222_v33 = vrot.slane %v3210_v61, 9  ;;  %v3852_v7 = vld [vmem:[%s4727_s5 + $0x8] sm:$0xff]   ;;  %v3854_v16 = vld [vmem:[%s4727_s5] sm:$0xff]  }
  0x81   : > { %v1830_v25 = vsel %vm4066_vm5, %v1825_v15, %v1829_v59  ;;  %v1444_v34 = vrot.slane %v1443_v26, 4  ;;  %v1469_v35 = vrot.slane %v1467_v28, 6  ;;  %v1342_v36 = vrot.slane %v3211_v14, 5  ;;  %v3214_v15 = vld [vmem:[%s4038_s8 + $0x38] sm:$0xe] }
  0x82   : > { %3725 = vmatpush3.bf16.msra.mxu1 %v3843_v48  ;;  %v3323_v31 = vcombine.low %v1816_v20, %v1830_v25  ;;  %3677 = vmatpush3.bf16.msra.mxu0 %v3847_v24  ;;  %v3223_v38 = vrot.slane %v3212_v1, 9  ;;  %v1462_v40 = vrot.slane %v1461_v32, 4  ;;  %v1346_v41 = vrot.slane %v3213_v19, 5  ;;  %v3216_v19 = vld [vmem:[%s4038_s8 + $0x40] sm:$0xe] }
  0x83   : > { %3726 = vmatprep.subr.bf16.mxu1 %v3846_v9  ;;  %3678 = vmatprep.subr.bf16.mxu0 %v3848_v30  ;;  %v1453_v45 = vsel %vm4090_vm8, %v1444_v34, %v1452_v27  ;;  %v1470_v46 = vor.u32 %v1469_v35, %v1466_v29  ;;  %v1343_v47 = vsel %vm4044_vm2, %v3222_v33, %v1342_v36  ;;  %v3318_v48 = vrot.slane %v3310_v43, 9  ;;  %v3232_v20 = vld [vmem:[%s4038_s8 + $0x3c] sm:$0x3]  ;;  %v3233_v22 = vld [vmem:[%s4038_s8 + $0x44] sm:$0x3] }
  0x84   : > { %2145 = vmatmul.mubr.bf16.gmra.mxu1 %v3323_v31  ;;  %v1347_v50 = vsel %vm4044_vm2, %v3223_v38, %v1346_v41  ;;  %v1929_v51 = vrot.slane %v3299_v62, 5  ;;  %v3319_v52 = vrot.slane %v3311_v44, 9  ;;  %v1933_v53 = vrot.slane %v3301_v39, 5  ;;  %v3215_v31 = vld [vmem:[%s4038_s8 + $0x3c] sm:$0x1] }
  0x85   : > { %v1471_v56 = vsel %vm4090_vm8, %v1462_v40, %v1470_v46  ;;  %v3236_v57 = vcombine.low %v1343_v47, %v1347_v50  ;;  %v1832_v60 = vshrl.u32 %v3298_v54, 16  ;;  %v1835_v61 = vshll.u32 %v3298_v54, 16  ;;  %v3217_v34 = vld [vmem:[%s4038_s8 + $0x44] sm:$0x1] }
  0x86   : > { %3727 = vmatpush3.bf16.msra.mxu1 %v3846_v9  ;;  %v3240_v63 = vcombine.low %v1453_v45, %v1471_v56  ;;  %v1930_v59 = vsel %vm4044_vm2, %v3318_v48, %v1929_v51  ;;  %v1934_v1 = vsel %vm4044_vm2, %v3319_v52, %v1933_v53  ;;  %v1841_v0 = vshll.u32 %v3299_v62, 16  ;;  %3679 = vmatpush3.bf16.msra.mxu0 %v3850_v55  ;;  %v3303_v53 = vld [vmem:[%s4038_s8 + $0x44] sm:$0x1] }
  0x87   : > { %3728 = vmatprep.subr.bf16.mxu1 %v3849_v49  ;;  %v3328_v3 = vcombine.low %v1930_v59, %v1934_v1  ;;  %v1834_v4 = vrot.slane %v1832_v60, 4  ;;  %v1837_v5 = vrot.slane %v1835_v61, 5  ;;  %v1846_v6 = vshrl.u32 %v3300_v58, 16  ;;  %3680 = vmatprep.subr.bf16.mxu0 %v3851_v2  ;;  %v4463_v54 = vld [vmem:[%s4457_s10] sm:$0xff]   ;;  %v3305_v60 = vld [vmem:[%s4038_s8 + $0x4c] sm:$0x1] }
  0x88   : > { %1717 = vmatprep.mubr.bf16.mxu0 %v3240_v63  ;;  %v1843_v9 = vrot.slane %v1841_v0, 5  ;;  %v1849_v10 = vshll.u32 %v3300_v58, 16  ;;  %v1855_v11 = vshll.u32 %v3301_v39, 16  ;;  %v1473_v23 = vshrl.u32 %v3214_v15, 16  ;;  %v3312_v59 = vld [vmem:[%s4038_s8 + $0x40] sm:$0xe] }
  0x89   : > { %1718 = vmatmul.mubr.bf16.gmra.mxu0 %v3236_v57  ;;  %2152 = vmatprep.mubr.bf16.mxu1 %v3328_v3  ;;  %v1838_v13 = vor.u32 %v1837_v5, %v1834_v4  ;;  %v1848_v14 = vrot.slane %v1846_v6, 4  ;;  %v1476_v24 = vshll.u32 %v3214_v15, 16  ;;  %v1482_v25 = vshrl.u32 %v3232_v20, 16  ;;  %v3313_v1 = vld [vmem:[%s4038_s8 + $0x48] sm:$0xe] }
  0x8a   : > { %3729 = vmatpush3.bf16.msra.mxu1 %v3849_v49  ;;  %v1851_v18 = vrot.slane %v1849_v10, 5  ;;  %v1857_v17 = vrot.slane %v1855_v11, 5  ;;  %3681 = vmatpush3.bf16.msra.mxu0 %v3853_v12  ;;  %v1485_v27 = vshll.u32 %v3232_v20, 16  ;;  %v1491_v28 = vshrl.u32 %v3216_v19, 16  ;;  %v3302_v11 = vld [vmem:[%s4038_s8 + $0x40] sm:$0xf] }
  0x8b   : > { %3730 = vmatprep.subr.bf16.mxu1 %v3852_v7  ;;  %v1839_v21 = vrot.slane %v1838_v13, 4  ;;  %v1494_v30 = vshll.u32 %v3216_v19, 16  ;;  %v1475_v29 = vrot.slane %v1473_v23, 5  ;;  %v1478_v33 = vrot.slane %v1476_v24, 6  ;;  %v3304_v12 = vld [vmem:[%s4038_s8 + $0x48] sm:$0xf] }
  0x8c   : > { %v1852_v26 = vor.u32 %v1851_v18, %v1848_v14  ;;  %v1484_v62 = vrot.slane %v1482_v25, 5  ;;  %v1487_v36 = vrot.slane %v1485_v27, 6  ;;  %v1493_v38 = vrot.slane %v1491_v28, 5  ;;  %v4490_v24 = vld [vmem:[%s4457_s10 + $0x18] sm:$0xff]  }
  0x8d   : > { %v1844_v32 = vsel %vm4066_vm5, %v1839_v21, %v1843_v9  ;;  %v1496_v39 = vrot.slane %v1494_v30, 6  ;;  %v1479_v40 = vor.u32 %v1478_v33, %v1475_v29  ;;  %v1500_v41 = vshrl.u32 %v3233_v22, 16  ;;  %v2353_v33 = vld [vmem:[%s4038_s8] sm:$0xf] }
  0x8e   : > { %3731 = vmatpush3.bf16.msra.mxu1 %v3852_v7  ;;  %v1853_v35 = vrot.slane %v1852_v26, 4  ;;  %v1503_v43 = vshll.u32 %v3233_v22, 16  ;;  %v3224_v44 = vrot.slane %v3214_v15, 9  ;;  %v1488_v46 = vor.u32 %v1487_v36, %v1484_v62  ;;  %v4476_v7 = vld [vmem:[%s4457_s10 + $0x8] sm:$0xff]   ;;  %v2354_v62 = vld [vmem:[%s4038_s8 + $0x4] sm:$0x1] }
  0x8f   : > { %3732 = vmatprep.subr.bf16.mxu1 %v3854_v16  ;;  %v1497_v47 = vor.u32 %v1496_v39, %v1493_v38  ;;  %v1350_v48 = vrot.slane %v3215_v31, 5  ;;  %v1480_v50 = vrot.slane %v1479_v40, 4  ;;  %v1502_v51 = vrot.slane %v1500_v41, 5  ;;  %v2355_v39 = vld [vmem:[%s4038_s8 + $0x8] sm:$0xf] }
  0x90   : > { %v1858_v45 = vsel %vm4066_vm5, %v1853_v35, %v1857_v17  ;;  %v1505_v52 = vrot.slane %v1503_v43, 6  ;;  %v3225_v57 = vrot.slane %v3216_v19, 9  ;;  %v1354_v58 = vrot.slane %v3217_v34, 5  ;;  %v4487_v19 = vld [vmem:[%s4457_s10 + $0x10] sm:$0xff]   ;;  %v2356_v40 = vld [vmem:[%s4038_s8 + $0xc] sm:$0x1] }
  0x91   : > { %v3324_v49 = vcombine.low %v1844_v32, %v1858_v45  ;;  %v1498_v55 = vrot.slane %v1497_v47, 4  ;;  %v1351_v56 = vsel %vm4044_vm2, %v3224_v44, %v1350_v48  ;;  %v1489_v61 = vsel %vm4090_vm8, %v1480_v50, %v1488_v46 }
  0x92   : > { %3733 = vmatpush3.bf16.msra.mxu1 %v3854_v16  ;;  %v1506_v63 = vor.u32 %v1505_v52, %v1502_v51  ;;  %v1937_v0 = vrot.slane %v3303_v53, 5  ;;  %v1941_v2 = vrot.slane %v3305_v60, 5  ;;  %v1355_v3 = vsel %vm4044_vm2, %v3225_v57, %v1354_v58 }
  0x93   : > { %2153 = vmatmul.mubr.bf16.gmra.mxu1 %v3324_v49  ;;  %v3320_v4 = vrot.slane %v3312_v59, 9  ;;  %v3321_v5 = vrot.slane %v3313_v1, 9  ;;  %v3466_v6 = vunpack.c.l.bf16 %v4463_v54  ;;  %v3237_v10 = vcombine.low %v1351_v56, %v1355_v3  ;;  %v3378_v49 = vld [vmem:[%s4038_s8 + $0x10] sm:$0xe]  ;;  %v3380_v1 = vld [vmem:[%s4038_s8 + $0x18] sm:$0xe] }
  0x94   : > { %v1507_v9 = vsel %vm4090_vm8, %v1498_v55, %v1506_v63  ;;  %v1869_v13 = vshll.u32 %v3303_v53, 16  ;;  %v1883_v14 = vshll.u32 %v3305_v60, 16  ;;  %v1860_v17 = vshrl.u32 %v3302_v11, 16  ;;  %v3379_v55 = vld [vmem:[%s4038_s8 + $0x14] sm:$0x3] }
  0x95   : > { %v3241_v15 = vcombine.low %v1489_v61, %v1507_v9  ;;  %v1938_v16 = vsel %vm4044_vm2, %v3320_v4, %v1937_v0  ;;  %v1942_v18 = vsel %vm4044_vm2, %v3321_v5, %v1941_v2  ;;  %v1863_v21 = vshll.u32 %v3302_v11, 16  ;;  %v3381_v4 = vld [vmem:[%s4038_s8 + $0x1c] sm:$0x3] }
  0x96   : > { %v3329_v20 = vcombine.low %v1938_v16, %v1942_v18  ;;  %v1871_v22 = vrot.slane %v1869_v13, 5  ;;  %v1874_v23 = vshrl.u32 %v3304_v12, 16  ;;  %v1862_v25 = vrot.slane %v1860_v17, 4 }
  0x97   : > { %1725 = vmatprep.mubr.bf16.mxu0 %v3241_v15  ;;  %v1877_v26 = vshll.u32 %v3304_v12, 16  ;;  %v1885_v27 = vrot.slane %v1883_v14, 5  ;;  %v3467_v37 = vunpack.c.h.bf16 %v4463_v54  ;;  %v1865_v28 = vrot.slane %v1863_v21, 5 }
  0x98   : > { %1726 = vmatmul.mubr.bf16.gmra.mxu0 %v3237_v10  ;;  %2160 = vmatprep.mubr.bf16.mxu1 %v3329_v20  ;;  %v1876_v30 = vrot.slane %v1874_v23, 4  ;;  %v3470_v31 = vunpack.c.l.bf16 %v4476_v7  ;;  %v3471_v32 = vunpack.c.h.bf16 %v4476_v7  ;;  %v3474_v34 = vunpack.c.l.bf16 %v4487_v19  ;;  %v4516_v23 = vld [vmem:[%s4725_s3] ss:$0 sm:$0xff]  ;;  %v2360_v7 = vld [vmem:[%s4038_s8 + $0x1c] sm:$0x1] }
  0x99   : > { %v1879_v29 = vrot.slane %v1877_v26, 5  ;;  %v3475_v35 = vunpack.c.h.bf16 %v4487_v19  ;;  %v3478_v36 = vunpack.c.l.bf16 %v4490_v24  ;;  %v1866_v38 = vor.u32 %v1865_v28, %v1862_v25 }
  0x9a   : > { %v2370_v41 = vshrl.u32 %v2353_v33, 16  ;;  %v2373_v43 = vshll.u32 %v2353_v33, 16  ;;  %v3479_v44 = vunpack.c.h.bf16 %v4490_v24  ;;  %v2379_v46 = vshll.u32 %v2354_v62, 16 }
  0x9b   : > { %v1880_v45 = vor.u32 %v1879_v29, %v1876_v30  ;;  %v2384_v47 = vshrl.u32 %v2355_v39, 16  ;;  %v2387_v48 = vshll.u32 %v2355_v39, 16  ;;  %v1867_v50 = vrot.slane %v1866_v38, 4  ;;  %v2357_v30 = vld [vmem:[%s4038_s8 + $0x10] sm:$0xf] }
  0x9c   : > { %v2372_v51 = vrot.slane %v2370_v41, 4  ;;  %v2375_v52 = vrot.slane %v2373_v43, 5  ;;  %v2393_v53 = vshll.u32 %v2356_v40, 16  ;;  %v2381_v57 = vrot.slane %v2379_v46, 5  ;;  %v4524_v39 = vld [vmem:[%s4726_s4] ss:$0 sm:$0xff] }
  0x9d   : > { %v1881_v56 = vrot.slane %v1880_v45, 4  ;;  %v2386_v58 = vrot.slane %v2384_v47, 4  ;;  %v2389_v60 = vrot.slane %v2387_v48, 5  ;;  %v1872_v61 = vsel %vm4066_vm5, %v1867_v50, %v1871_v22 }
  0x9e   : > { %v2376_v63 = vor.u32 %v2375_v52, %v2372_v51  ;;  %v2395_v59 = vrot.slane %v2393_v53, 5  ;;  %v2210_v0 = vshrl.u32 %v3378_v49, 16  ;;  %v2213_v5 = vshll.u32 %v3378_v49, 16  ;;  %v2358_v49 = vld [vmem:[%s4038_s8 + $0x14] sm:$0x1] }
  0x9f   : > { %v1886_v2 = vsel %vm4066_vm5, %v1881_v56, %v1885_v27  ;;  %v2390_v3 = vor.u32 %v2389_v60, %v2386_v58  ;;  %v2219_v9 = vshrl.u32 %v3379_v55, 16  ;;  %v2222_v13 = vshll.u32 %v3379_v55, 16  ;;  %v2359_v52 = vld [vmem:[%s4038_s8 + $0x18] sm:$0xf] }
  0xa0   : > { %v3325_v10 = vcombine.low %v1872_v61, %v1886_v2  ;;  %v2377_v11 = vrot.slane %v2376_v63, 4  ;;  %v2212_v12 = vrot.slane %v2210_v0, 5  ;;  %v2215_v15 = vrot.slane %v2213_v5, 6  ;;  %v3382_v61 = vld [vmem:[%s4038_s8 + $0x20] sm:$0xe] }
  0xa1   : > { %v2391_v14 = vrot.slane %v2390_v3, 4  ;;  %v2221_v16 = vrot.slane %v2219_v9, 5  ;;  %v2228_v18 = vshrl.u32 %v3380_v1, 16  ;;  %v2224_v20 = vrot.slane %v2222_v13, 6  ;;  %v3383_v2 = vld [vmem:[%s4038_s8 + $0x24] sm:$0x3] }
  0xa2   : > { %2161 = vmatmul.mubr.bf16.gmra.mxu1 %v3325_v10  ;;  %v2382_v17 = vsel %vm4066_vm5, %v2377_v11, %v2381_v57  ;;  %v2231_v21 = vshll.u32 %v3380_v1, 16  ;;  %v2237_v22 = vshrl.u32 %v3381_v4, 16  ;;  %v2216_v26 = vor.u32 %v2215_v15, %v2212_v12  ;;  %v3384_v10 = vld [vmem:[%s4038_s8 + $0x28] sm:$0xe] }
  0xa3   : > { %v2396_v25 = vsel %vm4066_vm5, %v2391_v14, %v2395_v59  ;;  %v2230_v27 = vrot.slane %v2228_v18, 5  ;;  %v2240_v28 = vshll.u32 %v3381_v4, 16  ;;  %v2225_v33 = vor.u32 %v2224_v20, %v2221_v16 }
  0xa4   : > { %v3398_v29 = vcombine.low %v2382_v17, %v2396_v25  ;;  %v2233_v62 = vrot.slane %v2231_v21, 6  ;;  %v2239_v38 = vrot.slane %v2237_v22, 5  ;;  %v2217_v40 = vrot.slane %v2216_v26, 4  ;;  %v3385_v22 = vld [vmem:[%s4038_s8 + $0x2c] sm:$0x3] }
  0xa5   : > { %v2242_v41 = vrot.slane %v2240_v28, 6  ;;  %v2755_v43 = vmul.f32 %v3466_v6, %v4516_v23  ;;  %v2756_v45 = vmul.f32 %v3467_v37, %v4516_v23  ;;  %v2757_v47 = vmul.f32 %v3470_v31, %v4516_v23 }
  0xa6   : > { %2674 = vmatprep.mubr.bf16.mxu0 %v3398_v29  ;;  %v2234_v46 = vor.u32 %v2233_v62, %v2230_v27  ;;  %v2758_v48 = vmul.f32 %v3471_v32, %v4516_v23  ;;  %v2398_v50 = vshrl.u32 %v2357_v30, 16  ;;  %v2226_v6 = vsel %vm4090_vm8, %v2217_v40, %v2225_v33  ;;  %v2361_v33 = vld [vmem:[%s4038_s8 + $0x20] sm:$0xf] }
  0xa7   : > { %v2243_v51 = vor.u32 %v2242_v41, %v2239_v38  ;;  %v2769_v54 = vadd.f32 %v4524_v39, %v2755_v43  ;;  %v2770_v37 = vadd.f32 %v4524_v39, %v2756_v45  ;;  %v2771_v31 = vadd.f32 %v4524_v39, %v2757_v47 }
  0xa8   : > { %v2235_v53 = vrot.slane %v2234_v46, 4  ;;  %v2772_v55 = vadd.f32 %v4524_v39, %v2758_v48  ;;  %v2400_v32 = vrot.slane %v2398_v50, 4  ;;  %v2401_v58 = vshll.u32 %v2357_v30, 16  ;;  %v2362_v48 = vld [vmem:[%s4038_s8 + $0x24] sm:$0x1] }
  0xa9   : > { %v2777_v56 = vmax.f32 %v2769_v54, 0.0  ;;  %v2778_v57 = vmax.f32 %v2770_v37, 0.0  ;;  %v2407_v60 = vshll.u32 %v2358_v49, 16  ;;  %v2779_v59 = vmax.f32 %v2771_v31, 0.0 }
  0xaa   : > { %v2244_v63 = vsel %vm4090_vm8, %v2235_v53, %v2243_v51  ;;  %v2780_v1 = vmax.f32 %v2772_v55, 0.0  ;;  %v2412_v0 = vshrl.u32 %v2359_v52, 16  ;;  %v2403_v5 = vrot.slane %v2401_v58, 5  ;;  %v2363_v53 = vld [vmem:[%s4038_s8 + $0x28] sm:$0xf] }
  0xab   : > { %v3394_v3 = vcombine.low %v2226_v6, %v2244_v63  ;;  %v2785_v4 = vpack.c.bf16 %v2778_v57, %v2777_v56  ;;  %v2409_v9 = vrot.slane %v2407_v60, 5  ;;  %v2415_v13 = vshll.u32 %v2359_v52, 16  ;;  %v3386_v58 = vld [vmem:[%s4038_s8 + $0x30] sm:$0xe] }
  0xac   : > { %v2786_v11 = vpack.c.bf16 %v2780_v1, %v2779_v59  ;;  %v2414_v12 = vrot.slane %v2412_v0, 4  ;;  %v2421_v14 = vshll.u32 %v2360_v7, 16  ;;  %v2404_v15 = vor.u32 %v2403_v5, %v2400_v32  ;;  %v2364_v32 = vld [vmem:[%s4038_s8 + $0x2c] sm:$0x1]  ;;  %v3387_v1 = vld [vmem:[%s4038_s8 + $0x34] sm:$0x3] }
  0xad   : > { %2675 = vmatmul.mubr.bf16.vlgmr.msra.gmra.mxu0 %v3394_v3  ;;  %3734 = vmatprep.mubr.bf16.mxu1 %v2785_v4  ;;  %v2246_v16 = vshrl.u32 %v3382_v61, 16  ;;  %v2249_v18 = vshll.u32 %v3382_v61, 16  ;;  %v2255_v17 = vshrl.u32 %v3383_v2, 16  ;;  %v2417_v20 = vrot.slane %v2415_v13, 5 }
  0xae   : > { %3735 = vmatmul.mubr.bf16.vlgmr.msra.gmra.mxu1 %v2786_v11  ;;  %v2423_v21 = vrot.slane %v2421_v14, 5  ;;  %v2258_v25 = vshll.u32 %v3383_v2, 16  ;;  %v2264_v26 = vshrl.u32 %v3384_v10, 16  ;;  %v2405_v27 = vrot.slane %v2404_v15, 4 }
  0xaf   : > { %v2248_v28 = vrot.slane %v2246_v16, 5  ;;  %v2251_v30 = vrot.slane %v2249_v18, 6  ;;  %v2257_v29 = vrot.slane %v2255_v17, 5  ;;  %v2418_v62 = vor.u32 %v2417_v20, %v2414_v12  ;;  %v3389_v16 = vld [vmem:[%s4038_s8 + $0x3c] sm:$0x3] }
  0xb0   : > { %v2260_v38 = vrot.slane %v2258_v25, 6  ;;  %v2266_v40 = vrot.slane %v2264_v26, 5  ;;  %v2267_v41 = vshll.u32 %v3384_v10, 16  ;;  %v2410_v43 = vsel %vm4066_vm5, %v2405_v27, %v2409_v9  ;;  %v3388_v10 = vld [vmem:[%s4038_s8 + $0x38] sm:$0xe] }
  0xb1   : > { %v2252_v45 = vor.u32 %v2251_v30, %v2248_v28  ;;  %v2273_v46 = vshrl.u32 %v3385_v22, 16  ;;  %v2276_v47 = vshll.u32 %v3385_v22, 16  ;;  %v2419_v49 = vrot.slane %v2418_v62, 4 }
  0xb2   : > { %v2261_v50 = vor.u32 %v2260_v38, %v2257_v29  ;;  %v2269_v6 = vrot.slane %v2267_v41, 6  ;;  %v2426_v51 = vshrl.u32 %v2361_v33, 16  ;;  %v2429_v31 = vshll.u32 %v2361_v33, 16 }
  0xb3   : > { %v2253_v54 = vrot.slane %v2252_v45, 4  ;;  %v2275_v37 = vrot.slane %v2273_v46, 5  ;;  %v2278_v52 = vrot.slane %v2276_v47, 6  ;;  %v2424_v55 = vsel %vm4066_vm5, %v2419_v49, %v2423_v21 }
  0xb4   : > { %v2270_v7 = vor.u32 %v2269_v6, %v2266_v40  ;;  %v2428_v56 = vrot.slane %v2426_v51, 4  ;;  %v2435_v57 = vshll.u32 %v2362_v48, 16  ;;  %v3399_v60 = vcombine.low %v2410_v43, %v2424_v55  ;;  %v2366_v55 = vld [vmem:[%s4038_s8 + $0x34] sm:$0x1] }
  0xb5   : > { %v2262_v61 = vsel %vm4090_vm8, %v2253_v54, %v2261_v50  ;;  %v2279_v63 = vor.u32 %v2278_v52, %v2275_v37  ;;  %v2431_v59 = vrot.slane %v2429_v31, 5  ;;  %v2440_v3 = vshrl.u32 %v2363_v53, 16  ;;  %v2365_v54 = vld [vmem:[%s4038_s8 + $0x30] sm:$0xf] }
  0xb6   : > { %v2271_v0 = vrot.slane %v2270_v7, 4  ;;  %v2437_v2 = vrot.slane %v2435_v57, 5  ;;  %v2443_v4 = vshll.u32 %v2363_v53, 16  ;;  %2682 = vmatprep.mubr.bf16.mxu0 %v3399_v60  ;;  %v2449_v9 = vshll.u32 %v2364_v32, 16  ;;  %v2367_v57 = vld [vmem:[%s4038_s8 + $0x38] sm:$0xf] }
  0xb7   : > { %v2432_v5 = vor.u32 %v2431_v59, %v2428_v56  ;;  %v2282_v11 = vshrl.u32 %v3386_v58, 16  ;;  %v2285_v12 = vshll.u32 %v3386_v58, 16  ;;  %v2442_v14 = vrot.slane %v2440_v3, 4  ;;  %v2368_v59 = vld [vmem:[%s4038_s8 + $0x3c] sm:$0x1] }
  0xb8   : > { %v2280_v13 = vsel %vm4090_vm8, %v2271_v0, %v2279_v63  ;;  %v2445_v15 = vrot.slane %v2443_v4, 5  ;;  %v2291_v18 = vshrl.u32 %v3387_v1, 16  ;;  %v2451_v21 = vrot.slane %v2449_v9, 5 }
  0xb9   : > { %v3395_v17 = vcombine.low %v2262_v61, %v2280_v13  ;;  %v2433_v20 = vrot.slane %v2432_v5, 4  ;;  %v2284_v22 = vrot.slane %v2282_v11, 5  ;;  %v2287_v26 = vrot.slane %v2285_v12, 6 }
  0xba   : > { %v2446_v25 = vor.u32 %v2445_v15, %v2442_v14  ;;  %v2293_v27 = vrot.slane %v2291_v18, 5  ;;  %v2294_v28 = vshll.u32 %v3387_v1, 16  ;;  %v2300_v29 = vshrl.u32 %v3388_v10, 16  ;;  %v3392_v14 = vld [vmem:[%s4038_s8 + $0x48] sm:$0xe] }
  0xbb   : > { %2683 = vmatmul.mubr.bf16.gmra.mxu0 %v3395_v17  ;;  %v2438_v30 = vsel %vm4066_vm5, %v2433_v20, %v2437_v2  ;;  %v2303_v33 = vshll.u32 %v3388_v10, 16  ;;  %v2309_v62 = vshrl.u32 %v3389_v16, 16  ;;  %v2288_v40 = vor.u32 %v2287_v26, %v2284_v22  ;;  %v3390_v2 = vld [vmem:[%s4038_s8 + $0x40] sm:$0xe]  ;;  %v3391_v10 = vld [vmem:[%s4038_s8 + $0x44] sm:$0x3] }
  0xbc   : > { %v2447_v38 = vrot.slane %v2446_v25, 4  ;;  %v2296_v41 = vrot.slane %v2294_v28, 6  ;;  %v2312_v43 = vshll.u32 %v3389_v16, 16  ;;  %v2302_v45 = vrot.slane %v2300_v29, 5 }
  0xbd   : > { %v2305_v46 = vrot.slane %v2303_v33, 6  ;;  %v2311_v47 = vrot.slane %v2309_v62, 5  ;;  %v2759_v48 = vmul.f32 %v3474_v34, %v4516_v23  ;;  %v2289_v50 = vrot.slane %v2288_v40, 4 }
  0xbe   : > { %v2452_v49 = vsel %vm4066_vm5, %v2447_v38, %v2451_v21  ;;  %v2297_v6 = vor.u32 %v2296_v41, %v2293_v27  ;;  %v2314_v51 = vrot.slane %v2312_v43, 6  ;;  %v2760_v53 = vmul.f32 %v3475_v35, %v4516_v23  ;;  %v3393_v21 = vld [vmem:[%s4038_s8 + $0x4c] sm:$0x3] }
  0xbf   : > { %v3400_v37 = vcombine.low %v2438_v30, %v2452_v49  ;;  %v2306_v52 = vor.u32 %v2305_v46, %v2302_v45  ;;  %v2773_v31 = vadd.f32 %v4524_v39, %v2759_v48  ;;  %v2761_v32 = vmul.f32 %v3478_v36, %v4516_v23 }
  0xc0   : > { %v2298_v34 = vsel %vm4090_vm8, %v2289_v50, %v2297_v6  ;;  %v2315_v7 = vor.u32 %v2314_v51, %v2311_v47  ;;  %v2762_v56 = vmul.f32 %v3479_v44, %v4516_v23  ;;  %v2774_v35 = vadd.f32 %v4524_v39, %v2760_v53 }
  0xc1   : > { %2690 = vmatprep.mubr.bf16.mxu0 %v3400_v37  ;;  %v2307_v19 = vrot.slane %v2306_v52, 4  ;;  %v2781_v58 = vmax.f32 %v2773_v31, 0.0  ;;  %v2454_v60 = vshrl.u32 %v2365_v54, 16  ;;  %v2775_v61 = vadd.f32 %v4524_v39, %v2761_v32 }
  0xc2   : > { %v2776_v63 = vadd.f32 %v4524_v39, %v2762_v56  ;;  %v2457_v1 = vshll.u32 %v2365_v54, 16  ;;  %v2463_v36 = vshll.u32 %v2366_v55, 16  ;;  %v2782_v44 = vmax.f32 %v2774_v35, 0.0 }
  0xc3   : > { %v2316_v24 = vsel %vm4090_vm8, %v2307_v19, %v2315_v7  ;;  %v2456_v23 = vrot.slane %v2454_v60, 4  ;;  %v2468_v0 = vshrl.u32 %v2367_v57, 16  ;;  %v2783_v4 = vmax.f32 %v2775_v61, 0.0 }
  0xc4   : > { %v3396_v3 = vcombine.low %v2298_v34, %v2316_v24  ;;  %v2784_v5 = vmax.f32 %v2776_v63, 0.0  ;;  %v2459_v9 = vrot.slane %v2457_v1, 5  ;;  %v2787_v11 = vpack.c.bf16 %v2782_v44, %v2781_v58 }
  0xc5   : > { %v2465_v12 = vrot.slane %v2463_v36, 5  ;;  %v2470_v39 = vrot.slane %v2468_v0, 4  ;;  %v2471_v13 = vshll.u32 %v2367_v57, 16  ;;  %v2477_v18 = vshll.u32 %v2368_v59, 16 }
  0xc6   : > { %2691 = vmatmul.mubr.bf16.gmra.mxu0 %v3396_v3  ;;  %v2788_v15 = vpack.c.bf16 %v2784_v5, %v2783_v4  ;;  %v2460_v16 = vor.u32 %v2459_v9, %v2456_v23  ;;  %v2318_v17 = vshrl.u32 %v3390_v2, 16  ;;  %3738 = vmatprep.mubr.bf16.mxu1 %v2787_v11  ;;  %v2321_v22 = vshll.u32 %v3390_v2, 16 }
  0xc7   : > { %v2473_v20 = vrot.slane %v2471_v13, 5  ;;  %v2327_v25 = vshrl.u32 %v3391_v10, 16  ;;  %v2330_v26 = vshll.u32 %v3391_v10, 16  ;;  %v2479_v28 = vrot.slane %v2477_v18, 5 }
  0xc8   : > { %3739 = vmatmul.mubr.bf16.gmra.mxu1 %v2788_v15  ;;  %v2461_v27 = vrot.slane %v2460_v16, 4  ;;  %v2320_v30 = vrot.slane %v2318_v17, 5  ;;  %v2336_v29 = vshrl.u32 %v3392_v14, 16  ;;  %v2323_v62 = vrot.slane %v2321_v22, 6 }
  0xc9   : > { %v2474_v33 = vor.u32 %v2473_v20, %v2470_v39  ;;  %v2329_v38 = vrot.slane %v2327_v25, 5  ;;  %v2332_v40 = vrot.slane %v2330_v26, 6  ;;  %v2339_v43 = vshll.u32 %v3392_v14, 16 }
  0xca   : > { %v2338_v41 = vrot.slane %v2336_v29, 5  ;;  %v2345_v45 = vshrl.u32 %v3393_v21, 16  ;;  %v2466_v46 = vsel %vm4066_vm5, %v2461_v27, %v2465_v12  ;;  %v2324_v48 = vor.u32 %v2323_v62, %v2320_v30 }
  0xcb   : > { %v2475_v47 = vrot.slane %v2474_v33, 4  ;;  %v2348_v49 = vshll.u32 %v3393_v21, 16  ;;  %v2333_v50 = vor.u32 %v2332_v40, %v2329_v38  ;;  %v2341_v6 = vrot.slane %v2339_v43, 6 }
  0xcc   : > { %v2347_v51 = vrot.slane %v2345_v45, 5  ;;  %v2325_v37 = vrot.slane %v2324_v48, 4 }
  0xcd   : > { %v2480_v54 = vsel %vm4066_vm5, %v2475_v47, %v2479_v28  ;;  %v2350_v52 = vrot.slane %v2348_v49, 6  ;;  %v2342_v31 = vor.u32 %v2341_v6, %v2338_v41 }
  0xce   : > { %v3401_v53 = vcombine.low %v2466_v46, %v2480_v54  ;;  %v2334_v34 = vsel %vm4090_vm8, %v2325_v37, %v2333_v50 }
  0xcf   : > { %v2351_v55 = vor.u32 %v2350_v52, %v2347_v51  ;;  %v2343_v7 = vrot.slane %v2342_v31, 4 }
  0xd0   : > { %2698 = vmatprep.mubr.bf16.mxu0 %v3401_v53 }
  0xd1   : > { %v2352_v32 = vsel %vm4090_vm8, %v2343_v7, %v2351_v55 }
  0xd2   : > { %v3397_v56 = vcombine.low %v2334_v34, %v2352_v32 }
  0xd4   : > { %2699 = vmatmul.mubr.bf16.gmra.mxu0 %v3397_v56 }
  0xf0   : > { %v4609_v57 = vpop.f32.mrf.mxu0 }
  0xf2   : > { %v4611_v19 = vpop.f32.mrf.mxu0 }
  0xf4   : > { %v4613_v8 = vpop.f32.mrf.mxu1  ;;  %v4615_v35 = vpop.f32.mrf.mxu0 }
  0xf6   : > { %v4617_v58 = vpop.f32.mrf.mxu1  ;;  %v4619_v60 = vpop.f32.mrf.mxu0 }
  0xf8   : > { %v4621_v61 = vpop.f32.mrf.mxu1 }
  0xfa   : > { %v4623_v42 = vpop.f32.mrf.mxu1 }
  0xfc   : > { %v3528_v63 = vpop.f32.mrf.mxu0 }
  0xfe   : > { %v3529_v59 = vpop.f32.mrf.mxu0 }
  0xff   : > { %v3530_v1 = vadd.f32 %v3529_v59, %v3528_v63 }
 0x100   : > { %v3531_v36 = vpop.f32.mrf.mxu0 }
 0x102   : > { %v3532_v24 = vpop.f32.mrf.mxu0  ;;  %v3568_v44 = vpop.f32.mrf.mxu1 }
 0x103   : > { %v4625_v23 = vadd.f32 %v3532_v24, %v3531_v36 }
 0x104   : > { %v3569_v0 = vpop.f32.mrf.mxu1 }
 0x105   : > { %v3570_v2 = vadd.f32 %v3569_v0, %v3568_v44 }
 0x106   : > { %v4629_v4 = vpop.f32.mrf.mxu1 }
 0x107   : > { %v4627_v3 = vadd.f32 %v3570_v2, %v3530_v1 }
 0x108   : > { %v4631_v10 = vpop.f32.mrf.mxu1 }
 0x10d   : > { %v3534_v5 = vpop.f32.mrf.mxu0 }
 0x10f   : > { %v3535_v9 = vpop.f32.mrf.mxu0 }
 0x110   : > { %v3536_v11 = vadd.f32 %v3535_v9, %v3534_v5 }
 0x111   : > { %v3537_v12 = vpop.f32.mrf.mxu0 }
 0x113   : > { %v3538_v39 = vpop.f32.mrf.mxu0 }
 0x114   : > { %v3574_v13 = vpop.f32.mrf.mxu1  ;;  %v3539_v14 = vadd.f32 %v3538_v39, %v3537_v12 }
 0x116   : > { %v3575_v15 = vpop.f32.mrf.mxu1 }
 0x117   : > { %v3576_v16 = vadd.f32 %v3575_v15, %v3574_v13  ;;  %v3524_v13 = vadd.f32 %v4611_v19, %v4609_v57 }
 0x118   : > { %v3577_v18 = vpop.f32.mrf.mxu1 }
 0x119   : > { %v4633_v17 = vadd.f32 %v3576_v16, %v3536_v11 }
 0x11a   : > { %v3578_v20 = vpop.f32.mrf.mxu1 }
 0x11b   : > { %v3579_v21 = vadd.f32 %v3578_v20, %v3577_v18  ;;  %v3527_v18 = vadd.f32 %v4619_v60, %v4615_v35  ;;  %v3567_v20 = vadd.f32 %v4623_v42, %v4621_v61 }
 0x11d   : > { %v4635_v22 = vadd.f32 %v3579_v21, %v3539_v14  ;;  %v3564_v14 = vadd.f32 %v4617_v58, %v4613_v8  ;;  %v1277_v57 = vadd.f32 %v3567_v20, %v3527_v18 }
 0x11f   : > { %v3540_v25 = vpop.f32.mrf.mxu0 }
 0x121   : > { %v3541_v26 = vpop.f32.mrf.mxu0 }
 0x122   : > { %v3542_v27 = vadd.f32 %v3541_v26, %v3540_v25  ;;  %v1276_v25 = vadd.f32 %v3564_v14, %v3524_v13 }
 0x123   : > { %v3543_v28 = vpop.f32.mrf.mxu0 }
 0x125   : > { %v3544_v30 = vpop.f32.mrf.mxu0 }
 0x126   : > { %v3580_v29 = vpop.f32.mrf.mxu1  ;;  %v3545_v33 = vadd.f32 %v3544_v30, %v3543_v28 }
 0x128   : > { %v3581_v62 = vpop.f32.mrf.mxu1 }
 0x129   : > { %v3582_v38 = vadd.f32 %v3581_v62, %v3580_v29 }
 0x12a   : > { %v3583_v40 = vpop.f32.mrf.mxu1 }
 0x12b   : > { %v4637_v41 = vadd.f32 %v3582_v38, %v3542_v27 }
 0x12c   : > { %v3584_v43 = vpop.f32.mrf.mxu1 }
 0x12d   : > { %v3585_v45 = vadd.f32 %v3584_v43, %v3583_v40  ;;  %v3602_v47 = vpop.f32.mrf.mxu0 }
 0x12f   : > { %v4639_v46 = vadd.f32 %v3585_v45, %v3545_v33  ;;  %v3603_v48 = vpop.f32.mrf.mxu0 }
 0x130   : > { %v3604_v21 = vadd.f32 %v3603_v48, %v3602_v47 }
 0x131   : > { %v3605_v50 = vpop.f32.mrf.mxu0 }
 0x132   : > { %v1742_v19 = vadd.f32 %v3604_v21, %v1276_v25 }
 0x133   : > { %v3606_v51 = vpop.f32.mrf.mxu0 }
 0x134   : > { %v3607_v26 = vadd.f32 %v3606_v51, %v3605_v50  ;;  %v3573_v50 = vadd.f32 %v4631_v10, %v4629_v4 }
 0x135   : > { %v3642_v49 = vpop.f32.mrf.mxu1 }
 0x136   : > { %v1743_v29 = vadd.f32 %v3607_v26, %v1277_v57  ;;  %v1279_v14 = vadd.f32 %v3573_v50, %v4625_v23 }
 0x137   : > { %v3643_v6 = vpop.f32.mrf.mxu1 }
 0x138   : > { %v3644_v30 = vadd.f32 %v3643_v6, %v3642_v49 }
 0x139   : > { %v3645_v54 = vpop.f32.mrf.mxu1 }
 0x13a   : > { %v2177_v60 = vadd.f32 %v3644_v30, %v1742_v19 }
 0x13b   : > { %v3646_v52 = vpop.f32.mrf.mxu1 }
 0x13c   : > { %v3608_v37 = vpop.f32.mrf.mxu0  ;;  %v3647_v33 = vadd.f32 %v3646_v52, %v3645_v54 }
 0x13e   : > { %v3609_v53 = vpop.f32.mrf.mxu0  ;;  %v2178_v42 = vadd.f32 %v3647_v33, %v1743_v29 }
 0x13f   : > { %v3610_v49 = vadd.f32 %v3609_v53, %v3608_v37 }
 0x140   : > { %v3611_v55 = vpop.f32.mrf.mxu0 }
 0x141   : > { %v1744_v18 = vadd.f32 %v3610_v49, %v4627_v3 }
 0x142   : > { %v3612_v7 = vpop.f32.mrf.mxu0 }
 0x143   : > { %v3613_v54 = vadd.f32 %v3612_v7, %v3611_v55 }
 0x144   : > { %v3648_v31 = vpop.f32.mrf.mxu1 }
 0x145   : > { %v1745_v10 = vadd.f32 %v3613_v54, %v1279_v14 }
 0x146   : > { %v3649_v34 = vpop.f32.mrf.mxu1 }
 0x147   : > { %v3650_v20 = vadd.f32 %v3649_v34, %v3648_v31 }
 0x148   : > { %v3651_v32 = vpop.f32.mrf.mxu1 }
 0x149   : > { %v4641_v56 = vpop.f32.mrf.mxu0  ;;  %v2179_v25 = vadd.f32 %v3650_v20, %v1744_v18 }
 0x14a   : > { %v3652_v63 = vpop.f32.mrf.mxu1 }
 0x14b   : > { %v4643_v59 = vpop.f32.mrf.mxu0  ;;  %v3653_v37 = vadd.f32 %v3652_v63, %v3651_v32 }
 0x14c   : > { %v3616_v55 = vadd.f32 %v4643_v59, %v4641_v56 }
 0x14d   : > { %v4647_v36 = vpop.f32.mrf.mxu0 }
 0x14e   : > { %v1746_v30 = vadd.f32 %v3616_v55, %v4633_v17 }
 0x14f   : > { %v3618_v44 = vpop.f32.mrf.mxu0 }
 0x150   : > { %v3619_v23 = vadd.f32 %v3618_v44, %v4647_v36 }
 0x152   : > { %v1747_v33 = vadd.f32 %v3619_v23, %v4635_v22 }
 0x153   : > { %v4645_v1 = vpop.f32.mrf.mxu1 }
 0x155   : > { %v4649_v24 = vpop.f32.mrf.mxu1 }
 0x156   : > { %v3656_v32 = vadd.f32 %v4649_v24, %v4645_v1 }
 0x157   : > { %v4651_v0 = vpop.f32.mrf.mxu1 }
 0x158   : > { %v4653_v2 = vpop.f32.mrf.mxu0  ;;  %v2181_v44 = vadd.f32 %v3656_v32, %v1746_v30 }
 0x159   : > { %v4655_v5 = vpop.f32.mrf.mxu1 }
 0x15a   : > { %v4657_v9 = vpop.f32.mrf.mxu0 }
 0x15b   : > { %v3622_v22 = vadd.f32 %v4657_v9, %v4653_v2 }
 0x15c   : > { %v4663_v39 = vpop.f32.mrf.mxu0 }
 0x15e   : > { %v4671_v16 = vpop.f32.mrf.mxu0 }
 0x162   : > { %v4659_v11 = vpop.f32.mrf.mxu1 }
 0x164   : > { %v4661_v12 = vpop.f32.mrf.mxu1 }
 0x166   : > { %v4669_v15 = vpop.f32.mrf.mxu1 }
 0x168   : > { %v4677_v27 = vpop.f32.mrf.mxu1 }
 0x169   : > { %v3665_v50 = vadd.f32 %v4677_v27, %v4669_v15 }
 0x16d   : > { %v3682_v28 = vpop.f32.mrf.mxu0 }
 0x16e   : > { %v3736_v8 = vpop.f32.mrf.mxu1 }
 0x16f   : > { %v3683_v58 = vpop.f32.mrf.mxu0 }
 0x170   : > { %v3684_v62 = vadd.f32 %v3683_v58, %v3682_v28  ;;  %v2895_v38 = vpop.f32.mrf.mxu1  ;;  %v2180_v28 = vadd.f32 %v3653_v37, %v1745_v10 }
 0x171   : > { %v3685_v35 = vpop.f32.mrf.mxu0 }
 0x172   : > { %v3737_v40 = vpop.f32.mrf.mxu1  ;;  %v2715_v45 = vadd.f32 %v3684_v62, %v2177_v60  ;;  %v3659_v62 = vadd.f32 %v4655_v5, %v4651_v0  ;;  %v3625_v0 = vadd.f32 %v4671_v16, %v4663_v39 }
 0x173   : > { %v3686_v61 = vpop.f32.mrf.mxu0 }
 0x174   : > { %v3687_v43 = vadd.f32 %v3686_v61, %v3685_v35  ;;  %v2898_v47 = vpop.f32.mrf.mxu1  ;;  %v2926_v6 = vadd.f32 %v2895_v38, %v2715_v45  ;;  %v2182_v17 = vadd.f32 %v3659_v62, %v1747_v33  ;;  %v3662_v45 = vadd.f32 %v4661_v12, %v4659_v11 }
 0x176   : > { %v2716_v48 = vadd.f32 %v3687_v43, %v2178_v42  ;;  %v1748_v43 = vadd.f32 %v3622_v22, %v4637_v41 }
 0x178   : > { %v2927_v51 = vadd.f32 %v2898_v47, %v2716_v48  ;;  %v1749_v48 = vadd.f32 %v3625_v0, %v4639_v46  ;;  %v2183_v9 = vadd.f32 %v3662_v45, %v1748_v43 }
 0x17a   : > { %v3483_v52 = vpack.c.bf16 %v2927_v51, %v2926_v6  ;;  %v2184_v51 = vadd.f32 %v3665_v50, %v1749_v48 }
 0x17b   : > { %v3688_v13 = vpop.f32.mrf.mxu0 }
 0x17c   : > { %3484 = vst [vmem:[%s4686_s16] sm:$0xff] %v3483_v52  }
 0x17d   : > { %v3689_v4 = vpop.f32.mrf.mxu0 }
 0x17e   : > { %v3690_v53 = vadd.f32 %v3689_v4, %v3688_v13 }
 0x17f   : > { %v3691_v21 = vpop.f32.mrf.mxu0 }
 0x180   : > { %v2717_v57 = vadd.f32 %v3690_v53, %v2179_v25 }
 0x181   : > { %v3692_v26 = vpop.f32.mrf.mxu0 }
 0x182   : > { %v3693_v19 = vadd.f32 %v3692_v26, %v3691_v21  ;;  %v2928_v3 = vadd.f32 %v3736_v8, %v2717_v57 }
 0x184   : > { %v2718_v7 = vadd.f32 %v3693_v19, %v2180_v28 }
 0x186   : > { %v2929_v31 = vadd.f32 %v3737_v40, %v2718_v7  ;;  %v3694_v34 = vpop.f32.mrf.mxu0 }
 0x188   : > { %v3488_v63 = vpack.c.bf16 %v2929_v31, %v2928_v3  ;;  %v3695_v58 = vpop.f32.mrf.mxu0  ;;  %v3740_v29 = vpop.f32.mrf.mxu1 }
 0x189   : > { %v3696_v56 = vadd.f32 %v3695_v58, %v3694_v34 }
 0x18a   : > { %3503 = vst [vmem:[%s4686_s16 + $0x8] sm:$0xff] %v3488_v63   ;;  %v3697_v59 = vpop.f32.mrf.mxu0  ;;  %v2911_v36 = vpop.f32.mrf.mxu1 }
 0x18b   : > { %v2719_v60 = vadd.f32 %v3696_v56, %v2181_v44 }
 0x18c   : > { %v3698_v8 = vpop.f32.mrf.mxu0  ;;  %v3741_v38 = vpop.f32.mrf.mxu1 }
 0x18d   : > { %v3699_v35 = vadd.f32 %v3698_v8, %v3697_v59  ;;  %v2930_v40 = vadd.f32 %v2911_v36, %v2719_v60 }
 0x18e   : > { %v2914_v1 = vpop.f32.mrf.mxu1 }
 0x18f   : > { %v2720_v24 = vadd.f32 %v3699_v35, %v2182_v17 }
 0x191   : > { %v2931_v61 = vadd.f32 %v2914_v1, %v2720_v24 }
 0x193   : > { %v3493_v42 = vpack.c.bf16 %v2931_v61, %v2930_v40 }
 0x194   : > { %v3700_v5 = vpop.f32.mrf.mxu0 }
 0x195   : > { %3504 = vst [vmem:[%s4686_s16 + $0x10] sm:$0xff] %v3493_v42  }
 0x196   : > { %v3701_v47 = vpop.f32.mrf.mxu0 }
 0x197   : > { %v3702_v49 = vadd.f32 %v3701_v47, %v3700_v5 }
 0x198   : > { %v3703_v2 = vpop.f32.mrf.mxu0 }
 0x199   : > { %v2721_v39 = vadd.f32 %v3702_v49, %v2183_v9 }
 0x19a   : > { %v3704_v6 = vpop.f32.mrf.mxu0 }
 0x19b   : > { %v3705_v16 = vadd.f32 %v3704_v6, %v3703_v2  ;;  %v2932_v52 = vadd.f32 %v3740_v29, %v2721_v39 }
 0x19d   : > { %v2722_v54 = vadd.f32 %v3705_v16, %v2184_v51 }
 0x19f   : > { %v2933_v41 = vadd.f32 %v3741_v38, %v2722_v54 }
 0x1a1   : > { %v3498_v13 = vpack.c.bf16 %v2933_v41, %v2932_v52 }
 0x1a3   : > { %3505 = vst [vmem:[%s4686_s16 + $0x18] sm:$0xff] %v3498_v13  }
 0x1a4 PF: > { %s16_s23 = sadd.s32 1, %s3877_s23   ;;  %s4735_s21 = smov %s3873_s22 }
 0x1a5   : > { %p13_p5 = scmp.ge.s32.totalorder %s16_s23, 4   ;;  %s4736_s22 = smov %s4738_s24 }
 0x1a7   :  { %15 = sbr.rel (!%p13_p5) target bundleno = 2 (0x2), region = 89 }

// kernel: basic_block_forward.2
= control target key start
LH: loop header
LB: loop body
LE: loop exit
PB: predicated region body
PF: predicated region fallthrough
CT: control target
= control target key end

     0   :  { %s5628_s21 = smov 0   ;;  %s5630_s22 = smov 0   ;;  %s7231_s0 = inlined_call_operand.vmem [shape: bf16[2,9,9,512], index: 0, kind: input, shape index: {}]   ;;  %s7232_s1 = inlined_call_operand.vmem [shape: f32[1,512], index: 1, kind: input, shape index: {}]   ;;  %s7233_s2 = inlined_call_operand.vmem [shape: f32[1,512], index: 2, kind: input, shape index: {}]   ;;  %s7234_s3 = inlined_call_operand.vmem [shape: f32[1,9,9,4], index: 3, kind: input, shape index: {}]   ;;  %s7235_s4 = inlined_call_operand.vmem [shape: bf16[4,512,128], index: 4, kind: input, shape index: {}]   ;;  %s7236_s5 = inlined_call_operand.vmem [shape: f32[1,128], index: 5, kind: input, shape index: {}]   ;;  %s7237_s6 = inlined_call_operand.vmem [shape: bf16[2,10,12,128], index: 6, kind: output, shape index: {}]  }
   0x1   :  { %s5632_s23 = smov 0  }
   0x2 LB: > { %s28_s24 = sadd.s32 1, %s5583_s22  ;;  %p4441_p0 = scmp.ge.s32.totalorder %s5587_s23, 1  ;;  %s5587_s23 = sphi %s5632_s23, %s16_s23   ;;  %s5583_s22 = sphi %s5630_s22, %s7293_s22   ;;  %s5579_s21 = sphi %s5628_s21, %s7292_s21  }
   0x3   : > { %p30_p1 = scmp.ge.s32.totalorder %s28_s24, 2  ;;  %p243_p2 = scmp.lt.s32.totalorder %s5587_s23, 3 }
   0x5   : > { %s7295_s24 = smov (%p30_p1, %s28_s24), 0  ;;  %p244_p3 = pnand %p4441_p0, %p243_p2 }
   0x7   : > { %247 = sbr.rel (%p244_p3) target bundleno = 633 (0x279), region = 44 }
   0xc   : > { %v5649_v0 = vld [vmem:[%s7234_s3] sm:$0xff]  ;;  %v5589_v1 = vmov 2   ;;  %v5590_v2 = vmov 1   ;;  %p283_p4 = scmp.lt.s32.totalorder %s5579_s21, 1  ;;  %v5658_v3 = vld [vmem:[%s7234_s3 + $0x30] sm:$0xff]  ;;  %v5413_v5 = vld [vmem:[%s7235_s4 + $0xf8] sm:$0xff]  }
   0xd   : > { %5366 = vset.pattern.permute.xlu0 %v5589_v1  ;;  %5365 = vset.pattern.permute.xlu1 %v5590_v2  ;;  %v5663_v4 = vld [vmem:[%s7234_s3 + $0x10] sm:$0xff]  ;;  %v5591_v6 = vmov 0   ;;  %v5414_v7 = vld [vmem:[%s7235_s4 + $0xb8] sm:$0xff]   ;;  %v5592_v8 = vmov 3   ;;  %v5731_v10 = vld [vmem:[%s7234_s3 + $0x40] sm:$0xff]  ;;  %vm629_vm0 = vcmask 1040384  }
   0xe   : > { %1147 = vperm.xlu0 %5366, %v5649_v0   ;;  %827 = vperm.xlu1 %5365, %v5649_v0   ;;  %s7297_s21 = smov (!%p283_p4, %s5579_s21), 1  ;;  %v5415_v9 = vld [vmem:[%s7235_s4 + $0xf0] sm:$0xff]   ;;  %v5417_v12 = vld [vmem:[%s7235_s4 + $0xe8] sm:$0xff]   ;;  %v5419_v15 = vld [vmem:[%s7235_s4 + $0xe0] sm:$0xff]   ;;  %vm630_vm1 = vsmask.f32 256 }
   0xf   : > { %s5336_s7 = smul.u32 80, %s7297_s21  ;;  %5055 = vmatprep.subr.bf16.mxu1 %v5413_v5  ;;  %v5416_v11 = vld [vmem:[%s7235_s4 + $0xb0] sm:$0xff]   ;;  %v5418_v14 = vld [vmem:[%s7235_s4 + $0xa8] sm:$0xff]   ;;  %v434_v16 = vld [vmem:[%s7234_s3 + $0x20] sm:$0xff]  ;;  %vm2257_vm3 = vsmask.f32 3328 }
  0x10   : > { %5056 = vmatpush3.bf16.msra.mxu1 %v5414_v7  ;;  %v5745_v13 = vld [vmem:[%s7234_s3 + $0x70] sm:$0xff]  ;;  %v5420_v17 = vld [vmem:[%s7235_s4 + $0xa0] sm:$0xff]   ;;  %v5421_v18 = vld [vmem:[%s7235_s4 + $0xd8] sm:$0xff]   ;;  %s5335_s14 = smul.u32 288, %s7297_s21  ;;  %vm2258_vm4 = vsmask.f32 7440 }
  0x11   : > { %s5676_s12 = scalar_lea.vmem %s7237_s6, %s5336_s7  ;;  %5057 = vmatprep.subr.bf16.mxu1 %v5415_v9  ;;  %v5422_v19 = vld [vmem:[%s7235_s4 + $0x98] sm:$0xff]   ;;  %v5772_v20 = vld [vmem:[%s7234_s3 + $0x50] sm:$0xff]  ;;  %v808_v22 = vld [vmem:[%s7234_s3 + $0x8] sm:$0x1] }
  0x12   : > { %1177 = vperm.xlu0 %5366, %v5658_v3   ;;  %837 = vperm.xlu1 %5365, %v5663_v4   ;;  %4229 = vst [vmem:[%s5676_s12] sm:$0xf] %v5591_v6  ;;  %4230 = vst [vmem:[%s5676_s12 + $0x4] sm:$0x3] %v5591_v6  ;;  %v5423_v21 = vld [vmem:[%s7235_s4 + $0xd0] sm:$0xff]   ;;  %v5425_v24 = vld [vmem:[%s7235_s4 + $0xc8] sm:$0xff]   ;;  %s5921_s25 = scalar_lea.vmem %s7231_s0, %s5335_s14 }
  0x13   : > { %4247 = vst [vmem:[%s5676_s12 + $0x48] sm:$0xf] %v5591_v6  ;;  %4248 = vst [vmem:[%s5676_s12 + $0x4c] sm:$0x3] %v5591_v6  ;;  %v5424_v23 = vld [vmem:[%s7235_s4 + $0x90] sm:$0xff]   ;;  %v5428_v25 = vld [vmem:[%s7235_s4 + $0x78] sm:$0xff]  }
  0x14   : > { %4231 = vst [vmem:[%s5676_s12 + $0x8] sm:$0xf] %v5591_v6  ;;  %4232 = vst [vmem:[%s5676_s12 + $0xc] sm:$0x3] %v5591_v6  ;;  %5058 = vmatpush3.bf16.msra.mxu1 %v5416_v11  ;;  %v814_v26 = vld [vmem:[%s7234_s3 + $0x38] sm:$0x1]  ;;  %5015 = vmatprep.subr.bf16.mxu0 %v5428_v25 }
  0x15   : > { %4233 = vst [vmem:[%s5676_s12 + $0x10] sm:$0xf] %v5591_v6  ;;  %4234 = vst [vmem:[%s5676_s12 + $0x14] sm:$0x3] %v5591_v6  ;;  %5059 = vmatprep.subr.bf16.mxu1 %v5417_v12  ;;  %v5426_v27 = vld [vmem:[%s7235_s4 + $0x88] sm:$0xff]   ;;  %v5430_v28 = vld [vmem:[%s7235_s4 + $0x38] sm:$0xff]  }
  0x16   : > { %4235 = vst [vmem:[%s5676_s12 + $0x18] sm:$0xf] %v5591_v6  ;;  %4236 = vst [vmem:[%s5676_s12 + $0x1c] sm:$0x3] %v5591_v6  ;;  %5372 = vset.pattern.permute.xlu0 %v5592_v8  ;;  %5367 = vset.pattern.permute.xlu1 %v5589_v1  ;;  %v5427_v29 = vld [vmem:[%s7235_s4 + $0xc0] sm:$0xff]   ;;  %v5431_v30 = vld [vmem:[%s7235_s4 + $0x70] sm:$0xff]  }
  0x17   : > { %4237 = vst [vmem:[%s5676_s12 + $0x20] sm:$0xf] %v5591_v6  ;;  %4238 = vst [vmem:[%s5676_s12 + $0x24] sm:$0x3] %v5591_v6  ;;  %1531 = vperm.xlu0 %5372, %v5663_v4   ;;  %1157 = vperm.xlu1 %5367, %v5663_v4   ;;  %v5429_v31 = vld [vmem:[%s7235_s4 + $0x80] sm:$0xff]   ;;  %v5432_v32 = vld [vmem:[%s7235_s4 + $0x30] sm:$0xff]  }
  0x18   : > { %4239 = vst [vmem:[%s5676_s12 + $0x28] sm:$0xf] %v5591_v6  ;;  %4240 = vst [vmem:[%s5676_s12 + $0x2c] sm:$0x3] %v5591_v6  ;;  %5060 = vmatpush3.bf16.msra.mxu1 %v5418_v14  ;;  %5016 = vmatpush3.bf16.msra.mxu0 %v5430_v28  ;;  %v5433_v33 = vld [vmem:[%s7235_s4 + $0x68] sm:$0xff]   ;;  %v5435_v35 = vld [vmem:[%s7235_s4 + $0x60] sm:$0xff]  }
  0x19   : > { %4241 = vst [vmem:[%s5676_s12 + $0x30] sm:$0xf] %v5591_v6  ;;  %4242 = vst [vmem:[%s5676_s12 + $0x34] sm:$0x3] %v5591_v6  ;;  %5061 = vmatprep.subr.bf16.mxu1 %v5419_v15  ;;  %5017 = vmatprep.subr.bf16.mxu0 %v5431_v30  ;;  %v5434_v34 = vld [vmem:[%s7235_s4 + $0x28] sm:$0xff]   ;;  %v5436_v36 = vld [vmem:[%s7235_s4 + $0x20] sm:$0xff]  }
  0x1a   : > { %4243 = vst [vmem:[%s5676_s12 + $0x38] sm:$0xf] %v5591_v6  ;;  %4244 = vst [vmem:[%s5676_s12 + $0x3c] sm:$0x3] %v5591_v6  ;;  %v5437_v37 = vld [vmem:[%s7235_s4 + $0x58] sm:$0xff]   ;;  %v5439_v39 = vld [vmem:[%s7235_s4 + $0x50] sm:$0xff]  }
  0x1b   : > { %4245 = vst [vmem:[%s5676_s12 + $0x40] sm:$0xf] %v5591_v6  ;;  %4246 = vst [vmem:[%s5676_s12 + $0x44] sm:$0x3] %v5591_v6  ;;  %1561 = vperm.xlu0 %5372, %v5731_v10   ;;  %5368 = vset.pattern.permute.xlu1 %v5592_v8  ;;  %v5438_v38 = vld [vmem:[%s7235_s4 + $0x18] sm:$0xff]   ;;  %v5440_v40 = vld [vmem:[%s7235_s4 + $0x10] sm:$0xff]  }
  0x1c   : > { %1521 = vperm.xlu1 %5368, %v5649_v0   ;;  %5062 = vmatpush3.bf16.msra.mxu1 %v5420_v17  ;;  %v5441_v41 = vld [vmem:[%s7235_s4 + $0x48] sm:$0xff]   ;;  %v5443_v44 = vld [vmem:[%s7235_s4 + $0x40] sm:$0xff]   ;;  %v441_v45 = vld [vmem:[%s7234_s3 + $0x58] sm:$0x1] }
  0x1d   : > { %5063 = vmatprep.subr.bf16.mxu1 %v5421_v18  ;;  %5018 = vmatpush3.bf16.msra.mxu0 %v5432_v32  ;;  %v435_v42 = vld [vmem:[%s7234_s3 + $0x28] sm:$0x1]  ;;  %v5444_v46 = vld [vmem:[%s7235_s4] sm:$0xff]   ;;  %v1130_v48 = vld [vmem:[%s7234_s3 + $0x18] sm:$0x1] }
  0x1e   : > { %5019 = vmatprep.subr.bf16.mxu0 %v5433_v33  ;;  %v5442_v43 = vld [vmem:[%s7235_s4 + $0x8] sm:$0xff]   ;;  %v442_v47 = vld [vmem:[%s7234_s3 + $0x60] sm:$0xff]  ;;  %v1512_v51 = vld [vmem:[%s7234_s3 + $0x58] sm:$0x1] }
  0x1f   : > { %1591 = vperm.xlu0 %5372, %v5745_v13   ;;  %v1136_v49 = vld [vmem:[%s7234_s3 + $0x48] sm:$0x1]  ;;  %v5445_v53 = vld [vmem:[%s7235_s4 + $0x178] sm:$0xff]   ;;  %v823_v56 = vld [vmem:[%s7234_s3 + $0x80] sm:$0xff] }
  0x20   : > { %5369 = vset.pattern.permute.xlu1 %v5591_v6  ;;  %5064 = vmatpush3.bf16.msra.mxu1 %v5422_v19  ;;  %v1506_v50 = vld [vmem:[%s7234_s3 + $0x28] sm:$0x1]  ;;  %v1142_v54 = vld [vmem:[%s7234_s3 + $0x78] sm:$0x1]  ;;  %v5927_v59 = vld [vmem:[%s5921_s25] sm:$0xff] }
  0x21   : > { %470 = vperm.xlu1 %5369, %v434_v16   ;;  %5065 = vmatprep.subr.bf16.mxu1 %v5423_v21  ;;  %v820_v52 = vld [vmem:[%s7234_s3 + $0x68] sm:$0x1]  ;;  %v433_v57 = vld [vmem:[%s7234_s3 + $0x18] sm:$0x1]  ;;  %v687_v62 = vrot.slane %v5927_v59, 4  ;;  %v5939_v63 = vld [vmem:[%s5921_s25 + $0x20] sm:$0xff] }
  0x22   : > { %5020 = vmatpush3.bf16.msra.mxu0 %v5434_v34  ;;  %v431_v55 = vld [vmem:[%s7234_s3 + $0x8] sm:$0x1]  ;;  %v810_v58 = vld [vmem:[%s7234_s3 + $0x18] sm:$0x1]  ;;  %v5950_v5 = vld [vmem:[%s7232_s1 + $0x1] ss:$0 sm:$0xff] }
  0x23   : > { %5382 = vset.pattern.permute.xlu0 %v5590_v2  ;;  %5021 = vmatprep.subr.bf16.mxu0 %v5435_v35  ;;  %v5453_v60 = vld [vmem:[%s7235_s4 + $0x1f8] sm:$0xff]   ;;  %v1144_v61 = vld [vmem:[%s7234_s3 + $0x88] sm:$0x1]  ;;  %v723_v7 = vunpack.c.l.bf16 %v687_v62  ;;  %v689_v9 = vrot.slane %v5939_v63, 4  ;;  %v5981_v21 = vld [vmem:[%s7233_s2 + $0x2] ss:$0 sm:$0xff] }
  0x24   : > { %847 = vperm.xlu0 %5382, %v434_v16   ;;  %5066 = vmatpush3.bf16.msra.mxu1 %v5424_v23  ;;  %v5959_v11 = vld [vmem:[%s5921_s25 + $0x68] sm:$0xff]  ;;  %v5994_v28 = vld [vmem:[%s7232_s1 + $0x3] ss:$0 sm:$0xff]  ;;  %v437_v33 = vld [vmem:[%s7234_s3 + $0x38] sm:$0x1] }
  0x25   : > { %480 = vperm.xlu1 %5369, %v5658_v3   ;;  %5067 = vmatprep.subr.bf16.mxu1 %v5425_v24  ;;  %v313_v12 = vld [vmem:[%s5921_s25 + $0x28] sm:$0xff]  ;;  %v1049_v15 = vunpack.c.l.bf16 %v5959_v11  ;;  %v747_v17 = vmul.f32 %v5950_v5, %v723_v7  ;;  %v725_v18 = vunpack.c.l.bf16 %v689_v9  ;;  %vm6106_vm2 = vmand %vm629_vm0, %vm630_vm1 }
  0x26   : > { %5022 = vmatpush3.bf16.msra.mxu0 %v5436_v36  ;;  %v5975_v19 = vld [vmem:[%s5921_s25 + $0x88] sm:$0xff]  ;;  %v1045_v30 = vunpack.c.l.bf16 %v313_v12  ;;  %vm6474_vm5 = vmor %vm2257_vm3, %vm2258_vm4 }
  0x27   : > { %5023 = vmatprep.subr.bf16.mxu0 %v5437_v37  ;;  %v1389_v25 = vrot.slane %v5975_v19, 4  ;;  %v5997_v32 = vld [vmem:[%s5921_s25 + $0xe8] sm:$0xff] }
  0x28   : > { %877 = vperm.xlu0 %5382, %v5772_v20   ;;  %5068 = vmatpush3.bf16.msra.mxu1 %v5426_v27  ;;  %v749_v27 = vmul.f32 %v5950_v5, %v725_v18  ;;  %v1132_v18 = vld [vmem:[%s7234_s3 + $0x28] sm:$0x1] }
  0x29   : > { %5370 = vset.pattern.permute.xlu1 %v5590_v2  ;;  %5069 = vmatprep.subr.bf16.mxu1 %v5427_v29  ;;  %v1425_v36 = vunpack.c.l.bf16 %v1389_v25  ;;  %v6041_v25 = vld [vmem:[%s7233_s2] ss:$0 sm:$0xff] }
  0x2a   : > { %857 = vperm.xlu1 %5370, %v5658_v3   ;;  %5024 = vmatpush3.bf16.msra.mxu0 %v5438_v38 }
  0x2b   : > { %5025 = vmatprep.subr.bf16.mxu0 %v5439_v39  ;;  %v1395_v39 = vrot.slane %v5997_v32, 4 }
  0x2c   : > { %832 = vperm.xlu0 %5382, %v808_v22   ;;  %5070 = vmatpush3.bf16.msra.mxu1 %v5429_v31  ;;  %v1504_v22 = vld [vmem:[%s7234_s3 + $0x18] sm:$0x1] }
  0x2d   : > { %5135 = vmatprep.subr.bf16.mxu1 %v5453_v60 }
  0x2e   : > { %5371 = vset.pattern.permute.xlu1 %v5589_v1  ;;  %5026 = vmatpush3.bf16.msra.mxu0 %v5440_v40 }
  0x2f   : > { %1167 = vperm.xlu1 %5371, %v434_v16   ;;  %5027 = vmatprep.subr.bf16.mxu0 %v5441_v41 }
  0x30   : > { %862 = vperm.xlu0 %5382, %v814_v26  }
  0x32   : > { %5028 = vmatpush3.bf16.msra.mxu0 %v5442_v43 }
  0x33   : > { %5373 = vset.pattern.permute.xlu1 %v5592_v8  ;;  %5029 = vmatprep.subr.bf16.mxu0 %v5443_v44 }
  0x34   : > { %5389 = vset.pattern.permute.xlu0 %v5591_v6  ;;  %1541 = vperm.xlu1 %5373, %v434_v16   ;;  %v5971_v16 = vld [vmem:[%s7233_s2 + $0x1] ss:$0 sm:$0xff] }
  0x35   : > { %450 = vperm.xlu0 %5389, %v5649_v0   ;;  %v1128_v0 = vld [vmem:[%s7234_s3 + $0x8] sm:$0x1]  ;;  %v771_v26 = vadd.f32 %v5971_v16, %v747_v17  ;;  %v773_v38 = vadd.f32 %v5971_v16, %v749_v27  ;;  %v6044_v27 = vld [vmem:[%s5921_s25 + $0x10] sm:$0x11] }
  0x36   : > { %5030 = vmatpush3.bf16.msra.mxu0 %v5444_v46 }
  0x37   : > { %5095 = vmatprep.subr.bf16.mxu0 %v5445_v53  ;;  %v789_v37 = vmax.f32 %v771_v26, 0.0  ;;  %v812_v53 = vld [vmem:[%s7234_s3 + $0x28] sm:$0x1] }
  0x38   : > { %1551 = vperm.xlu1 %5373, %v5658_v3   ;;  %v309_v3 = vld [vmem:[%s5921_s25 + $0x8] sm:$0xff] }
  0x39   : > { %460 = vperm.xlu0 %5389, %v5663_v4   ;;  %v1043_v4 = vunpack.c.l.bf16 %v309_v3  ;;  %v1381_v31 = vrot.slane %v309_v3, 4 }
  0x3b   : > { %v1417_v43 = vunpack.c.l.bf16 %v1381_v31 }
  0x3c   : > { %5374 = vset.pattern.permute.xlu1 %v5591_v6 }
  0x3d   : > { %500 = vperm.xlu1 %5374, %v5772_v20   ;;  %490 = vperm.xlu0 %5389, %v5731_v10  }
  0x41   : > { %5375 = vset.pattern.permute.xlu1 %v5590_v2  ;;  %520 = vperm.xlu0 %5389, %v5745_v13  }
  0x42   : > { %867 = vperm.xlu1 %5375, %v5731_v10  }
  0x45   : > { %475 = vperm.xlu0 %5389, %v435_v42   ;;  %v6011_v42 = vld [vmem:[%s7233_s2 + $0x3] ss:$0 sm:$0xff] }
  0x46   : > { %5376 = vset.pattern.permute.xlu1 %v5589_v1 }
  0x47   : > { %1187 = vperm.xlu1 %5376, %v5731_v10   ;;  %v5956_v10 = vld [vmem:[%s7232_s1 + $0x2] ss:$0 sm:$0xff] }
  0x48   : > { %v1067_v14 = vmul.f32 %v5956_v10, %v1043_v4  ;;  %v1073_v24 = vmul.f32 %v5956_v10, %v1049_v15  ;;  %v1069_v41 = vmul.f32 %v5956_v10, %v1045_v30  ;;  %v6029_v4 = vld [vmem:[%s7232_s1] ss:$0 sm:$0xff] }
  0x49   : > { %505 = vperm.xlu0 %5389, %v441_v45  }
  0x4a   : > { %v1091_v23 = vadd.f32 %v5981_v21, %v1067_v14  ;;  %v1097_v35 = vadd.f32 %v5981_v21, %v1073_v24  ;;  %v320_v14 = vld [vmem:[%s5921_s25 + $0x60] sm:$0xff] }
  0x4b   : > { %1197 = vperm.xlu1 %5376, %v5772_v20   ;;  %v352_v31 = vunpack.c.l.bf16 %v320_v14 }
  0x4c   : > { %v1109_v34 = vmax.f32 %v1091_v23, 0.0  ;;  %v1115_v46 = vmax.f32 %v1097_v35, 0.0 }
  0x4d   : > { %5393 = vset.pattern.permute.xlu0 %v5589_v1 }
  0x4e   : > { %1207 = vperm.xlu0 %5393, %v442_v47  }
  0x4f   : > { %5377 = vset.pattern.permute.xlu1 %v5592_v8 }
  0x50   : > { %1571 = vperm.xlu1 %5377, %v5772_v20   ;;  %v1383_v20 = vrot.slane %v313_v12, 4 }
  0x52   : > { %1162 = vperm.xlu0 %5393, %v1130_v48   ;;  %v1419_v29 = vunpack.c.l.bf16 %v1383_v20  ;;  %v316_v48 = vld [vmem:[%s5921_s25 + $0x40] sm:$0xff] }
  0x53   : > { %v691_v60 = vrot.slane %v316_v48, 4  ;;  %v350_v7 = vunpack.c.l.bf16 %v316_v48  ;;  %v376_v48 = vmul.f32 %v6029_v4, %v352_v31 }
  0x54   : > { %5378 = vset.pattern.permute.xlu1 %v5591_v6  ;;  %v1443_v40 = vmul.f32 %v5994_v28, %v1419_v29 }
  0x55   : > { %510 = vperm.xlu1 %5378, %v442_v47   ;;  %v727_v26 = vunpack.c.l.bf16 %v691_v60  ;;  %v374_v30 = vmul.f32 %v6029_v4, %v350_v7  ;;  %v1508_v60 = vld [vmem:[%s7234_s3 + $0x38] sm:$0x1] }
  0x56   : > { %1192 = vperm.xlu0 %5393, %v1136_v49  }
  0x59   : > { %5379 = vset.pattern.permute.xlu1 %v5590_v2 }
  0x5a   : > { %887 = vperm.xlu1 %5379, %v442_v47   ;;  %5395 = vset.pattern.permute.xlu0 %v5592_v8 }
  0x5b   : > { %1546 = vperm.xlu0 %5395, %v1506_v50  }
  0x5e   : > { %897 = vperm.xlu1 %5379, %v5745_v13  }
  0x5f   : > { %1576 = vperm.xlu0 %5395, %v1512_v51   ;;  %v791_v51 = vmax.f32 %v773_v38, 0.0 }
  0x62   : > { %5380 = vset.pattern.permute.xlu1 %v5589_v1 }
  0x63   : > { %1217 = vperm.xlu1 %5380, %v5745_v13   ;;  %5399 = vset.pattern.permute.xlu0 %v5590_v2  ;;  %v1502_v13 = vld [vmem:[%s7234_s3 + $0x8] sm:$0x1] }
  0x64   : > { %892 = vperm.xlu0 %5399, %v820_v52   ;;  %v1431_v52 = vunpack.c.l.bf16 %v1395_v39  ;;  %v1134_v39 = vld [vmem:[%s7234_s3 + $0x38] sm:$0x1] }
  0x67   : > { %5381 = vset.pattern.permute.xlu1 %v5592_v8 }
  0x68   : > { %1581 = vperm.xlu1 %5381, %v442_v47   ;;  %5402 = vset.pattern.permute.xlu0 %v5589_v1  ;;  %v1449_v47 = vmul.f32 %v5994_v28, %v1425_v36 }
  0x69   : > { %1222 = vperm.xlu0 %5402, %v1142_v54   ;;  %v1467_v54 = vadd.f32 %v6011_v42, %v1443_v40 }
  0x6a   : > { %v1473_v3 = vadd.f32 %v6011_v42, %v1449_v47  ;;  %v398_v47 = vadd.f32 %v6041_v25, %v374_v30 }
  0x6b   : > { %v1485_v15 = vmax.f32 %v1467_v54, 0.0 }
  0x6c   : > { %5383 = vset.pattern.permute.xlu1 %v5591_v6  ;;  %v1491_v29 = vmax.f32 %v1473_v3, 0.0  ;;  %v416_v7 = vmax.f32 %v398_v47, 0.0 }
  0x6d   : > { %455 = vperm.xlu1 %5383, %v431_v55   ;;  %5404 = vset.pattern.permute.xlu0 %v5591_v6  ;;  %v1093_v55 = vadd.f32 %v5981_v21, %v1069_v41  ;;  %v688_v41 = vrot.slane %v6044_v27, 4 }
  0x6e   : > { %530 = vperm.xlu0 %5404, %v823_v56  }
  0x6f   : > { %v1111_v17 = vmax.f32 %v1093_v55, 0.0 }
  0x71   : > { %465 = vperm.xlu1 %5383, %v433_v57  }
  0x72   : > { %5407 = vset.pattern.permute.xlu0 %v5592_v8 }
  0x73   : > { %1601 = vperm.xlu0 %5407, %v823_v56  }
  0x75   : > { %5384 = vset.pattern.permute.xlu1 %v5590_v2 }
  0x76   : > { %842 = vperm.xlu1 %5384, %v810_v58   ;;  %v1441_v58 = vmul.f32 %v5994_v28, %v1417_v43 }
  0x77   : > { %5410 = vset.pattern.permute.xlu0 %v5589_v1 }
  0x78   : > { %1232 = vperm.xlu0 %5410, %v1144_v61   ;;  %v6022_v61 = vld [vmem:[%s5921_s25 + $0xa0] sm:$0xff]  ;;  %v1465_v24 = vadd.f32 %v6011_v42, %v1441_v58 }
  0x79   : > { %v697_v20 = vrot.slane %v6022_v61, 4 }
  0x7a   : > { %5385 = vset.pattern.permute.xlu1 %v5589_v1  ;;  %v1483_v43 = vmax.f32 %v1465_v24, 0.0 }
  0x7b   : > { %1152 = vperm.xlu1 %5385, %v1128_v0   ;;  %v733_v40 = vunpack.c.l.bf16 %v697_v20 }
  0x7c   : > { %5412 = vset.pattern.permute.xlu0 %v5592_v8 }
  0x7f   : > { %5386 = vset.pattern.permute.xlu1 %v5592_v8 }
  0x80   : > { %1526 = vperm.xlu1 %5386, %v1502_v13   ;;  %v1455_v13 = vmul.f32 %v5994_v28, %v1431_v52 }
  0x82   : > { %v1479_v36 = vadd.f32 %v6011_v42, %v1455_v13 }
  0x84   : > { %1536 = vperm.xlu1 %5386, %v1504_v22  }
  0x88   : > { %5387 = vset.pattern.permute.xlu1 %v5591_v6 }
  0x89   : > { %v828_v44 = vpop.permute.xlu1 %827  ;;  %485 = vperm.xlu1 %5387, %v437_v33   ;;  %v1148_v45 = vpop.permute.xlu0 %1147  ;;  %v693_v33 = vrot.slane %v320_v14, 4 }
  0x8a   : > { %v915_v49 = vmul.f32 %v828_v44, %v789_v37  ;;  %v1235_v50 = vmul.f32 %v1148_v45, %v1109_v34  ;;  %v751_v44 = vmul.f32 %v5950_v5, %v727_v26 }
  0x8b   : > { %v729_v52 = vunpack.c.l.bf16 %v693_v33  ;;  %v439_v33 = vld [vmem:[%s7234_s3 + $0x48] sm:$0x1] }
  0x8c   : > { %v4953_v56 = vpack.c.bf16 %v915_v49, %v915_v49  ;;  %v4971_v57 = vpack.c.bf16 %v1235_v50, %v1235_v50  ;;  %v322_v49 = vld [vmem:[%s5921_s25 + $0x70] sm:$0x11] }
  0x8d   : > { %v838_v62 = vpop.permute.xlu1 %837  ;;  %5388 = vset.pattern.permute.xlu1 %v5590_v2  ;;  %v1178_v0 = vpop.permute.xlu0 %1177 }
  0x8e   : > { %1005 = vst [vmem:[#allocation2 + $0x4] sm:$0xf] %v4953_v56  ;;  %1325 = vst [vmem:[#allocation2 + $0x8] sm:$0xf] %v4971_v57  ;;  %v917_v9 = vmul.f32 %v838_v62, %v791_v51  ;;  %v1241_v12 = vmul.f32 %v1178_v0, %v1115_v46  ;;  %852 = vperm.xlu1 %5388, %v812_v53   ;;  %v1497_v51 = vmax.f32 %v1479_v36, 0.0  ;;  %v317_v53 = vld [vmem:[%s5921_s25 + $0x48] sm:$0xff]  ;;  %v724_v57 = vunpack.c.l.bf16 %v688_v41 }
  0x8f   : > { %v757_v56 = vmul.f32 %v5950_v5, %v733_v40  ;;  %v775_v62 = vadd.f32 %v5971_v16, %v751_v44  ;;  %v694_v0 = vrot.slane %v322_v49, 4  ;;  %v346_v36 = vunpack.c.l.bf16 %v5927_v59 }
  0x90   : > { %v4955_v22 = vpack.c.bf16 %v917_v9, %v917_v9  ;;  %v4977_v23 = vpack.c.bf16 %v1241_v12, %v1241_v12  ;;  %v400_v9 = vadd.f32 %v6041_v25, %v376_v48  ;;  %v1385_v12 = vrot.slane %v317_v53, 4 }
  0x91   : > { %v781_v20 = vadd.f32 %v5971_v16, %v757_v56  ;;  %v793_v24 = vmax.f32 %v775_v62, 0.0  ;;  %v730_v26 = vunpack.c.l.bf16 %v694_v0  ;;  %v370_v49 = vmul.f32 %v6029_v4, %v346_v36  ;;  %v5461_v36 = vld [vmem:[%s7235_s4 + $0x1e8] sm:$0xff]  }
  0x92   : > { %1009 = vst [vmem:[#allocation2 + $0x24] sm:$0xf] %v4955_v22  ;;  %1337 = vst [vmem:[#allocation2 + $0x68] sm:$0xf] %v4977_v23  ;;  %v1532_v34 = vpop.permute.xlu0 %1531  ;;  %v1158_v35 = vpop.permute.xlu1 %1157  ;;  %5390 = vset.pattern.permute.xlu1 %v5589_v1  ;;  %v748_v22 = vmul.f32 %v5950_v5, %v724_v57  ;;  %v418_v31 = vmax.f32 %v400_v9, 0.0  ;;  %v348_v9 = vunpack.c.l.bf16 %v5939_v63 }
  0x93   : > { %v1611_v37 = vmul.f32 %v1532_v34, %v1485_v15  ;;  %v1237_v38 = vmul.f32 %v1158_v35, %v1111_v17  ;;  %1172 = vperm.xlu1 %5390, %v1132_v18   ;;  %v753_v15 = vmul.f32 %v5950_v5, %v729_v52  ;;  %v1047_v17 = vunpack.c.l.bf16 %v317_v53 }
  0x94   : > { %v799_v40 = vmax.f32 %v781_v20, 0.0  ;;  %v772_v41 = vadd.f32 %v5971_v16, %v748_v22  ;;  %v394_v20 = vadd.f32 %v6041_v25, %v370_v49  ;;  %v356_v22 = vunpack.c.l.bf16 %v6022_v61  ;;  %v5462_v49 = vld [vmem:[%s7235_s4 + $0x1a8] sm:$0xff]  }
  0x95   : > { %v4991_v45 = vpack.c.bf16 %v1611_v37, %v1611_v37  ;;  %v4973_v46 = vpack.c.bf16 %v1237_v38, %v1237_v38  ;;  %v777_v34 = vadd.f32 %v5971_v16, %v753_v15  ;;  %v1071_v35 = vmul.f32 %v5956_v10, %v1047_v17 }
  0x96   : > { %v1562_v50 = vpop.permute.xlu0 %1561  ;;  %v1387_v37 = vrot.slane %v5959_v11, 4  ;;  %v816_v11 = vld [vmem:[%s7234_s3 + $0x48] sm:$0x1]  ;;  %v372_v61 = vmul.f32 %v6029_v4, %v348_v9 }
  0x97   : > { %1703 = vst [vmem:[#allocation2 + $0x2c] sm:$0xf] %v4991_v45  ;;  %1329 = vst [vmem:[#allocation2 + $0x28] sm:$0xf] %v4973_v46  ;;  %v1617_v54 = vmul.f32 %v1562_v50, %v1491_v29  ;;  %v1522_v55 = vpop.permute.xlu1 %1521  ;;  %1182 = vperm.xlu1 %5390, %v1134_v39   ;;  %v754_v46 = vmul.f32 %v5950_v5, %v730_v26  ;;  %v795_v59 = vmax.f32 %v777_v34, 0.0 }
  0x98   : > { %v1609_v58 = vmul.f32 %v1522_v55, %v1483_v43  ;;  %v1421_v43 = vunpack.c.l.bf16 %v1385_v12  ;;  %v1423_v50 = vunpack.c.l.bf16 %v1387_v37  ;;  %v790_v55 = vmax.f32 %v772_v41, 0.0  ;;  %v5457_v12 = vld [vmem:[%s7235_s4 + $0x1f0] sm:$0xff]  }
  0x99   : > { %v4997_v3 = vpack.c.bf16 %v1617_v54, %v1617_v54  ;;  %v1095_v56 = vadd.f32 %v5981_v21, %v1071_v35  ;;  %v778_v0 = vadd.f32 %v5971_v16, %v754_v46 }
  0x9a   : > { %v4989_v13 = vpack.c.bf16 %v1609_v58, %v1609_v58  ;;  %v1592_v14 = vpop.permute.xlu0 %1591  ;;  %v1445_v57 = vmul.f32 %v5994_v28, %v1421_v43  ;;  %v1447_v63 = vmul.f32 %v5994_v28, %v1423_v50 }
  0x9b   : > { %1715 = vst [vmem:[#allocation2 + $0x8c] sm:$0xf] %v4997_v3  ;;  %v1623_v18 = vmul.f32 %v1592_v14, %v1497_v51  ;;  %5391 = vset.pattern.permute.xlu1 %v5592_v8  ;;  %v5454_v3 = vld [vmem:[%s7235_s4 + $0x1b8] sm:$0xff]   ;;  %v1113_v17 = vmax.f32 %v1095_v56, 0.0 }
  0x9c   : > { %1699 = vst [vmem:[#allocation2 + $0xc] sm:$0xf] %v4989_v13  ;;  %v471_v23 = vpop.permute.xlu1 %470  ;;  %1556 = vperm.xlu1 %5391, %v1508_v60   ;;  %v1471_v43 = vadd.f32 %v6011_v42, %v1447_v63 }
  0x9d   : > { %v5003_v29 = vpack.c.bf16 %v1623_v18, %v1623_v18  ;;  %v542_v30 = vmul.f32 %v471_v23, %v416_v7  ;;  %v818_v18 = vld [vmem:[%s7234_s3 + $0x58] sm:$0x1]  ;;  %v324_v23 = vld [vmem:[%s5921_s25 + $0x80] sm:$0xff] }
  0x9e   : > { %v1738_v54 = vld [vmem:[#allocation2 + $0x28] sm:$0xff]  ;;  %v354_v35 = vunpack.c.l.bf16 %v324_v23 }
  0x9f   : > { %1727 = vst [vmem:[#allocation2 + $0xec] sm:$0xf] %v5003_v29  ;;  %v4939_v38 = vpack.c.bf16 %v542_v30, %v542_v30  ;;  %v848_v39 = vpop.permute.xlu0 %847  ;;  %v796_v29 = vmax.f32 %v778_v0, 0.0  ;;  %v1469_v30 = vadd.f32 %v6011_v42, %v1445_v57  ;;  %v6136_v0 = vld [vmem:[%s5921_s25 + $0x50] sm:$0x11] }
  0xa0   : > { %v919_v44 = vmul.f32 %v848_v39, %v793_v24  ;;  %v481_v45 = vpop.permute.xlu1 %480  ;;  %5392 = vset.pattern.permute.xlu1 %v5591_v6  ;;  %v695_v39 = vrot.slane %v324_v23, 4 }
  0xa1   : > { %639 = vst [vmem:[#allocation2 + $0x40] sm:$0xf] %v4939_v38  ;;  %v544_v47 = vmul.f32 %v481_v45, %v418_v31  ;;  %495 = vperm.xlu1 %5392, %v439_v33   ;;  %v5458_v31 = vld [vmem:[%s7235_s4 + $0x1b0] sm:$0xff]  }
  0xa2   : > { %v4957_v48 = vpack.c.bf16 %v919_v44, %v919_v44  ;;  %v1006_v33 = vld [vmem:[#allocation2 + $0x14] sm:$0x1]  ;;  %v380_v44 = vmul.f32 %v6029_v4, %v356_v22  ;;  %v731_v57 = vunpack.c.l.bf16 %v695_v39 }
  0xa3   : > { %v4941_v51 = vpack.c.bf16 %v544_v47, %v544_v47  ;;  %v878_v52 = vpop.permute.xlu0 %877  ;;  %v1736_v53 = vld [vmem:[#allocation2 + $0x8] sm:$0xff]  ;;  %v1487_v47 = vmax.f32 %v1469_v30, 0.0 }
  0xa4   : > { %1013 = vst [vmem:[#allocation2 + $0x44] sm:$0xf] %v4957_v48  ;;  %v925_v58 = vmul.f32 %v878_v52, %v799_v40  ;;  %v4526_v60 = vcombine.low %v1736_v53, %v1738_v54  ;;  %v4527_v62 = vcombine.high %v1736_v53, %v1738_v54  ;;  %v1138_v48 = vld [vmem:[%s7234_s3 + $0x58] sm:$0x1]  ;;  %v396_v52 = vadd.f32 %v6041_v25, %v372_v61  ;;  %v329_v30 = vld [vmem:[%s5921_s25 + $0xa8] sm:$0xff] }
  0xa5   : > { %643 = vst [vmem:[#allocation2 + $0x60] sm:$0xf] %v4941_v51  ;;  %v858_v7 = vpop.permute.xlu1 %857  ;;  %5394 = vset.pattern.permute.xlu1 %v5590_v2  ;;  %v1018_v51 = vld [vmem:[#allocation2 + $0x74] sm:$0x1]  ;;  %v378_v53 = vmul.f32 %v6029_v4, %v354_v35  ;;  %v755_v23 = vmul.f32 %v5950_v5, %v731_v57 }
  0xa6   : > { %v4963_v13 = vpack.c.bf16 %v925_v58, %v925_v58  ;;  %v921_v14 = vmul.f32 %v858_v7, %v795_v59  ;;  %872 = vperm.xlu1 %5394, %v816_v11   ;;  %2184 = vmatprep.mubr.bf16.mxu1 %v4527_v62  ;;  %v412_v59 = vmax.f32 %v394_v20, 0.0  ;;  %v6122_v11 = vld [vmem:[%s5921_s25 + $0xe0] sm:$0xff]  ;;  %v404_v62 = vadd.f32 %v6041_v25, %v380_v44 }
  0xa7   : > { %2185 = vmatmul.mubr.bf16.vlgmr.msra.gmra.mxu1 %v4526_v60  ;;  %v833_v15 = vpop.permute.xlu0 %832  ;;  %v360_v54 = vunpack.c.l.bf16 %v6122_v11  ;;  %v1489_v60 = vmax.f32 %v1471_v43, 0.0  ;;  %v402_v20 = vadd.f32 %v6041_v25, %v378_v53  ;;  %v5471_v43 = vld [vmem:[%s7235_s4 + $0x1d0] sm:$0xff]  }
  0xa8   : > { %1025 = vst [vmem:[#allocation2 + $0xa4] sm:$0xf] %v4963_v13  ;;  %v4959_v24 = vpack.c.bf16 %v921_v14, %v921_v14  ;;  %v916_v26 = vmul.f32 %v833_v15, %v790_v55  ;;  %5136 = vmatpush3.bf16.msra.mxu1 %v5454_v3  ;;  %v5465_v55 = vld [vmem:[%s7235_s4 + $0x1e0] sm:$0xff]   ;;  %v351_v13 = vunpack.c.l.bf16 %v6136_v0  ;;  %v422_v61 = vmax.f32 %v404_v62, 0.0  ;;  %v5472_v53 = vld [vmem:[%s7235_s4 + $0x190] sm:$0xff]  }
  0xa9   : > { %5137 = vmatprep.subr.bf16.mxu1 %v5457_v12  ;;  %v1051_v12 = vunpack.c.l.bf16 %v5975_v19  ;;  %v5466_v14 = vld [vmem:[%s7235_s4 + $0x1a0] sm:$0xff]   ;;  %v384_v63 = vmul.f32 %v6029_v4, %v360_v54  ;;  %v5469_v19 = vld [vmem:[%s7235_s4 + $0x1d8] sm:$0xff]   ;;  %v420_v39 = vmax.f32 %v402_v20, 0.0 }
  0xaa   : > { %1017 = vst [vmem:[#allocation2 + $0x64] sm:$0xf] %v4959_v24  ;;  %v4954_v37 = vpack.c.bf16 %v916_v26, %v916_v26  ;;  %v1168_v38 = vpop.permute.xlu1 %1167  ;;  %882 = vperm.xlu1 %5394, %v818_v18   ;;  %v414_v18 = vmax.f32 %v396_v52, 0.0  ;;  %v330_v24 = vld [vmem:[%s5921_s25 + $0xb0] sm:$0x11] }
  0xab   : > { %v1239_v40 = vmul.f32 %v1168_v38, %v1113_v17  ;;  %v863_v41 = vpop.permute.xlu0 %862  ;;  %v1510_v17 = vld [vmem:[%s7234_s3 + $0x48] sm:$0x1]  ;;  %v1075_v35 = vmul.f32 %v5956_v10, %v1051_v12 }
  0xac   : > { %v1007_v45 = vsel %vm6106_vm2, %v4954_v37, %v1006_v33  ;;  %v922_v46 = vmul.f32 %v863_v41, %v796_v29  ;;  %5138 = vmatpush3.bf16.msra.mxu1 %v5458_v31  ;;  %v5470_v37 = vld [vmem:[%s7235_s4 + $0x198] sm:$0xff]   ;;  %v357_v41 = vunpack.c.l.bf16 %v330_v24 }
  0xad   : > { %1008 = vst [vmem:[#allocation2 + $0x14] sm:$0x1] %v1007_v45  ;;  %v4975_v50 = vpack.c.bf16 %v1239_v40, %v1239_v40  ;;  %5139 = vmatprep.subr.bf16.mxu1 %v5461_v36  ;;  %v375_v36 = vmul.f32 %v6029_v4, %v351_v13  ;;  %v408_v40 = vadd.f32 %v6041_v25, %v384_v63  ;;  %v443_v45 = vld [vmem:[%s7234_s3 + $0x68] sm:$0x1] }
  0xae   : > { %v4960_v56 = vpack.c.bf16 %v922_v46, %v922_v46  ;;  %5396 = vset.pattern.permute.xlu1 %v5589_v1  ;;  %v779_v46 = vadd.f32 %v5971_v16, %v755_v23  ;;  %v381_v57 = vmul.f32 %v6029_v4, %v357_v41  ;;  %v5474_v63 = vld [vmem:[%s7235_s4 + $0x188] sm:$0xff]  }
  0xaf   : > { %1333 = vst [vmem:[#allocation2 + $0x48] sm:$0xf] %v4975_v50  ;;  %v1542_v58 = vpop.permute.xlu1 %1541  ;;  %1202 = vperm.xlu1 %5396, %v1138_v48   ;;  %v399_v52 = vadd.f32 %v6041_v25, %v375_v36 }
  0xb0   : > { %v1019_v3 = vsel %vm6106_vm2, %v4960_v56, %v1018_v51  ;;  %v1613_v7 = vmul.f32 %v1542_v58, %v1487_v47  ;;  %v451_v9 = vpop.permute.xlu0 %450  ;;  %5140 = vmatpush3.bf16.msra.mxu1 %v5462_v49  ;;  %v1053_v47 = vunpack.c.l.bf16 %v329_v30  ;;  %v6172_v51 = vadd.f32 %v5981_v21, %v1075_v35  ;;  %v6180_v58 = vld [vmem:[%s5921_s25 + $0xc8] sm:$0xff]  ;;  %v6213_v35 = vld [vmem:[%s5921_s25 + $0x58] sm:$0x11] }
  0xb1   : > { %1020 = vst [vmem:[#allocation2 + $0x74] sm:$0x1] %v1019_v3  ;;  %v538_v15 = vmul.f32 %v451_v9, %v412_v59  ;;  %5141 = vmatprep.subr.bf16.mxu1 %v5465_v55  ;;  %v1391_v59 = vrot.slane %v329_v30, 4  ;;  %v426_v56 = vmax.f32 %v408_v40, 0.0  ;;  %v797_v62 = vmax.f32 %v779_v46, 0.0 }
  0xb2   : > { %v4993_v22 = vpack.c.bf16 %v1613_v7, %v1613_v7  ;;  %v445_v3 = vld [vmem:[%s7234_s3 + $0x78] sm:$0x1]  ;;  %v1077_v7 = vmul.f32 %v5956_v10, %v1053_v47  ;;  %v1055_v9 = vunpack.c.l.bf16 %v6180_v58  ;;  %v417_v24 = vmax.f32 %v399_v52, 0.0 }
  0xb3   : > { %v4935_v26 = vpack.c.bf16 %v538_v15, %v538_v15  ;;  %v1552_v29 = vpop.permute.xlu1 %1551  ;;  %5397 = vset.pattern.permute.xlu1 %v5592_v8  ;;  %v6191_v15 = vld [vmem:[%s5921_s25 + $0x38] sm:$0x11] }
  0xb4   : > { %1707 = vst [vmem:[#allocation2 + $0x4c] sm:$0xf] %v4993_v22  ;;  %v1615_v31 = vmul.f32 %v1552_v29, %v1489_v60  ;;  %1566 = vperm.xlu1 %5397, %v1510_v17   ;;  %v461_v33 = vpop.permute.xlu0 %460  ;;  %5142 = vmatpush3.bf16.msra.mxu1 %v5466_v14  ;;  %v5473_v60 = vld [vmem:[%s7235_s4 + $0x1c8] sm:$0xff]   ;;  %v1427_v14 = vunpack.c.l.bf16 %v1391_v59  ;;  %v6194_v17 = vld [vmem:[%s5921_s25 + $0xc0] sm:$0xff]  ;;  %v1046_v20 = vunpack.c.l.bf16 %v6191_v15  ;;  %v1117_v22 = vmax.f32 %v6172_v51, 0.0 }
  0xb5   : > { %628 = vst [vmem:[#allocation2] sm:$0xf] %v4935_v26  ;;  %v540_v38 = vmul.f32 %v461_v33, %v414_v18  ;;  %5143 = vmatprep.subr.bf16.mxu1 %v5469_v19  ;;  %v405_v26 = vadd.f32 %v6041_v25, %v381_v57  ;;  %v822_v30 = vld [vmem:[%s7234_s3 + $0x78] sm:$0x1]  ;;  %v1079_v33 = vmul.f32 %v5956_v10, %v1055_v9  ;;  %v699_v40 = vrot.slane %v6194_v17, 4  ;;  %v6225_v59 = vld [vmem:[#allocation2 + $0x60] sm:$0xff] }
  0xb6   : > { %v4995_v44 = vpack.c.bf16 %v1615_v31, %v1615_v31  ;;  %v6206_v31 = vadd.f32 %v5981_v21, %v1077_v7  ;;  %v6236_v57 = vld [vmem:[#allocation2 + $0x40] sm:$0xff]  ;;  %v5447_v7 = vld [vmem:[%s7235_s4 + $0x170] sm:$0xff]  }
  0xb7   : > { %v4937_v48 = vpack.c.bf16 %v540_v38, %v540_v38  ;;  %v1451_v38 = vmul.f32 %v5994_v28, %v1427_v14 }
  0xb8   : > { %1711 = vst [vmem:[#allocation2 + $0x6c] sm:$0xf] %v4995_v44  ;;  %v501_v49 = vpop.permute.xlu1 %500  ;;  %5398 = vset.pattern.permute.xlu1 %v5591_v6  ;;  %v491_v50 = vpop.permute.xlu0 %490  ;;  %5144 = vmatpush3.bf16.msra.mxu1 %v5470_v37 }
  0xb9   : > { %635 = vst [vmem:[#allocation2 + $0x20] sm:$0xf] %v4937_v48  ;;  %v548_v54 = vmul.f32 %v501_v49, %v422_v61  ;;  %515 = vperm.xlu1 %5398, %v443_v45   ;;  %v546_v55 = vmul.f32 %v491_v50, %v420_v39  ;;  %5145 = vmatprep.subr.bf16.mxu1 %v5471_v43  ;;  %v6210_v61 = vld [vmem:[%s5921_s25 + $0x98] sm:$0x11]  ;;  %v358_v39 = vunpack.c.l.bf16 %v6194_v17  ;;  %v5475_v43 = vld [vmem:[%s7235_s4 + $0x1c0] sm:$0xff]   ;;  %v1386_v17 = vrot.slane %v6213_v35, 4 }
  0xba   : > { %v1070_v50 = vmul.f32 %v5956_v10, %v1046_v20  ;;  %v1052_v9 = vunpack.c.l.bf16 %v6210_v61  ;;  %v1140_v20 = vld [vmem:[%s7234_s3 + $0x68] sm:$0x1] }
  0xbb   : > { %v4945_v12 = vpack.c.bf16 %v548_v54, %v548_v54  ;;  %v4943_v13 = vpack.c.bf16 %v546_v55, %v546_v55  ;;  %v1740_v36 = vld [vmem:[#allocation2 + $0x48] sm:$0xff]  ;;  %v423_v54 = vmax.f32 %v405_v26, 0.0  ;;  %v5446_v55 = vld [vmem:[%s7235_s4 + $0x138] sm:$0xff]  }
  0xbc   : > { %v521_v18 = vpop.permute.xlu0 %520  ;;  %5146 = vmatpush3.bf16.msra.mxu1 %v5472_v53  ;;  %v6221_v46 = vld [vmem:[#allocation2] sm:$0xff]  ;;  %v6259_v26 = vld [vmem:[%s5921_s25 + $0xb8] sm:$0x11] }
  0xbd   : > { %651 = vst [vmem:[#allocation2 + $0xa0] sm:$0xf] %v4945_v12  ;;  %v868_v19 = vpop.permute.xlu1 %867  ;;  %525 = vperm.xlu1 %5398, %v445_v3   ;;  %647 = vst [vmem:[#allocation2 + $0x80] sm:$0xf] %v4943_v13  ;;  %v552_v23 = vmul.f32 %v521_v18, %v426_v56  ;;  %5147 = vmatprep.subr.bf16.mxu1 %v5473_v60  ;;  %v1119_v60 = vmax.f32 %v6206_v31, 0.0  ;;  %v1103_v3 = vadd.f32 %v5981_v21, %v1079_v33  ;;  %v5476_v18 = vld [vmem:[%s7235_s4 + $0x180] sm:$0xff]  }
  0xbe   : > { %v923_v29 = vmul.f32 %v868_v19, %v797_v62  ;;  %v640_v62 = vld [vmem:[#allocation2 + $0x50] sm:$0x1]  ;;  %v4529_v13 = vcombine.high %v6236_v57, %v6225_v59  ;;  %v382_v19 = vmul.f32 %v6029_v4, %v358_v39 }
  0xbf   : > { %v1742_v37 = vld [vmem:[#allocation2 + $0x68] sm:$0xff]  ;;  %v4949_v41 = vpack.c.bf16 %v552_v23, %v552_v23  ;;  %v5448_v4 = vld [vmem:[%s7235_s4 + $0x130] sm:$0xff]  }
  0xc0   : > { %v4961_v44 = vpack.c.bf16 %v923_v29, %v923_v29  ;;  %v4531_v45 = vcombine.high %v1740_v36, %v1742_v37  ;;  %v6223_v47 = vld [vmem:[#allocation2 + $0x20] sm:$0xff]  ;;  %v4530_v48 = vcombine.low %v1740_v36, %v1742_v37  ;;  %v476_v49 = vpop.permute.xlu0 %475  ;;  %5148 = vmatpush3.bf16.msra.mxu1 %v5474_v63  ;;  %v1475_v63 = vadd.f32 %v6011_v42, %v1451_v38  ;;  %v652_v36 = vld [vmem:[#allocation2 + $0xb0] sm:$0x1] }
  0xc1   : > { %5400 = vset.pattern.permute.xlu1 %v5590_v2  ;;  %v4524_v51 = vcombine.low %v6221_v46, %v6223_v47  ;;  %v4525_v52 = vcombine.high %v6221_v46, %v6223_v47  ;;  %659 = vst [vmem:[#allocation2 + $0xe0] sm:$0xf] %v4949_v41  ;;  %v543_v53 = vmul.f32 %v476_v49, %v417_v24  ;;  %v1121_v37 = vmax.f32 %v1103_v3, 0.0  ;;  %v5451_v3 = vld [vmem:[%s7235_s4 + $0x160] sm:$0xff]  }
  0xc2   : > { %1021 = vst [vmem:[#allocation2 + $0x84] sm:$0xf] %v4961_v44  ;;  %v1188_v56 = vpop.permute.xlu1 %1187  ;;  %902 = vperm.xlu1 %5400, %v822_v30   ;;  %2192 = vmatprep.mubr.bf16.mxu1 %v4531_v45  ;;  %v6256_v24 = vadd.f32 %v5981_v21, %v1070_v50  ;;  %v701_v30 = vrot.slane %v6122_v11, 4  ;;  %v5449_v11 = vld [vmem:[%s7235_s4 + $0x168] sm:$0xff]   ;;  %v1076_v38 = vmul.f32 %v5956_v10, %v1052_v9  ;;  %v1422_v41 = vunpack.c.l.bf16 %v1386_v17  ;;  %v5485_v9 = vld [vmem:[%s7235_s4 + $0x2f8] sm:$0xff]  }
  0xc3   : > { %v1243_v12 = vmul.f32 %v1188_v56, %v1117_v22  ;;  %2119 = vmatprep.mubr.bf16.mxu0 %v4525_v52  ;;  %2193 = vmatmul.mubr.bf16.gmra.mxu1 %v4530_v48  ;;  %v4940_v14 = vpack.c.bf16 %v543_v53, %v543_v53  ;;  %v735_v22 = vunpack.c.l.bf16 %v699_v40  ;;  %v1493_v44 = vmax.f32 %v1475_v63, 0.0  ;;  %v1514_v45 = vld [vmem:[%s7234_s3 + $0x68] sm:$0x1]  ;;  %v6312_v63 = vld [vmem:[%s7232_s1 + $0x1] ss:$0 sm:$0xff] }
  0xc4   : > { %2120 = vmatmul.mubr.bf16.vlgmr.msra.gmra.mxu0 %v4524_v51  ;;  %v506_v23 = vpop.permute.xlu0 %505  ;;  %5149 = vmatprep.subr.bf16.mxu1 %v5475_v43  ;;  %v1392_v43 = vrot.slane %v6259_v26, 4  ;;  %v406_v48 = vadd.f32 %v6041_v25, %v382_v19  ;;  %v5450_v10 = vld [vmem:[%s7235_s4 + $0x128] sm:$0xff]   ;;  %v6283_v52 = vld [vmem:[#allocation2 + $0xa0] sm:$0xff]  ;;  %v737_v53 = vunpack.c.l.bf16 %v701_v30  ;;  %v1112_v56 = vmax.f32 %v6256_v24, 0.0  ;;  %v6289_v25 = vld [vmem:[%s5921_s25 + $0xd0] sm:$0x11] }
  0xc5   : > { %v4979_v29 = vpack.c.bf16 %v1243_v12, %v1243_v12  ;;  %2127 = vmatprep.mubr.bf16.mxu0 %v4529_v13  ;;  %v641_v31 = vsel %vm6106_vm2, %v4940_v14, %v640_v62  ;;  %v549_v33 = vmul.f32 %v506_v23, %v423_v54  ;;  %5096 = vmatpush3.bf16.msra.mxu0 %v5446_v55  ;;  %v700_v17 = vrot.slane %v6289_v25, 4 }
  0xc6   : > { %v1198_v61 = vpop.permute.xlu1 %1197  ;;  %5401 = vset.pattern.permute.xlu1 %v5589_v1  ;;  %642 = vst [vmem:[#allocation2 + $0x50] sm:$0x1] %v641_v31  ;;  %5097 = vmatprep.subr.bf16.mxu0 %v5447_v7  ;;  %v759_v49 = vmul.f32 %v5950_v5, %v735_v22  ;;  %v4528_v5 = vcombine.low %v6236_v57, %v6225_v59  ;;  %v1428_v57 = vunpack.c.l.bf16 %v1392_v43  ;;  %v5452_v22 = vld [vmem:[%s7235_s4 + $0x120] sm:$0xff]  }
  0xc7   : > { %1341 = vst [vmem:[#allocation2 + $0x88] sm:$0xf] %v4979_v29  ;;  %v1245_v39 = vmul.f32 %v1198_v61, %v1119_v60  ;;  %1212 = vperm.xlu1 %5401, %v1140_v20   ;;  %v4946_v40 = vpack.c.bf16 %v549_v33, %v549_v33  ;;  %5150 = vmatpush3.bf16.msra.mxu1 %v5476_v18  ;;  %v424_v18 = vmax.f32 %v406_v48, 0.0  ;;  %v1057_v29 = vunpack.c.l.bf16 %v5997_v32  ;;  %v5459_v48 = vld [vmem:[%s7235_s4 + $0x150] sm:$0xff]  }
  0xc8   : > { %v1100_v7 = vadd.f32 %v5981_v21, %v1076_v38  ;;  %v1446_v59 = vmul.f32 %v5994_v28, %v1422_v41  ;;  %v1516_v21 = vld [vmem:[%s7234_s3 + $0x78] sm:$0x1]  ;;  %v783_v20 = vadd.f32 %v5971_v16, %v759_v49  ;;  %v761_v19 = vmul.f32 %v6312_v63, %v737_v53  ;;  %5215 = vmatprep.subr.bf16.mxu1 %v5485_v9 }
  0xc9   : > { %v4981_v50 = vpack.c.bf16 %v1245_v39, %v1245_v39  ;;  %v6281_v51 = vld [vmem:[#allocation2 + $0x80] sm:$0xff]  ;;  %v653_v54 = vsel %vm6106_vm2, %v4946_v40, %v652_v36  ;;  %v1208_v55 = vpop.permute.xlu0 %1207  ;;  %5098 = vmatpush3.bf16.msra.mxu0 %v5448_v4  ;;  %v5455_v16 = vld [vmem:[%s7235_s4 + $0x158] sm:$0xff]   ;;  %v1393_v33 = vrot.slane %v6180_v58, 4  ;;  %v1452_v36 = vmul.f32 %v5994_v28, %v1428_v57 }
  0xca   : > { %v4533_v60 = vcombine.high %v6281_v51, %v6283_v52  ;;  %654 = vst [vmem:[#allocation2 + $0xb0] sm:$0x1] %v653_v54  ;;  %v1247_v62 = vmul.f32 %v1208_v55, %v1121_v37  ;;  %5099 = vmatprep.subr.bf16.mxu0 %v5449_v11  ;;  %v1118_v31 = vmax.f32 %v1100_v7, 0.0  ;;  %v1330_v4 = vld [vmem:[#allocation2 + $0x38] sm:$0x1]  ;;  %v1470_v61 = vadd.f32 %v6011_v42, %v1446_v59 }
  0xcb   : > { %1345 = vst [vmem:[#allocation2 + $0xa8] sm:$0xf] %v4981_v50  ;;  %v1572_v12 = vpop.permute.xlu1 %1571  ;;  %5403 = vset.pattern.permute.xlu1 %v5592_v8  ;;  %v736_v11 = vunpack.c.l.bf16 %v700_v17  ;;  %v801_v39 = vmax.f32 %v783_v20, 0.0  ;;  %v6328_v40 = vld [vmem:[%s7233_s2 + $0x1] ss:$0 sm:$0xff]  ;;  %v5456_v58 = vld [vmem:[%s7235_s4 + $0x118] sm:$0xff]   ;;  %v4532_v43 = vcombine.low %v6281_v51, %v6283_v52  ;;  %v1429_v53 = vunpack.c.l.bf16 %v1393_v33 }
  0xcc   : > { %v1619_v13 = vmul.f32 %v1572_v12, %v1493_v44  ;;  %1586 = vperm.xlu1 %5403, %v1514_v45   ;;  %2128 = vmatmul.mubr.bf16.gmra.mxu0 %v4528_v5  ;;  %v4983_v14 = vpack.c.bf16 %v1247_v62, %v1247_v62  ;;  %v785_v41 = vadd.f32 %v6328_v40, %v761_v19  ;;  %v6339_v44 = vld [vmem:[%s7232_s1 + $0x2] ss:$0 sm:$0xff]  ;;  %v1342_v51 = vld [vmem:[#allocation2 + $0x98] sm:$0x1]  ;;  %v1488_v52 = vmax.f32 %v1470_v61, 0.0  ;;  %v5463_v19 = vld [vmem:[%s7235_s4 + $0x148] sm:$0xff]  }
  0xcd   : > { %2135 = vmatprep.mubr.bf16.mxu0 %v4533_v60  ;;  %5100 = vmatpush3.bf16.msra.mxu0 %v5450_v10  ;;  %v1163_v23 = vpop.permute.xlu0 %1162  ;;  %v1081_v45 = vmul.f32 %v6339_v44, %v1057_v29  ;;  %v1476_v54 = vadd.f32 %v6011_v42, %v1452_v36  ;;  %v339_v5 = vld [vmem:[%s5921_s25 + $0xf8] sm:$0x11]  ;;  %v5544_v62 = vld [vmem:[%s7234_s3 + $0x80] sm:$0xff]  ;;  %v347_v20 = vunpack.c.l.bf16 %v6044_v27  ;;  %v341_v33 = vld [vmem:[%s5921_s25 + $0x108] sm:$0xff] }
  0xce   : > { %v4999_v24 = vpack.c.bf16 %v1619_v13, %v1619_v13  ;;  %1349 = vst [vmem:[#allocation2 + $0xc8] sm:$0xf] %v4983_v14  ;;  %5101 = vmatprep.subr.bf16.mxu0 %v5451_v3  ;;  %v1238_v30 = vmul.f32 %v1163_v23, %v1112_v56  ;;  %v760_v56 = vmul.f32 %v6312_v63, %v736_v11  ;;  %v5460_v3 = vld [vmem:[%s7235_s4 + $0x110] sm:$0xff]   ;;  %v1058_v42 = vunpack.c.l.bf16 %v339_v5  ;;  %v6360_v12 = vld [vmem:[%s7233_s2 + $0x2] ss:$0 sm:$0xff]  ;;  %v1744_v14 = vld [vmem:[#allocation2 + $0x88] sm:$0xff] }
  0xcf   : > { %v803_v9 = vmax.f32 %v785_v41, 0.0  ;;  %v1105_v59 = vadd.f32 %v6360_v12, %v1081_v45  ;;  %v1494_v23 = vmax.f32 %v1476_v54, 0.0  ;;  %v5464_v27 = vld [vmem:[%s7235_s4 + $0x108] sm:$0xff]   ;;  %v314_v11 = vld [vmem:[%s5921_s25 + $0x30] sm:$0x11] }
  0xd0   : > { %1719 = vst [vmem:[#allocation2 + $0xac] sm:$0xf] %v4999_v24  ;;  %v511_v37 = vpop.permute.xlu1 %510  ;;  %1596 = vperm.xlu1 %5403, %v1516_v21   ;;  %v4974_v32 = vpack.c.bf16 %v1238_v30, %v1238_v30  ;;  %v1708_v30 = vld [vmem:[#allocation2 + $0x5c] sm:$0x1]  ;;  %v1082_v36 = vmul.f32 %v6339_v44, %v1058_v42  ;;  %v349_v54 = vunpack.c.l.bf16 %v314_v11 }
  0xd1   : > { %v550_v38 = vmul.f32 %v511_v37, %v424_v18  ;;  %5102 = vmatpush3.bf16.msra.mxu0 %v5452_v22  ;;  %v1193_v28 = vpop.permute.xlu0 %1192  ;;  %v6368_v18 = vld [vmem:[%s7232_s1 + $0x3] ss:$0 sm:$0xff]  ;;  %v1123_v41 = vmax.f32 %v1105_v59, 0.0 }
  0xd2   : > { %5103 = vmatprep.subr.bf16.mxu0 %v5455_v16  ;;  %v1331_v49 = vsel %vm6106_vm2, %v4974_v32, %v1330_v4  ;;  %v1244_v10 = vmul.f32 %v1193_v28, %v1118_v31  ;;  %v1453_v21 = vmul.f32 %v6368_v18, %v1429_v53  ;;  %v784_v31 = vadd.f32 %v6328_v40, %v760_v56  ;;  %v340_v37 = vld [vmem:[%s5921_s25 + $0x100] sm:$0xff] }
  0xd3   : > { %v4947_v50 = vpack.c.bf16 %v550_v38, %v550_v38  ;;  %1332 = vst [vmem:[#allocation2 + $0x38] sm:$0x1] %v1331_v49  ;;  %v5467_v38 = vld [vmem:[%s7235_s4 + $0x140] sm:$0xff]  }
  0xd4   : > { %5405 = vset.pattern.permute.xlu1 %v5590_v2  ;;  %2136 = vmatmul.mubr.bf16.gmra.mxu0 %v4532_v43  ;;  %v4980_v55 = vpack.c.bf16 %v1244_v10, %v1244_v10  ;;  %v1397_v43 = vrot.slane %v341_v33, 4  ;;  %v6395_v49 = vld [vmem:[%s7233_s2 + $0x3] ss:$0 sm:$0xff] }
  0xd5   : > { %655 = vst [vmem:[#allocation2 + $0xc0] sm:$0xf] %v4947_v50  ;;  %v888_v60 = vpop.permute.xlu1 %887  ;;  %907 = vperm.xlu1 %5405, %v5544_v62   ;;  %5104 = vmatpush3.bf16.msra.mxu0 %v5456_v58  ;;  %v1477_v10 = vadd.f32 %v6395_v49, %v1453_v21  ;;  %v6401_v50 = vld [vmem:[%s7232_s1] ss:$0 sm:$0xff] }
  0xd6   : > { %v927_v7 = vmul.f32 %v888_v60, %v801_v39  ;;  %5105 = vmatprep.subr.bf16.mxu0 %v5459_v48  ;;  %v1343_v57 = vsel %vm6106_vm2, %v4980_v55, %v1342_v51  ;;  %v1547_v13 = vpop.permute.xlu0 %1546  ;;  %v447_v48 = vld [vmem:[%s7234_s3 + $0x88] sm:$0x1]  ;;  %v371_v53 = vmul.f32 %v6401_v50, %v347_v20  ;;  %v1720_v51 = vld [vmem:[#allocation2 + $0xbc] sm:$0x1]  ;;  %v690_v55 = vrot.slane %v314_v11, 4  ;;  %v5468_v56 = vld [vmem:[%s7235_s4 + $0x100] sm:$0xff]  }
  0xd7   : > { %v1746_v17 = vld [vmem:[#allocation2 + $0xa8] sm:$0xff]  ;;  %1344 = vst [vmem:[#allocation2 + $0x98] sm:$0x1] %v1343_v57  ;;  %v1614_v22 = vmul.f32 %v1547_v13, %v1488_v52  ;;  %v802_v52 = vmax.f32 %v784_v31, 0.0  ;;  %v1106_v60 = vadd.f32 %v6360_v12, %v1082_v36  ;;  %v1433_v57 = vunpack.c.l.bf16 %v1397_v43  ;;  %v1354_v43 = vld [vmem:[#allocation2 + $0xf8] sm:$0x1] }
  0xd8   : > { %v4965_v24 = vpack.c.bf16 %v927_v7, %v927_v7  ;;  %v4535_v29 = vcombine.high %v1744_v14, %v1746_v17  ;;  %v4534_v16 = vcombine.low %v1744_v14, %v1746_v17  ;;  %v1495_v13 = vmax.f32 %v1477_v10, 0.0  ;;  %v824_v20 = vld [vmem:[%s7234_s3 + $0x88] sm:$0x1] }
  0xd9   : > { %v898_v4 = vpop.permute.xlu1 %897  ;;  %5406 = vset.pattern.permute.xlu1 %v5589_v1  ;;  %5106 = vmatpush3.bf16.msra.mxu0 %v5460_v3  ;;  %v4994_v61 = vpack.c.bf16 %v1614_v22, %v1614_v22  ;;  %v362_v1 = vunpack.c.l.bf16 %v340_v37  ;;  %v5477_v3 = vld [vmem:[%s7235_s4 + $0x278] sm:$0xff]   ;;  %v726_v22 = vunpack.c.l.bf16 %v690_v55  ;;  %v1457_v33 = vmul.f32 %v6368_v18, %v1433_v57 }
  0xda   : > { %1029 = vst [vmem:[#allocation2 + $0xc4] sm:$0xf] %v4965_v24  ;;  %v929_v32 = vmul.f32 %v898_v4, %v803_v9  ;;  %1227 = vperm.xlu1 %5406, %v5544_v62   ;;  %2200 = vmatprep.mubr.bf16.mxu1 %v4535_v29  ;;  %v1577_v39 = vpop.permute.xlu0 %1576  ;;  %v1124_v24 = vmax.f32 %v1106_v60, 0.0  ;;  %v311_v29 = vld [vmem:[%s5921_s25 + $0x18] sm:$0x11] }
  0xdb   : > { %2201 = vmatmul.mubr.bf16.gmra.mxu1 %v4534_v16  ;;  %5107 = vmatprep.subr.bf16.mxu0 %v5463_v19  ;;  %v1709_v58 = vsel %vm6106_vm2, %v4994_v61, %v1708_v30  ;;  %v1620_v28 = vmul.f32 %v1577_v39, %v1494_v23  ;;  %v386_v42 = vmul.f32 %v6401_v50, %v362_v1  ;;  %v1030_v23 = vld [vmem:[#allocation2 + $0xd4] sm:$0x1]  ;;  %v1044_v39 = vunpack.c.l.bf16 %v311_v29  ;;  %v632_v60 = vld [vmem:[#allocation2 + $0x10] sm:$0x1] }
  0xdc   : > { %v4967_v45 = vpack.c.bf16 %v929_v32, %v929_v32  ;;  %1710 = vst [vmem:[#allocation2 + $0x5c] sm:$0x1] %v1709_v58  ;;  %v373_v19 = vmul.f32 %v6401_v50, %v349_v54  ;;  %v1518_v58 = vld [vmem:[%s7234_s3 + $0x88] sm:$0x1] }
  0xdd   : > { %5108 = vmatpush3.bf16.msra.mxu0 %v5464_v27  ;;  %v5000_v5 = vpack.c.bf16 %v1620_v28, %v1620_v28 }
  0xde   : > { %1033 = vst [vmem:[#allocation2 + $0xe4] sm:$0xf] %v4967_v45  ;;  %v1218_v62 = vpop.permute.xlu1 %1217  ;;  %5408 = vset.pattern.permute.xlu1 %v5591_v6  ;;  %5109 = vmatprep.subr.bf16.mxu0 %v5467_v38  ;;  %v6418_v6 = vld [vmem:[%s7233_s2] ss:$0 sm:$0xff]  ;;  %v750_v38 = vmul.f32 %v6312_v63, %v726_v22 }
  0xdf   : > { %v1249_v7 = vmul.f32 %v1218_v62, %v1123_v41  ;;  %535 = vperm.xlu1 %5408, %v447_v48   ;;  %v1721_v9 = vsel %vm6106_vm2, %v5000_v5, %v1720_v51  ;;  %v893_v59 = vpop.permute.xlu0 %892  ;;  %v395_v14 = vadd.f32 %v6418_v6, %v371_v53  ;;  %v410_v30 = vadd.f32 %v6418_v6, %v386_v42  ;;  %v343_v5 = vld [vmem:[%s5921_s25 + $0x118] sm:$0x11] }
  0xe0   : > { %1722 = vst [vmem:[#allocation2 + $0xbc] sm:$0x1] %v1721_v9  ;;  %v928_v17 = vmul.f32 %v893_v59, %v802_v52  ;;  %v397_v11 = vadd.f32 %v6418_v6, %v373_v19  ;;  %v1382_v48 = vrot.slane %v311_v29, 4  ;;  %v1481_v53 = vadd.f32 %v6395_v49, %v1457_v33  ;;  %v636_v19 = vld [vmem:[#allocation2 + $0x30] sm:$0x1] }
  0xe1   : > { %v4985_v21 = vpack.c.bf16 %v1249_v7, %v1249_v7  ;;  %5110 = vmatpush3.bf16.msra.mxu0 %v5468_v56  ;;  %v413_v27 = vmax.f32 %v395_v14, 0.0  ;;  %v1747_v37 = vld [vmem:[#allocation2 + $0xc0] sm:$0xff]  ;;  %v428_v45 = vmax.f32 %v410_v30, 0.0  ;;  %v774_v62 = vadd.f32 %v6328_v40, %v750_v38 }
  0xe2   : > { %v4966_v16 = vpack.c.bf16 %v928_v17, %v928_v17  ;;  %5175 = vmatprep.subr.bf16.mxu0 %v5477_v3  ;;  %v415_v54 = vmax.f32 %v397_v11, 0.0  ;;  %v1068_v3 = vmul.f32 %v6339_v44, %v1044_v39  ;;  %v1060_v7 = vunpack.c.l.bf16 %v343_v5  ;;  %v1010_v39 = vld [vmem:[#allocation2 + $0x34] sm:$0x1] }
  0xe3   : > { %1353 = vst [vmem:[#allocation2 + $0xe8] sm:$0xf] %v4985_v21  ;;  %v1582_v31 = vpop.permute.xlu1 %1581  ;;  %5409 = vset.pattern.permute.xlu1 %v5590_v2  ;;  %v1418_v9 = vunpack.c.l.bf16 %v1382_v48  ;;  %v1384_v59 = vrot.slane %v6191_v15, 4  ;;  %v1499_v57 = vmax.f32 %v1481_v53, 0.0  ;;  %v792_v22 = vmax.f32 %v774_v62, 0.0 }
  0xe4   : > { %v1621_v4 = vmul.f32 %v1582_v31, %v1495_v13  ;;  %912 = vperm.xlu1 %5409, %v824_v20   ;;  %v1031_v61 = vsel %vm6106_vm2, %v4966_v16, %v1030_v23  ;;  %v1223_v36 = vpop.permute.xlu0 %1222  ;;  %v1084_v17 = vmul.f32 %v6339_v44, %v1060_v7  ;;  %v1092_v23 = vadd.f32 %v6360_v12, %v1068_v3  ;;  %v1326_v7 = vld [vmem:[#allocation2 + $0x18] sm:$0x1] }
  0xe5   : > { %v1749_v32 = vld [vmem:[#allocation2 + $0xe0] sm:$0xff]  ;;  %1032 = vst [vmem:[#allocation2 + $0xd4] sm:$0x1] %v1031_v61  ;;  %v1250_v1 = vmul.f32 %v1223_v36, %v1124_v24  ;;  %v1442_v31 = vmul.f32 %v6368_v18, %v1418_v9  ;;  %v1420_v33 = vunpack.c.l.bf16 %v1384_v59  ;;  %v2261_v48 = vshrl.u32 %v6221_v46, 16 }
  0xe6   : > { %v5001_v41 = vpack.c.bf16 %v1621_v4, %v1621_v4  ;;  %v4537_v2 = vcombine.high %v1747_v37, %v1749_v32  ;;  %v4536_v28 = vcombine.low %v1747_v37, %v1749_v32  ;;  %v1108_v29 = vadd.f32 %v6360_v12, %v1084_v17 }
  0xe7   : > { %v4986_v10 = vpack.c.bf16 %v1250_v1, %v1250_v1  ;;  %v1110_v1 = vmax.f32 %v1092_v23, 0.0 }
  0xe8   : > { %1723 = vst [vmem:[#allocation2 + $0xcc] sm:$0xf] %v5001_v41  ;;  %5411 = vset.pattern.permute.xlu1 %v5592_v8  ;;  %v456_v51 = vpop.permute.xlu1 %455  ;;  %2143 = vmatprep.mubr.bf16.mxu0 %v4537_v2  ;;  %v1126_v38 = vmax.f32 %v1108_v29, 0.0  ;;  %v1466_v41 = vadd.f32 %v6395_v49, %v1442_v31  ;;  %v1444_v2 = vmul.f32 %v6368_v18, %v1420_v33  ;;  %v1048_v29 = vunpack.c.l.bf16 %v6213_v35 }
  0xe9   : > { %v539_v52 = vmul.f32 %v456_v51, %v413_v27  ;;  %1606 = vperm.xlu1 %5411, %v1518_v58   ;;  %2144 = vmatmul.mubr.bf16.gmra.mxu0 %v4536_v28  ;;  %v1355_v55 = vsel %vm6106_vm2, %v4986_v10, %v1354_v43  ;;  %v531_v56 = vpop.permute.xlu0 %530  ;;  %v5550_v58 = vld [vmem:[%s5921_s25 + $0x70] sm:$0x11]  ;;  %v692_v10 = vrot.slane %v6136_v0, 4  ;;  %v2264_v51 = vshll.u32 %v6221_v46, 16 }
  0xea   : > { %1356 = vst [vmem:[#allocation2 + $0xf8] sm:$0x1] %v1355_v55  ;;  %v554_v42 = vmul.f32 %v531_v56, %v428_v45  ;;  %v1750_v30 = vld [vmem:[#allocation2 + $0xe8] sm:$0xff]  ;;  %v353_v28 = vunpack.c.l.bf16 %v5550_v58  ;;  %v1358_v55 = vld [vmem:[#allocation2 + $0x118] sm:$0x1]  ;;  %v1484_v3 = vmax.f32 %v1466_v41, 0.0  ;;  %v1468_v0 = vadd.f32 %v6395_v49, %v1444_v2 }
  0xeb   : > { %v4936_v8 = vpack.c.bf16 %v539_v52, %v539_v52  ;;  %v2289_v52 = vshrl.u32 %v6223_v47, 16  ;;  %v2263_v46 = vrot.slane %v2261_v48, 4  ;;  %v728_v9 = vunpack.c.l.bf16 %v692_v10  ;;  %v2226_v41 = vld [vmem:[#allocation2 + $0x8] sm:$0xff]  ;;  %v1704_v2 = vld [vmem:[#allocation2 + $0x3c] sm:$0x1] }
  0xec   : > { %v466_v13 = vpop.permute.xlu1 %465  ;;  %v4951_v14 = vpack.c.bf16 %v554_v42, %v554_v42  ;;  %v377_v42 = vmul.f32 %v6401_v50, %v353_v28  ;;  %v1486_v23 = vmax.f32 %v1468_v0, 0.0 }
  0xed   : > { %v633_v21 = vsel %vm6106_vm2, %v4936_v8, %v632_v60  ;;  %v541_v20 = vmul.f32 %v466_v13, %v415_v54  ;;  %v2292_v54 = vshll.u32 %v6223_v47, 16  ;;  %v2291_v13 = vrot.slane %v2289_v52, 4 }
  0xee   : > { %634 = vst [vmem:[#allocation2 + $0x10] sm:$0x1] %v633_v21  ;;  %663 = vst [vmem:[#allocation2 + $0x100] sm:$0xf] %v4951_v14  ;;  %v1602_v24 = vpop.permute.xlu0 %1601 }
  0xef   : > { %v4938_v16 = vpack.c.bf16 %v541_v20, %v541_v20  ;;  %v1748_v15 = vld [vmem:[#allocation2 + $0xc8] sm:$0xff]  ;;  %v1625_v4 = vmul.f32 %v1602_v24, %v1499_v57  ;;  %v2266_v57 = vrot.slane %v2264_v51, 5  ;;  %v2294_v14 = vrot.slane %v2292_v54, 5 }
  0xf0   : > { %v4539_v27 = vcombine.high %v1748_v15, %v1750_v30  ;;  %v4538_v61 = vcombine.low %v1748_v15, %v1750_v30  ;;  %v401_v20 = vadd.f32 %v6418_v6, %v377_v42  ;;  %v752_v24 = vmul.f32 %v6312_v63, %v728_v9  ;;  %v5478_v42 = vld [vmem:[%s7235_s4 + $0x238] sm:$0xff]  }
  0xf1   : > { %v637_v36 = vsel %vm6106_vm2, %v4938_v16, %v636_v19  ;;  %v843_v37 = vpop.permute.xlu1 %842  ;;  %v5005_v32 = vpack.c.bf16 %v1625_v4, %v1625_v4  ;;  %v1700_v16 = vld [vmem:[#allocation2 + $0x1c] sm:$0x1]  ;;  %v2267_v15 = vor.u32 %v2266_v57, %v2263_v46  ;;  %v2295_v30 = vor.u32 %v2294_v14, %v2291_v13  ;;  %v644_v46 = vld [vmem:[#allocation2 + $0x70] sm:$0x1] }
  0xf2   : > { %638 = vst [vmem:[#allocation2 + $0x30] sm:$0x1] %v637_v36  ;;  %v918_v11 = vmul.f32 %v843_v37, %v792_v22  ;;  %2208 = vmatprep.mubr.bf16.mxu1 %v4539_v27  ;;  %v323_v4 = vld [vmem:[%s5921_s25 + $0x78] sm:$0x11]  ;;  %v776_v35 = vadd.f32 %v6328_v40, %v752_v24 }
  0xf3   : > { %2209 = vmatmul.mubr.bf16.gmra.mxu1 %v4538_v61  ;;  %1731 = vst [vmem:[#allocation2 + $0x10c] sm:$0xf] %v5005_v32  ;;  %v1233_v43 = vpop.permute.xlu0 %1232  ;;  %v419_v61 = vmax.f32 %v401_v20, 0.0  ;;  %v2230_v32 = vld [vmem:[#allocation2 + $0x28] sm:$0xff]  ;;  %v2268_v58 = vrot.slane %v2267_v15, 4  ;;  %v2296_v28 = vrot.slane %v2295_v30, 4 }
  0xf4   : > { %v4956_v45 = vpack.c.bf16 %v918_v11, %v918_v11  ;;  %v1252_v53 = vmul.f32 %v1233_v43, %v1126_v38  ;;  %v2303_v10 = vshrl.u32 %v2230_v32, 16  ;;  %v1388_v51 = vrot.slane %v323_v4, 4  ;;  %v326_v20 = vld [vmem:[%s5921_s25 + $0x90] sm:$0x11]  ;;  %v6501_v15 = vld [vmem:[#allocation2 + $0x40] sm:$0xff] }
  0xf5   : > { %v2227_v8 = vld [vmem:[#allocation2 + $0x10] sm:$0x11]  ;;  %v794_v9 = vmax.f32 %v776_v35, 0.0  ;;  %v6503_v30 = vld [vmem:[#allocation2 + $0x60] sm:$0xff] }
  0xf6   : > { %v1011_v56 = vsel %vm6106_vm2, %v4956_v45, %v1010_v39  ;;  %v1153_v5 = vpop.permute.xlu1 %1152  ;;  %v4988_v60 = vpack.c.bf16 %v1252_v53, %v1252_v53  ;;  %v2270_v19 = vshll.u32 %v2227_v8, 16  ;;  %v1050_v45 = vunpack.c.l.bf16 %v323_v4  ;;  %v5479_v8 = vld [vmem:[%s7235_s4 + $0x270] sm:$0xff]  }
  0xf7   : > { %1012 = vst [vmem:[#allocation2 + $0x34] sm:$0x1] %v1011_v56  ;;  %v1236_v62 = vmul.f32 %v1153_v5, %v1110_v1  ;;  %v1072_v1 = vmul.f32 %v6339_v44, %v1048_v29  ;;  %v2306_v53 = vshll.u32 %v2230_v32, 16  ;;  %v2278_v56 = vshll.u32 %v2226_v41, 16 }
  0xf8   : > { %v1359_v47 = vsel %vm6106_vm2, %v4988_v60, %v1358_v55  ;;  %v2272_v36 = vrot.slane %v2270_v19, 5  ;;  %v2275_v55 = vshrl.u32 %v2226_v41, 16  ;;  %v1074_v0 = vmul.f32 %v6339_v44, %v1050_v45 }
  0xf9   : > { %v4972_v59 = vpack.c.bf16 %v1236_v62, %v1236_v62  ;;  %1360 = vst [vmem:[#allocation2 + $0x118] sm:$0x1] %v1359_v47  ;;  %v1096_v47 = vadd.f32 %v6360_v12, %v1072_v1  ;;  %v1424_v57 = vunpack.c.l.bf16 %v1388_v51  ;;  %v2317_v1 = vshrl.u32 %v6501_v15, 16 }
  0xfa   : > { %v2273_v52 = vsel %vm6474_vm5, %v2268_v58, %v2272_v36  ;;  %v2277_v14 = vrot.slane %v2275_v55, 4  ;;  %v1098_v29 = vadd.f32 %v6360_v12, %v1074_v0  ;;  %v1014_v36 = vld [vmem:[#allocation2 + $0x54] sm:$0x1]  ;;  %v2320_v41 = vshll.u32 %v6501_v15, 16  ;;  %v5482_v58 = vld [vmem:[%s7235_s4 + $0x228] sm:$0xff]  }
  0xfb   : > { %v1327_v17 = vsel %vm6106_vm2, %v4972_v59, %v1326_v7  ;;  %v1527_v21 = vpop.permute.xlu1 %1526  ;;  %v2305_v59 = vrot.slane %v2303_v10, 4  ;;  %v1448_v4 = vmul.f32 %v6368_v18, %v1424_v57  ;;  %v5483_v10 = vld [vmem:[%s7235_s4 + $0x260] sm:$0xff]  }
  0xfc   : > { %1328 = vst [vmem:[#allocation2 + $0x18] sm:$0x1] %v1327_v17  ;;  %v1610_v22 = vmul.f32 %v1527_v21, %v1484_v3  ;;  %v2280_v17 = vrot.slane %v2278_v56, 5  ;;  %v2308_v21 = vrot.slane %v2306_v53, 5  ;;  %v1334_v56 = vld [vmem:[#allocation2 + $0x58] sm:$0x1] }
  0xfe   : > { %v4990_v31 = vpack.c.bf16 %v1610_v22, %v1610_v22  ;;  %v2231_v33 = vld [vmem:[#allocation2 + $0x30] sm:$0x11]  ;;  %v2281_v32 = vor.u32 %v2280_v17, %v2277_v14  ;;  %v5487_v17 = vld [vmem:[%s7235_s4 + $0x258] sm:$0xff]  }
  0xff   : > { %v1537_v27 = vpop.permute.xlu1 %1536  ;;  %v2298_v37 = vshll.u32 %v2231_v33, 16  ;;  %v5480_v22 = vld [vmem:[%s7235_s4 + $0x230] sm:$0xff]  }
 0x100   : > { %v1701_v11 = vsel %vm6106_vm2, %v4990_v31, %v1700_v16  ;;  %v1612_v38 = vmul.f32 %v1537_v27, %v1486_v23  ;;  %v5481_v31 = vld [vmem:[%s7235_s4 + $0x268] sm:$0xff]   ;;  %v355_v27 = vunpack.c.l.bf16 %v326_v20 }
 0x101   : > { %1702 = vst [vmem:[#allocation2 + $0x1c] sm:$0x1] %v1701_v11  ;;  %v2300_v43 = vrot.slane %v2298_v37, 5  ;;  %v1114_v37 = vmax.f32 %v1096_v47, 0.0  ;;  %v2309_v11 = vor.u32 %v2308_v21, %v2305_v59 }
 0x102   : > { %v4992_v48 = vpack.c.bf16 %v1612_v38, %v1612_v38 }
 0x103   : > { %v2301_v54 = vsel %vm6474_vm5, %v2296_v28, %v2300_v43  ;;  %v1116_v28 = vmax.f32 %v1098_v29, 0.0 }
 0x104   : > { %v1705_v5 = vsel %vm6106_vm2, %v4992_v48, %v1704_v2  ;;  %v486_v60 = vpop.permute.xlu1 %485  ;;  %v4636_v62 = vcombine.low %v2273_v52, %v2301_v54  ;;  %v4637_v3 = vcombine.high %v2273_v52, %v2301_v54  ;;  %v2345_v2 = vshrl.u32 %v6503_v30, 16 }
 0x105   : > { %1706 = vst [vmem:[#allocation2 + $0x3c] sm:$0x1] %v1705_v5  ;;  %v545_v7 = vmul.f32 %v486_v60, %v419_v61  ;;  %v696_v61 = vrot.slane %v326_v20, 4  ;;  %v2348_v48 = vshll.u32 %v6503_v30, 16  ;;  %v1472_v52 = vadd.f32 %v6395_v49, %v1448_v4 }
 0x106   : > { %2837 = vmatprep.mubr.bf16.mxu0 %v4637_v3  ;;  %v379_v54 = vmul.f32 %v6401_v50, %v355_v27  ;;  %v2282_v60 = vrot.slane %v2281_v32, 4  ;;  %v2347_v0 = vrot.slane %v2345_v2, 4 }
 0x107   : > { %v4942_v13 = vpack.c.bf16 %v545_v7, %v545_v7  ;;  %2838 = vmatmul.mubr.bf16.vlgmr.msra.gmra.mxu0 %v4636_v62  ;;  %v732_v55 = vunpack.c.l.bf16 %v696_v61  ;;  %v2310_v62 = vrot.slane %v2309_v11, 4  ;;  %v2322_v7 = vrot.slane %v2320_v41, 5 }
 0x108   : > { %v2228_v19 = vld [vmem:[#allocation2 + $0x18] sm:$0x11]  ;;  %5176 = vmatpush3.bf16.msra.mxu0 %v5478_v42  ;;  %v2319_v42 = vrot.slane %v2317_v1, 4  ;;  %v2350_v14 = vrot.slane %v2348_v48, 5  ;;  %v403_v4 = vadd.f32 %v6418_v6, %v379_v54  ;;  %v5490_v1 = vld [vmem:[%s7235_s4 + $0x2b0] sm:$0xff]  }
 0x109   : > { %v645_v23 = vsel %vm6106_vm2, %v4942_v13, %v644_v46  ;;  %v853_v24 = vpop.permute.xlu1 %852  ;;  %v2284_v16 = vshll.u32 %v2228_v19, 16  ;;  %5177 = vmatprep.subr.bf16.mxu0 %v5479_v8  ;;  %v5551_v8 = vld [vmem:[%s5921_s25 + $0xb0] sm:$0x11]  ;;  %v756_v27 = vmul.f32 %v6312_v63, %v732_v55  ;;  %v1712_v55 = vld [vmem:[#allocation2 + $0x7c] sm:$0x1] }
 0x10a   : > { %646 = vst [vmem:[#allocation2 + $0x70] sm:$0x1] %v645_v23  ;;  %v920_v33 = vmul.f32 %v853_v24, %v794_v9  ;;  %v698_v46 = vrot.slane %v5551_v8, 4  ;;  %v5484_v9 = vld [vmem:[%s7235_s4 + $0x220] sm:$0xff]   ;;  %v2323_v32 = vor.u32 %v2322_v7, %v2319_v42  ;;  %v2351_v11 = vor.u32 %v2350_v14, %v2347_v0  ;;  %v5492_v54 = vld [vmem:[%s7235_s4 + $0x210] sm:$0xff]  }
 0x10b   : > { %v2286_v43 = vrot.slane %v2284_v16, 5  ;;  %v5489_v16 = vld [vmem:[%s7235_s4 + $0x2f0] sm:$0xff]   ;;  %v5552_v0 = vld [vmem:[%s5921_s25 + $0x98] sm:$0x11] }
 0x10c   : > { %v4958_v38 = vpack.c.bf16 %v920_v33, %v920_v33  ;;  %v2232_v35 = vld [vmem:[#allocation2 + $0x38] sm:$0x11]  ;;  %5178 = vmatpush3.bf16.msra.mxu0 %v5480_v22  ;;  %v1490_v33 = vmax.f32 %v1472_v52, 0.0  ;;  %v734_v61 = vunpack.c.l.bf16 %v698_v46  ;;  %v6562_v52 = vld [vmem:[#allocation2 + $0x68] sm:$0xff]  ;;  %v1390_v8 = vrot.slane %v5552_v0, 4  ;;  %v6626_v0 = vld [vmem:[#allocation2 + $0x80] sm:$0xff] }
 0x10d   : > { %v2312_v45 = vshll.u32 %v2232_v35, 16  ;;  %5179 = vmatprep.subr.bf16.mxu0 %v5481_v31  ;;  %v2287_v59 = vsel %vm6474_vm5, %v2282_v60, %v2286_v43  ;;  %v5486_v22 = vld [vmem:[%s7235_s4 + $0x2b8] sm:$0xff]   ;;  %v6555_v43 = vld [vmem:[#allocation2 + $0x48] sm:$0xff]  ;;  %v2352_v60 = vrot.slane %v2351_v11, 4 }
 0x10e   : > { %v1015_v53 = vsel %vm6106_vm2, %v4958_v38, %v1014_v36  ;;  %v1173_v51 = vpop.permute.xlu1 %1172  ;;  %v1338_v31 = vld [vmem:[#allocation2 + $0x78] sm:$0x1]  ;;  %v5491_v38 = vld [vmem:[%s7235_s4 + $0x250] sm:$0xff]   ;;  %v2334_v7 = vshll.u32 %v6555_v43, 16  ;;  %v5494_v46 = vld [vmem:[%s7235_s4 + $0x2a8] sm:$0xff]  }
 0x10f   : > { %1016 = vst [vmem:[#allocation2 + $0x54] sm:$0x1] %v1015_v53  ;;  %v1240_v5 = vmul.f32 %v1173_v51, %v1114_v37  ;;  %v2314_v3 = vrot.slane %v2312_v45, 5  ;;  %v5488_v36 = vld [vmem:[%s7235_s4 + $0x218] sm:$0xff]   ;;  %v5493_v45 = vld [vmem:[%s7235_s4 + $0x2e8] sm:$0xff]   ;;  %v780_v53 = vadd.f32 %v6328_v40, %v756_v27  ;;  %v758_v51 = vmul.f32 %v6312_v63, %v734_v61  ;;  %v5498_v27 = vld [vmem:[%s7235_s4 + $0x2a0] sm:$0xff]  }
 0x110   : > { %5180 = vmatpush3.bf16.msra.mxu0 %v5482_v58  ;;  %v2331_v63 = vshrl.u32 %v6555_v43, 16 }
 0x111   : > { %v4976_v47 = vpack.c.bf16 %v1240_v5, %v1240_v5  ;;  %v2315_v57 = vsel %vm6474_vm5, %v2310_v62, %v2314_v3  ;;  %v2239_v13 = vld [vmem:[#allocation2 + $0x70] sm:$0x11]  ;;  %5181 = vmatprep.subr.bf16.mxu0 %v5483_v10  ;;  %v421_v10 = vmax.f32 %v403_v4, 0.0  ;;  %v1054_v62 = vunpack.c.l.bf16 %v6259_v26  ;;  %v5495_v3 = vld [vmem:[%s7235_s4 + $0x248] sm:$0xff]  }
 0x112   : > { %v1183_v21 = vpop.permute.xlu1 %1182  ;;  %v4638_v20 = vcombine.low %v2287_v59, %v2315_v57  ;;  %v4639_v19 = vcombine.high %v2287_v59, %v2315_v57  ;;  %v2354_v29 = vshll.u32 %v2239_v13, 16  ;;  %v2362_v59 = vshll.u32 %v6562_v52, 16  ;;  %v5497_v57 = vld [vmem:[%s7235_s4 + $0x2e0] sm:$0xff]  }
 0x113   : > { %v1335_v23 = vsel %vm6106_vm2, %v4976_v47, %v1334_v56  ;;  %v1242_v24 = vmul.f32 %v1183_v21, %v1116_v28  ;;  %v2324_v56 = vrot.slane %v2323_v32, 4  ;;  %v2359_v47 = vshrl.u32 %v6562_v52, 16  ;;  %v5501_v32 = vld [vmem:[%s7235_s4 + $0x2d8] sm:$0xff]  }
 0x114   : > { %1336 = vst [vmem:[#allocation2 + $0x58] sm:$0x1] %v1335_v23  ;;  %2902 = vmatprep.mubr.bf16.mxu1 %v4639_v19  ;;  %5182 = vmatpush3.bf16.msra.mxu0 %v5484_v9  ;;  %v2356_v28 = vrot.slane %v2354_v29, 5  ;;  %v648_v19 = vld [vmem:[#allocation2 + $0x90] sm:$0x1]  ;;  %v1078_v23 = vmul.f32 %v6339_v44, %v1054_v62  ;;  %v798_v29 = vmax.f32 %v780_v53, 0.0  ;;  %v1426_v4 = vunpack.c.l.bf16 %v1390_v8 }
 0x115   : > { %v4978_v37 = vpack.c.bf16 %v1242_v24, %v1242_v24  ;;  %2903 = vmatmul.mubr.bf16.vlgmr.msra.gmra.mxu1 %v4638_v20  ;;  %5183 = vmatprep.subr.bf16.mxu0 %v5487_v17  ;;  %v5496_v20 = vld [vmem:[%s7235_s4 + $0x208] sm:$0xff]   ;;  %v5499_v24 = vld [vmem:[%s7235_s4 + $0x240] sm:$0xff]   ;;  %v2336_v44 = vrot.slane %v2334_v7, 5  ;;  %v5506_v8 = vld [vmem:[%s7235_s4 + $0x290] sm:$0xff]  }
 0x116   : > { %v2235_v35 = vld [vmem:[#allocation2 + $0x50] sm:$0x11]  ;;  %5216 = vmatpush3.bf16.msra.mxu1 %v5486_v22  ;;  %v2357_v9 = vsel %vm6474_vm5, %v2352_v60, %v2356_v28  ;;  %v1450_v28 = vmul.f32 %v6368_v18, %v1426_v4  ;;  %v6620_v62 = vld [vmem:[#allocation2 + $0xa0] sm:$0xff] }
 0x117   : > { %v1339_v41 = vsel %vm6106_vm2, %v4978_v37, %v1338_v31  ;;  %v1557_v2 = vpop.permute.xlu1 %1556  ;;  %v2326_v58 = vshll.u32 %v2235_v35, 16  ;;  %5217 = vmatprep.subr.bf16.mxu1 %v5489_v16  ;;  %v782_v16 = vadd.f32 %v6328_v40, %v758_v51  ;;  %v2364_v37 = vrot.slane %v2362_v59, 5  ;;  %v5500_v40 = vld [vmem:[%s7235_s4 + $0x200] sm:$0xff]   ;;  %v5504_v51 = vld [vmem:[%s7235_s4 + $0x2d0] sm:$0xff]  }
 0x118   : > { %1340 = vst [vmem:[#allocation2 + $0x78] sm:$0x1] %v1339_v41  ;;  %v1616_v48 = vmul.f32 %v1557_v2, %v1490_v33  ;;  %5184 = vmatpush3.bf16.msra.mxu0 %v5488_v36  ;;  %v2333_v33 = vrot.slane %v2331_v63, 4  ;;  %v2361_v36 = vrot.slane %v2359_v47, 4  ;;  %v1102_v35 = vadd.f32 %v6360_v12, %v1078_v23  ;;  %v5503_v41 = vld [vmem:[%s7235_s4 + $0x378] sm:$0xff]  }
 0x119   : > { %v2328_v5 = vrot.slane %v2326_v58, 5  ;;  %5185 = vmatprep.subr.bf16.mxu0 %v5491_v38  ;;  %v800_v58 = vmax.f32 %v782_v16, 0.0  ;;  %v1022_v12 = vld [vmem:[#allocation2 + $0x94] sm:$0x1]  ;;  %v1474_v63 = vadd.f32 %v6395_v49, %v1450_v28  ;;  %v2376_v23 = vshll.u32 %v6626_v0, 16 }
 0x11a   : > { %v4996_v42 = vpack.c.bf16 %v1616_v48, %v1616_v48  ;;  %5218 = vmatpush3.bf16.msra.mxu1 %v5490_v1  ;;  %v5502_v48 = vld [vmem:[%s7235_s4 + $0x298] sm:$0xff]   ;;  %v2365_v53 = vor.u32 %v2364_v37, %v2361_v36 }
 0x11b   : > { %v2329_v26 = vsel %vm6474_vm5, %v2324_v56, %v2328_v5  ;;  %5219 = vmatprep.subr.bf16.mxu1 %v5493_v45  ;;  %v2236_v31 = vld [vmem:[#allocation2 + $0x58] sm:$0x11]  ;;  %v359_v45 = vunpack.c.l.bf16 %v6289_v25  ;;  %v338_v56 = vld [vmem:[%s5921_s25 + $0xf0] sm:$0x11]  ;;  %v1120_v5 = vmax.f32 %v1102_v35, 0.0  ;;  %v1492_v36 = vmax.f32 %v1474_v63, 0.0 }
 0x11c   : > { %v1713_v13 = vsel %vm6106_vm2, %v4996_v42, %v1712_v55  ;;  %v496_v14 = vpop.permute.xlu1 %495  ;;  %v4641_v17 = vcombine.high %v2329_v26, %v2357_v9  ;;  %v4640_v21 = vcombine.low %v2329_v26, %v2357_v9  ;;  %5186 = vmatpush3.bf16.msra.mxu0 %v5492_v54  ;;  %v2340_v1 = vshll.u32 %v2236_v31, 16 }
 0x11d   : > { %1714 = vst [vmem:[#allocation2 + $0x7c] sm:$0x1] %v1713_v13  ;;  %v547_v22 = vmul.f32 %v496_v14, %v421_v10  ;;  %5187 = vmatprep.subr.bf16.mxu0 %v5495_v3  ;;  %v2337_v10 = vor.u32 %v2336_v44, %v2333_v33  ;;  %v383_v7 = vmul.f32 %v6401_v50, %v359_v45  ;;  %v2366_v9 = vrot.slane %v2365_v53, 4  ;;  %v5510_v33 = vld [vmem:[%s7235_s4 + $0x288] sm:$0xff]   ;;  %v1346_v44 = vld [vmem:[#allocation2 + $0xb8] sm:$0x1] }
 0x11e   : > { %2845 = vmatprep.mubr.bf16.mxu0 %v4641_v17  ;;  %5220 = vmatpush3.bf16.msra.mxu1 %v5494_v46  ;;  %v2342_v25 = vrot.slane %v2340_v1, 5  ;;  %v1026_v46 = vld [vmem:[#allocation2 + $0xb4] sm:$0x1]  ;;  %v361_v59 = vunpack.c.l.bf16 %v338_v56  ;;  %v2401_v14 = vshrl.u32 %v6620_v62, 16  ;;  %v2404_v17 = vshll.u32 %v6620_v62, 16  ;;  %v5517_v53 = vld [vmem:[%s7235_s4 + $0x3f8] sm:$0xff]  }
 0x11f   : > { %v4944_v61 = vpack.c.bf16 %v547_v22, %v547_v22  ;;  %2846 = vmatmul.mubr.bf16.gmra.mxu0 %v4640_v21  ;;  %5221 = vmatprep.subr.bf16.mxu1 %v5497_v57  ;;  %v2338_v26 = vrot.slane %v2337_v10, 4  ;;  %v5508_v57 = vld [vmem:[%s7235_s4 + $0x2c8] sm:$0xff]   ;;  %v702_v21 = vrot.slane %v338_v56, 4  ;;  %v2373_v22 = vshrl.u32 %v6626_v0, 16 }
 0x120   : > { %5188 = vmatpush3.bf16.msra.mxu0 %v5496_v20  ;;  %v407_v37 = vadd.f32 %v6418_v6, %v383_v7  ;;  %v2378_v35 = vrot.slane %v2376_v23, 5  ;;  %v2406_v1 = vrot.slane %v2404_v17, 5  ;;  %v6661_v10 = vld [vmem:[#allocation2 + $0xa8] sm:$0xff]  ;;  %v6687_v17 = vld [vmem:[%s7232_s1 + $0x2] ss:$0 sm:$0xff] }
 0x121   : > { %v649_v11 = vsel %vm6106_vm2, %v4944_v61, %v648_v19  ;;  %v873_v38 = vpop.permute.xlu1 %872  ;;  %5189 = vmatprep.subr.bf16.mxu0 %v5499_v24  ;;  %v2343_v20 = vsel %vm6474_vm5, %v2338_v26, %v2342_v25  ;;  %v5512_v61 = vld [vmem:[%s7235_s4 + $0x2c0] sm:$0xff]  }
 0x122   : > { %650 = vst [vmem:[#allocation2 + $0x90] sm:$0x1] %v649_v11  ;;  %v924_v2 = vmul.f32 %v873_v38, %v798_v29  ;;  %5222 = vmatpush3.bf16.msra.mxu1 %v5498_v27  ;;  %v385_v27 = vmul.f32 %v6401_v50, %v361_v59  ;;  %v2375_v38 = vrot.slane %v2373_v22, 4  ;;  %v5514_v50 = vld [vmem:[%s7235_s4 + $0x280] sm:$0xff]  }
 0x123   : > { %5223 = vmatprep.subr.bf16.mxu1 %v5501_v32  ;;  %v2403_v32 = vrot.slane %v2401_v14, 4 }
 0x124   : > { %v4962_v54 = vpack.c.bf16 %v924_v2, %v924_v2  ;;  %v2240_v55 = vld [vmem:[#allocation2 + $0x78] sm:$0x11]  ;;  %5190 = vmatpush3.bf16.msra.mxu0 %v5500_v40  ;;  %v738_v40 = vunpack.c.l.bf16 %v702_v21  ;;  %v409_v45 = vadd.f32 %v6418_v6, %v385_v27  ;;  %v2379_v25 = vor.u32 %v2378_v35, %v2375_v38 }
 0x125   : > { %v883_v18 = vpop.permute.xlu1 %882  ;;  %v2368_v60 = vshll.u32 %v2240_v55, 16  ;;  %5255 = vmatprep.subr.bf16.mxu0 %v5503_v41  ;;  %v335_v41 = vld [vmem:[%s5921_s25 + $0xd8] sm:$0x11] }
 0x126   : > { %v1023_v3 = vsel %vm6106_vm2, %v4962_v54, %v1022_v12  ;;  %v926_v42 = vmul.f32 %v883_v18, %v800_v58  ;;  %5224 = vmatpush3.bf16.msra.mxu1 %v5502_v48  ;;  %v6659_v12 = vld [vmem:[#allocation2 + $0x88] sm:$0xff]  ;;  %v6669_v54 = vld [vmem:[%s7232_s1 + $0x1] ss:$0 sm:$0xff]  ;;  %v1056_v6 = vunpack.c.l.bf16 %v335_v41  ;;  %v1394_v56 = vrot.slane %v335_v41, 4  ;;  %v1716_v18 = vld [vmem:[#allocation2 + $0x9c] sm:$0x1] }
 0x127   : > { %1024 = vst [vmem:[#allocation2 + $0x94] sm:$0x1] %v1023_v3  ;;  %v2370_v47 = vrot.slane %v2368_v60, 5  ;;  %5225 = vmatprep.subr.bf16.mxu1 %v5504_v51  ;;  %v762_v55 = vmul.f32 %v6669_v54, %v738_v40  ;;  %v2407_v60 = vor.u32 %v2406_v1, %v2403_v32  ;;  %v2387_v63 = vshrl.u32 %v6659_v12, 16 }
 0x128   : > { %v4964_v13 = vpack.c.bf16 %v926_v42, %v926_v42  ;;  %v2390_v7 = vshll.u32 %v6659_v12, 16  ;;  %v1080_v21 = vmul.f32 %v6687_v17, %v1056_v6  ;;  %v2380_v22 = vrot.slane %v2379_v25, 4 }
 0x129   : > { %v2371_v19 = vsel %vm6474_vm5, %v2366_v9, %v2370_v47  ;;  %v2418_v47 = vshll.u32 %v6661_v10, 16  ;;  %v2408_v23 = vrot.slane %v2407_v60, 4 }
 0x12a   : > { %v1027_v24 = vsel %vm6106_vm2, %v4964_v13, %v1026_v46  ;;  %v1203_v29 = vpop.permute.xlu1 %1202  ;;  %v4643_v16 = vcombine.high %v2343_v20, %v2371_v19  ;;  %v4642_v31 = vcombine.low %v2343_v20, %v2371_v19  ;;  %5226 = vmatpush3.bf16.msra.mxu1 %v5506_v8  ;;  %v2415_v8 = vshrl.u32 %v6661_v10, 16  ;;  %v6681_v13 = vld [vmem:[%s7233_s2 + $0x1] ss:$0 sm:$0xff] }
 0x12b   : > { %1028 = vst [vmem:[#allocation2 + $0xb4] sm:$0x1] %v1027_v24  ;;  %v1246_v4 = vmul.f32 %v1203_v29, %v1120_v5  ;;  %5227 = vmatprep.subr.bf16.mxu1 %v5508_v57  ;;  %v425_v5 = vmax.f32 %v407_v37, 0.0  ;;  %v427_v46 = vmax.f32 %v409_v45, 0.0  ;;  %v786_v14 = vadd.f32 %v6681_v13, %v762_v55  ;;  %v656_v29 = vld [vmem:[#allocation2 + $0xd0] sm:$0x1] }
 0x12c   : > { %2910 = vmatprep.mubr.bf16.mxu1 %v4643_v16  ;;  %v1430_v20 = vunpack.c.l.bf16 %v1394_v56  ;;  %v2389_v16 = vrot.slane %v2387_v63, 4  ;;  %v2420_v32 = vrot.slane %v2418_v47, 5  ;;  %v6706_v45 = vld [vmem:[%s7232_s1 + $0x3] ss:$0 sm:$0xff] }
 0x12d   : > { %v4982_v11 = vpack.c.bf16 %v1246_v4, %v1246_v4  ;;  %2911 = vmatmul.mubr.bf16.gmra.mxu1 %v4642_v31  ;;  %v2392_v31 = vrot.slane %v2390_v7, 5  ;;  %v5556_v4 = vld [vmem:[%s5921_s25 + $0xf8] sm:$0x11]  ;;  %v6712_v63 = vld [vmem:[#allocation2 + $0xc0] sm:$0xff] }
 0x12e   : > { %v2243_v2 = vld [vmem:[#allocation2 + $0x90] sm:$0x11]  ;;  %5228 = vmatpush3.bf16.msra.mxu1 %v5510_v33  ;;  %v2417_v33 = vrot.slane %v2415_v8, 4  ;;  %v1396_v27 = vrot.slane %v5556_v4, 4 }
 0x12f   : > { %v1347_v58 = vsel %vm6106_vm2, %v4982_v11, %v1346_v44  ;;  %v1567_v28 = vpop.permute.xlu1 %1566  ;;  %v2382_v48 = vshll.u32 %v2243_v2, 16  ;;  %5229 = vmatprep.subr.bf16.mxu1 %v5512_v61  ;;  %v660_v2 = vld [vmem:[#allocation2 + $0xf0] sm:$0x1] }
 0x130   : > { %1348 = vst [vmem:[#allocation2 + $0xb8] sm:$0x1] %v1347_v58  ;;  %v1618_v51 = vmul.f32 %v1567_v28, %v1492_v36  ;;  %v6700_v58 = vld [vmem:[%s7233_s2 + $0x2] ss:$0 sm:$0xff]  ;;  %v2421_v55 = vor.u32 %v2420_v32, %v2417_v33  ;;  %v1432_v6 = vunpack.c.l.bf16 %v1396_v27 }
 0x131   : > { %v2384_v26 = vrot.slane %v2382_v48, 5  ;;  %v1104_v28 = vadd.f32 %v6700_v58, %v1080_v21  ;;  %v1454_v48 = vmul.f32 %v6706_v45, %v1430_v20 }
 0x132   : > { %v4998_v3 = vpack.c.bf16 %v1618_v51, %v1618_v51  ;;  %v2247_v42 = vld [vmem:[#allocation2 + $0xb0] sm:$0x11]  ;;  %5230 = vmatpush3.bf16.msra.mxu1 %v5514_v50  ;;  %v804_v50 = vmax.f32 %v786_v14, 0.0  ;;  %v2393_v51 = vor.u32 %v2392_v31, %v2389_v16  ;;  %v1456_v14 = vmul.f32 %v6706_v45, %v1432_v6 }
 0x133   : > { %v2410_v9 = vshll.u32 %v2247_v42, 16  ;;  %5295 = vmatprep.subr.bf16.mxu1 %v5517_v53  ;;  %v2385_v44 = vsel %vm6474_vm5, %v2380_v22, %v2384_v26  ;;  %v1122_v8 = vmax.f32 %v1104_v28, 0.0  ;;  %v6715_v26 = vld [vmem:[#allocation2 + $0xe0] sm:$0xff]  ;;  %v2432_v22 = vshll.u32 %v6712_v63, 16 }
 0x134   : > { %v1717_v59 = vsel %vm6106_vm2, %v4998_v3, %v1716_v18  ;;  %v516_v57 = vpop.permute.xlu1 %515  ;;  %v5559_v18 = vld [vmem:[%s5921_s25 + $0x100] sm:$0xff]  ;;  %v2394_v47 = vrot.slane %v2393_v51, 4 }
 0x135   : > { %1718 = vst [vmem:[#allocation2 + $0x9c] sm:$0x1] %v1717_v59  ;;  %v551_v19 = vmul.f32 %v516_v57, %v425_v5  ;;  %v2412_v24 = vrot.slane %v2410_v9, 5  ;;  %v703_v5 = vrot.slane %v5559_v18, 4  ;;  %v1034_v9 = vld [vmem:[#allocation2 + $0xf4] sm:$0x1] }
 0x136   : > { %v2422_v57 = vrot.slane %v2421_v55, 4 }
 0x137   : > { %v4948_v61 = vpack.c.bf16 %v551_v19, %v551_v19  ;;  %v2413_v36 = vsel %vm6474_vm5, %v2408_v23, %v2412_v24  ;;  %v2248_v37 = vld [vmem:[#allocation2 + $0xb8] sm:$0x11]  ;;  %v739_v20 = vunpack.c.l.bf16 %v703_v5  ;;  %v2429_v19 = vshrl.u32 %v6712_v63, 16 }
 0x138   : > { %v526_v40 = vpop.permute.xlu1 %525  ;;  %v4645_v11 = vcombine.high %v2385_v44, %v2413_v36  ;;  %v4644_v38 = vcombine.low %v2385_v44, %v2413_v36  ;;  %v2424_v41 = vshll.u32 %v2248_v37, 16  ;;  %v2457_v24 = vshrl.u32 %v6715_v26, 16  ;;  %v1350_v44 = vld [vmem:[#allocation2 + $0xd8] sm:$0x1]  ;;  %v6731_v36 = vld [vmem:[%s7233_s2 + $0x3] ss:$0 sm:$0xff] }
 0x139   : > { %v657_v35 = vsel %vm6106_vm2, %v4948_v61, %v656_v29  ;;  %v553_v1 = vmul.f32 %v526_v40, %v427_v46  ;;  %v1478_v46 = vadd.f32 %v6395_v49, %v1454_v48  ;;  %v2460_v29 = vshll.u32 %v6715_v26, 16 }
 0x13a   : > { %658 = vst [vmem:[#allocation2 + $0xd0] sm:$0x1] %v657_v35  ;;  %2853 = vmatprep.mubr.bf16.mxu0 %v4645_v11  ;;  %v2426_v42 = vrot.slane %v2424_v41, 5  ;;  %v1480_v37 = vadd.f32 %v6731_v36, %v1456_v14  ;;  %v763_v32 = vmul.f32 %v6669_v54, %v739_v20  ;;  %v2431_v11 = vrot.slane %v2429_v19, 4  ;;  %v6745_v20 = vld [vmem:[#allocation2 + $0xc8] sm:$0xff] }
 0x13b   : > { %v4950_v53 = vpack.c.bf16 %v553_v1, %v553_v1  ;;  %2854 = vmatmul.mubr.bf16.gmra.mxu0 %v4644_v38  ;;  %v1496_v61 = vmax.f32 %v1478_v46, 0.0  ;;  %v5561_v38 = vld [vmem:[%s5921_s25 + $0x108] sm:$0xff]  ;;  %v2434_v41 = vrot.slane %v2432_v22, 5  ;;  %v1728_v19 = vld [vmem:[#allocation2 + $0xfc] sm:$0x1] }
 0x13c   : > { %v2244_v56 = vld [vmem:[#allocation2 + $0x98] sm:$0x11]  ;;  %v2427_v49 = vsel %vm6474_vm5, %v2422_v57, %v2426_v42  ;;  %v1059_v35 = vunpack.c.l.bf16 %v5561_v38  ;;  %v1498_v55 = vmax.f32 %v1480_v37, 0.0  ;;  %v787_v6 = vadd.f32 %v6681_v13, %v763_v32 }
 0x13d   : > { %v661_v25 = vsel %vm6106_vm2, %v4950_v53, %v660_v2  ;;  %v903_v60 = vpop.permute.xlu1 %902  ;;  %v2396_v3 = vshll.u32 %v2244_v56, 16  ;;  %v2459_v2 = vrot.slane %v2457_v24, 4  ;;  %v1724_v56 = vld [vmem:[#allocation2 + $0xdc] sm:$0x1]  ;;  %v2435_v18 = vor.u32 %v2434_v41, %v2431_v11 }
 0x13e   : > { %662 = vst [vmem:[#allocation2 + $0xf0] sm:$0x1] %v661_v25  ;;  %v930_v7 = vmul.f32 %v903_v60, %v804_v50  ;;  %v2462_v50 = vrot.slane %v2460_v29, 5  ;;  %v1083_v25 = vmul.f32 %v6687_v17, %v1059_v35  ;;  %v342_v60 = vld [vmem:[%s5921_s25 + $0x110] sm:$0x11]  ;;  %v805_v14 = vmax.f32 %v787_v6, 0.0 }
 0x13f   : > { %v2398_v59 = vrot.slane %v2396_v3, 5  ;;  %v6747_v17 = vrot.slane %v2435_v18, 4  ;;  %v5562_v29 = vld [vmem:[%s7232_s1] ss:$0 sm:$0xff] }
 0x140   : > { %v4968_v21 = vpack.c.bf16 %v930_v7, %v930_v7  ;;  %v2463_v5 = vor.u32 %v2462_v50, %v2459_v2  ;;  %v363_v7 = vunpack.c.l.bf16 %v342_v60 }
 0x141   : > { %v2399_v23 = vsel %vm6474_vm5, %v2394_v47, %v2398_v59  ;;  %v2251_v40 = vld [vmem:[#allocation2 + $0xd0] sm:$0x11]  ;;  %v6741_v47 = vld [vmem:[#allocation2 + $0xe8] sm:$0xff] }
 0x142   : > { %v1035_v16 = vsel %vm6106_vm2, %v4968_v21, %v1034_v9  ;;  %v1213_v31 = vpop.permute.xlu1 %1212  ;;  %v4647_v33 = vcombine.high %v2399_v23, %v2427_v49  ;;  %v4646_v4 = vcombine.low %v2399_v23, %v2427_v49  ;;  %v2438_v53 = vshll.u32 %v2251_v40, 16 }
 0x143   : > { %1036 = vst [vmem:[#allocation2 + $0xf4] sm:$0x1] %v1035_v16  ;;  %v1248_v27 = vmul.f32 %v1213_v31, %v1122_v8  ;;  %v704_v21 = vrot.slane %v342_v60, 4  ;;  %v6749_v22 = vrot.slane %v2463_v5, 4  ;;  %v1107_v49 = vadd.f32 %v6700_v58, %v1083_v25  ;;  %v6763_v58 = vld [vmem:[#allocation2 + $0x20] sm:$0xff] }
 0x144   : > { %2918 = vmatprep.mubr.bf16.mxu1 %v4647_v33  ;;  %v2440_v46 = vrot.slane %v2438_v53, 5  ;;  %v387_v16 = vmul.f32 %v5562_v29, %v363_v7  ;;  %v2471_v31 = vshrl.u32 %v6741_v47, 16  ;;  %v2474_v33 = vshll.u32 %v6741_v47, 16 }
 0x145   : > { %v4984_v1 = vpack.c.bf16 %v1248_v27, %v1248_v27  ;;  %2919 = vmatmul.mubr.bf16.gmra.mxu1 %v4646_v4  ;;  %v740_v38 = vunpack.c.l.bf16 %v704_v21  ;;  %v4749_v2 = vcombine.high %v6763_v58, %v6501_v15  ;;  %v1125_v50 = vmax.f32 %v1107_v49, 0.0  ;;  %v5507_v21 = vld [vmem:[%s7235_s4 + $0x370] sm:$0xff]  }
 0x146   : > { %v2441_v4 = vsel %vm6474_vm5, %v6747_v17, %v2440_v46  ;;  %v2473_v53 = vrot.slane %v2471_v31, 4  ;;  %v4753_v29 = vcombine.high %v6503_v30, %v6626_v0 }
 0x147   : > { %v1351_v28 = vsel %vm6106_vm2, %v4984_v1, %v1350_v44  ;;  %v1587_v48 = vpop.permute.xlu1 %1586  ;;  %v2446_v44 = vshll.u32 %v6745_v20, 16  ;;  %v5563_v1 = vld [vmem:[%s5921_s25 + $0x118] sm:$0x11]  ;;  %v764_v18 = vmul.f32 %v6669_v54, %v740_v38  ;;  %v4748_v54 = vcombine.low %v6763_v58, %v6501_v15 }
 0x148   : > { %1352 = vst [vmem:[#allocation2 + $0xd8] sm:$0x1] %v1351_v28  ;;  %v1622_v51 = vmul.f32 %v1587_v48, %v1496_v61  ;;  %v2443_v61 = vshrl.u32 %v6745_v20, 16  ;;  %v1398_v41 = vrot.slane %v5563_v1, 4  ;;  %v5564_v28 = vld [vmem:[%s7233_s2] ss:$0 sm:$0xff] }
 0x149   : > { %v411_v48 = vadd.f32 %v5564_v28, %v387_v16  ;;  %v2448_v6 = vrot.slane %v2446_v44, 5 }
 0x14a   : > { %v5002_v3 = vpack.c.bf16 %v1622_v51, %v1622_v51  ;;  %v2255_v42 = vld [vmem:[#allocation2 + $0xf0] sm:$0x11] }
 0x14b   : > { %v1597_v8 = vpop.permute.xlu1 %1596  ;;  %v2466_v9 = vshll.u32 %v2255_v42, 16  ;;  %v429_v7 = vmax.f32 %v411_v48, 0.0 }
 0x14c   : > { %v1725_v59 = vsel %vm6106_vm2, %v5002_v3, %v1724_v56  ;;  %v1624_v57 = vmul.f32 %v1597_v8, %v1498_v55  ;;  %v2445_v55 = vrot.slane %v2443_v61, 4  ;;  %v2476_v56 = vrot.slane %v2474_v33, 5  ;;  %v664_v33 = vld [vmem:[#allocation2 + $0x110] sm:$0x1] }
 0x14d   : > { %1726 = vst [vmem:[#allocation2 + $0xdc] sm:$0x1] %v1725_v59  ;;  %v2468_v23 = vrot.slane %v2466_v9, 5  ;;  %v1434_v3 = vunpack.c.l.bf16 %v1398_v41  ;;  %v5505_v59 = vld [vmem:[%s7235_s4 + $0x338] sm:$0xff]   ;;  %v6807_v41 = vld [vmem:[#allocation2 + $0x28] sm:$0xff] }
 0x14e   : > { %v5004_v24 = vpack.c.bf16 %v1624_v57, %v1624_v57  ;;  %v2449_v8 = vor.u32 %v2448_v6, %v2445_v55  ;;  %v2477_v46 = vor.u32 %v2476_v56, %v2473_v53  ;;  %v788_v57 = vadd.f32 %v6681_v13, %v764_v18  ;;  %v1038_v53 = vld [vmem:[#allocation2 + $0x114] sm:$0x1]  ;;  %v5515_v6 = vld [vmem:[%s7235_s4 + $0x360] sm:$0xff]  }
 0x14f   : > { %v2469_v27 = vsel %vm6474_vm5, %v6749_v22, %v2468_v23  ;;  %v1458_v49 = vmul.f32 %v6706_v45, %v1434_v3  ;;  %v5509_v45 = vld [vmem:[%s7235_s4 + $0x330] sm:$0xff]   ;;  %v4757_v18 = vcombine.high %v6620_v62, %v6712_v63  ;;  %v5516_v3 = vld [vmem:[%s7235_s4 + $0x320] sm:$0xff]  }
 0x150   : > { %v1729_v37 = vsel %vm6106_vm2, %v5004_v24, %v1728_v19  ;;  %v908_v32 = vpop.permute.xlu1 %907  ;;  %v4649_v40 = vcombine.high %v2441_v4, %v2469_v27  ;;  %v4648_v11 = vcombine.low %v2441_v4, %v2469_v27  ;;  %v6788_v13 = vrot.slane %v2449_v8, 4 }
 0x151   : > { %1730 = vst [vmem:[#allocation2 + $0xfc] sm:$0x1] %v1729_v37  ;;  %v931_v35 = vmul.f32 %v908_v32, %v805_v14  ;;  %v6790_v31 = vrot.slane %v2477_v46, 4  ;;  %v806_v4 = vmax.f32 %v788_v57, 0.0  ;;  %v5511_v37 = vld [vmem:[%s7235_s4 + $0x368] sm:$0xff]   ;;  %v1482_v32 = vadd.f32 %v6731_v36, %v1458_v49 }
 0x152   : > { %2861 = vmatprep.mubr.bf16.mxu0 %v4649_v40  ;;  %v3471_v40 = vld [vmem:[#allocation2 + $0x40] sm:$0xff]  ;;  %v5513_v36 = vld [vmem:[%s7235_s4 + $0x328] sm:$0xff]   ;;  %v3514_v57 = vshrl.u32 %v6807_v41, 16 }
 0x153   : > { %v4969_v51 = vpack.c.bf16 %v931_v35, %v931_v35  ;;  %2862 = vmatmul.mubr.bf16.gmra.mxu0 %v4648_v11  ;;  %v3528_v28 = vshrl.u32 %v3471_v40, 16  ;;  %v3531_v48 = vshll.u32 %v3471_v40, 16  ;;  %v1500_v55 = vmax.f32 %v1482_v32, 0.0 }
 0x154   : > { %3345 = vmatprep.mubr.bf16.mxu0 %v4749_v2  ;;  %v2252_v5 = vld [vmem:[#allocation2 + $0xd8] sm:$0x11] }
 0x155   : > { %1037 = vst [vmem:[#allocation2 + $0x104] sm:$0xf] %v4969_v51  ;;  %v1228_v25 = vpop.permute.xlu1 %1227  ;;  %v2452_v60 = vshll.u32 %v2252_v5, 16  ;;  %v4752_v51 = vcombine.low %v6503_v30, %v6626_v0  ;;  %v3475_v5 = vld [vmem:[#allocation2 + $0x60] sm:$0xff]  ;;  %v3533_v8 = vrot.slane %v3531_v48, 5 }
 0x156   : > { %v1251_v42 = vmul.f32 %v1228_v25, %v1125_v50  ;;  %v4751_v50 = vcombine.high %v6807_v41, %v6555_v43  ;;  %v3500_v25 = vshrl.u32 %v6763_v58, 16 }
 0x157   : > { %v2454_v19 = vrot.slane %v2452_v60, 5  ;;  %v3503_v60 = vshll.u32 %v6763_v58, 16  ;;  %v5519_v58 = vld [vmem:[%s7235_s4 + $0x358] sm:$0xff]  }
 0x158   : > { %v4987_v9 = vpack.c.bf16 %v1251_v42, %v1251_v42  ;;  %v2256_v14 = vld [vmem:[#allocation2 + $0xf8] sm:$0x11]  ;;  %v3473_v42 = vld [vmem:[#allocation2 + $0x50] sm:$0x11] }
 0x159   : > { %v2480_v23 = vshll.u32 %v2256_v14, 16  ;;  %v2455_v61 = vsel %vm6474_vm5, %v6788_v13, %v2454_v19  ;;  %v4750_v14 = vcombine.low %v6807_v41, %v6555_v43  ;;  %v3469_v19 = vld [vmem:[#allocation2 + $0x30] sm:$0x11]  ;;  %v4755_v43 = vcombine.high %v6562_v52, %v6659_v12 }
 0x15a   : > { %1357 = vst [vmem:[#allocation2 + $0x108] sm:$0xf] %v4987_v9  ;;  %v536_v24 = vpop.permute.xlu1 %535  ;;  %v3479_v9 = vld [vmem:[#allocation2 + $0x80] sm:$0xff] }
 0x15b   : > { %v555_v16 = vmul.f32 %v536_v24, %v429_v7  ;;  %3346 = vmatmul.mubr.bf16.vlgmr.msra.gmra.mxu0 %v4748_v54  ;;  %v2482_v15 = vrot.slane %v2480_v23, 5  ;;  %v3530_v7 = vrot.slane %v3528_v28, 4  ;;  %v1732_v54 = vld [vmem:[#allocation2 + $0x11c] sm:$0x1]  ;;  %v3559_v23 = vshll.u32 %v3475_v5, 16 }
 0x15c   : > { %3353 = vmatprep.mubr.bf16.mxu0 %v4753_v29  ;;  %5256 = vmatpush3.bf16.msra.mxu0 %v5505_v59  ;;  %v3556_v59 = vshrl.u32 %v3475_v5, 16  ;;  %v6837_v29 = vld [vmem:[#allocation2 + $0x100] sm:$0xff]  ;;  %v5527_v5 = vld [vmem:[%s7235_s4 + $0x348] sm:$0xff]  }
 0x15d   : > { %v4952_v27 = vpack.c.bf16 %v555_v16, %v555_v16  ;;  %5257 = vmatprep.subr.bf16.mxu0 %v5507_v21  ;;  %v2483_v44 = vsel %vm6474_vm5, %v6790_v31, %v2482_v15  ;;  %v5518_v21 = vld [vmem:[%s7235_s4 + $0x3b8] sm:$0xff]   ;;  %v5521_v16 = vld [vmem:[%s7235_s4 + $0x3f0] sm:$0xff]   ;;  %v3502_v15 = vrot.slane %v3500_v25, 4  ;;  %v4761_v34 = vcombine.high %v6715_v26, %v6837_v29 }
 0x15e   : > { %v4651_v11 = vcombine.high %v2455_v61, %v2483_v44  ;;  %v4650_v38 = vcombine.low %v2455_v61, %v2483_v44  ;;  %v3584_v61 = vshrl.u32 %v3479_v9, 16  ;;  %v3472_v44 = vld [vmem:[#allocation2 + $0x48] sm:$0xff] }
 0x15f   : > { %v665_v35 = vsel %vm6106_vm2, %v4952_v27, %v664_v33  ;;  %v913_v1 = vpop.permute.xlu1 %912  ;;  %v3505_v33 = vrot.slane %v3503_v60, 5  ;;  %v3534_v27 = vor.u32 %v3533_v8, %v3530_v7  ;;  %v4754_v7 = vcombine.low %v6562_v52, %v6659_v12  ;;  %v5526_v8 = vld [vmem:[%s7235_s4 + $0x3a8] sm:$0xff]   ;;  %v5529_v52 = vld [vmem:[%s7235_s4 + $0x3e0] sm:$0xff]  }
 0x160   : > { %666 = vst [vmem:[#allocation2 + $0x110] sm:$0x1] %v665_v35  ;;  %v932_v2 = vmul.f32 %v913_v1, %v806_v4  ;;  %2926 = vmatprep.mubr.bf16.mxu1 %v4651_v11  ;;  %5258 = vmatpush3.bf16.msra.mxu0 %v5509_v45  ;;  %v3537_v4 = vshll.u32 %v3473_v42, 16  ;;  %v5520_v45 = vld [vmem:[%s7235_s4 + $0x318] sm:$0xff]   ;;  %v4756_v11 = vcombine.low %v6620_v62, %v6712_v63  ;;  %v3509_v35 = vshll.u32 %v3469_v19, 16 }
 0x161   : > { %2927 = vmatmul.mubr.bf16.gmra.mxu1 %v4650_v38  ;;  %5259 = vmatprep.subr.bf16.mxu0 %v5511_v37  ;;  %v3517_v37 = vshll.u32 %v6807_v41, 16  ;;  %v5523_v38 = vld [vmem:[%s7235_s4 + $0x350] sm:$0xff]   ;;  %v3587_v1 = vshll.u32 %v3479_v9, 16  ;;  %v6862_v62 = vrot.slane %v3556_v59, 4  ;;  %v6864_v63 = vrot.slane %v3559_v23, 5 }
 0x162   : > { %v4970_v56 = vpack.c.bf16 %v932_v2, %v932_v2  ;;  %3410 = vmatprep.mubr.bf16.mxu1 %v4751_v50  ;;  %v5522_v41 = vld [vmem:[%s7235_s4 + $0x3b0] sm:$0xff]   ;;  %v3506_v28 = vor.u32 %v3505_v33, %v3502_v15  ;;  %v3539_v48 = vrot.slane %v3537_v4, 5  ;;  %v3511_v25 = vrot.slane %v3509_v35, 5  ;;  %v5531_v15 = vld [vmem:[%s7235_s4 + $0x340] sm:$0xff]  }
 0x163   : > { %3354 = vmatmul.mubr.bf16.gmra.mxu0 %v4752_v51  ;;  %v5524_v51 = vld [vmem:[%s7235_s4 + $0x310] sm:$0xff]   ;;  %v3535_v60 = vrot.slane %v3534_v27, 4  ;;  %v6886_v9 = vrot.slane %v3517_v37, 5  ;;  %v6914_v27 = vld [vmem:[#allocation2 + $0x68] sm:$0xff]  ;;  %v3470_v37 = vld [vmem:[#allocation2 + $0x38] sm:$0x11] }
 0x164   : > { %v1039_v30 = vsel %vm6106_vm2, %v4970_v56, %v1038_v53  ;;  %v1607_v0 = vpop.permute.xlu1 %1606  ;;  %3361 = vmatprep.mubr.bf16.mxu0 %v4757_v18  ;;  %5260 = vmatpush3.bf16.msra.mxu0 %v5513_v36  ;;  %v5525_v36 = vld [vmem:[%s7235_s4 + $0x3e8] sm:$0xff]   ;;  %v3542_v53 = vshrl.u32 %v3472_v44, 16  ;;  %v3545_v56 = vshll.u32 %v3472_v44, 16  ;;  %v3507_v59 = vrot.slane %v3506_v28, 4 }
 0x165   : > { %1040 = vst [vmem:[#allocation2 + $0x114] sm:$0x1] %v1039_v30  ;;  %v1626_v46 = vmul.f32 %v1607_v0, %v1500_v55  ;;  %5261 = vmatprep.subr.bf16.mxu0 %v5515_v6  ;;  %v3481_v55 = vld [vmem:[#allocation2 + $0x90] sm:$0x11]  ;;  %v6872_v6 = vrot.slane %v3514_v57, 4  ;;  %v3586_v30 = vrot.slane %v3584_v61, 4  ;;  %v6890_v57 = vsel %vm6474_vm5, %v3535_v60, %v3539_v48 }
 0x166   : > { %v3589_v0 = vrot.slane %v3587_v1, 5  ;;  %v3593_v12 = vshll.u32 %v3481_v55, 16  ;;  %v3547_v19 = vrot.slane %v3545_v56, 5  ;;  %v5533_v61 = vld [vmem:[%s7235_s4 + $0x3d8] sm:$0xff]   ;;  %v3489_v1 = vld [vmem:[#allocation2 + $0xd0] sm:$0x11]  ;;  %v4758_v48 = vcombine.low %v6661_v10, %v6745_v20 }
 0x167   : > { %v5006_v49 = vpack.c.bf16 %v1626_v46, %v1626_v46  ;;  %v5071_v24 = vpop.f32.mrf.mxu1  ;;  %v3477_v46 = vld [vmem:[#allocation2 + $0x70] sm:$0x11]  ;;  %v3570_v28 = vshrl.u32 %v6914_v27, 16 }
 0x168   : > { %5262 = vmatpush3.bf16.msra.mxu0 %v5516_v3  ;;  %v3483_v3 = vld [vmem:[#allocation2 + $0xa0] sm:$0xff]  ;;  %v3565_v33 = vshll.u32 %v3477_v46, 16  ;;  %v3590_v4 = vor.u32 %v3589_v0, %v3586_v30  ;;  %v3595_v44 = vrot.slane %v3593_v12, 5  ;;  %v3485_v55 = vld [vmem:[#allocation2 + $0xb0] sm:$0x11] }
 0x169   : > { %v1733_v32 = vsel %vm6106_vm2, %v5006_v49, %v1732_v54  ;;  %v5072_v40 = vpop.f32.mrf.mxu1  ;;  %3411 = vmatmul.mubr.bf16.vlgmr.msra.gmra.mxu1 %v4750_v14  ;;  %5263 = vmatprep.subr.bf16.mxu0 %v5519_v58  ;;  %v3562_v58 = vor.u32 %v6864_v63, %v6862_v62  ;;  %v3544_v14 = vrot.slane %v3542_v53, 4  ;;  %v4759_v54 = vcombine.high %v6661_v10, %v6745_v20  ;;  %v6924_v62 = vld [vmem:[#allocation2 + $0x108] sm:$0xff]  ;;  %v5534_v53 = vld [vmem:[%s7235_s4 + $0x398] sm:$0xff]  }
 0x16a   : > { %1734 = vst [vmem:[#allocation2 + $0x11c] sm:$0x1] %v1733_v32  ;;  %v6855_v2 = vadd.f32 %v5072_v40, %v5071_v24  ;;  %5296 = vmatpush3.bf16.msra.mxu1 %v5518_v21  ;;  %3418 = vmatprep.mubr.bf16.mxu1 %v4755_v43  ;;  %v5528_v21 = vld [vmem:[%s7235_s4 + $0x308] sm:$0xff]   ;;  %v3612_v23 = vshrl.u32 %v3483_v3, 16  ;;  %v3615_v49 = vshll.u32 %v3483_v3, 16  ;;  %v4760_v24 = vcombine.low %v6715_v26, %v6837_v29  ;;  %v5530_v26 = vld [vmem:[%s7235_s4 + $0x3a0] sm:$0xff]  }
 0x16b   : > { %v5074_v50 = vpop.f32.mrf.mxu1  ;;  %3362 = vmatmul.mubr.bf16.gmra.mxu0 %v4756_v11  ;;  %5297 = vmatprep.subr.bf16.mxu1 %v5521_v16  ;;  %v6904_v16 = vsel %vm6474_vm5, %v3507_v59, %v3511_v25  ;;  %v3520_v32 = vor.u32 %v6886_v9, %v6872_v6  ;;  %v3480_v40 = vld [vmem:[#allocation2 + $0x88] sm:$0xff]  ;;  %v5532_v11 = vld [vmem:[%s7235_s4 + $0x300] sm:$0xff]   ;;  %v3548_v35 = vor.u32 %v3547_v19, %v3544_v14  ;;  %v3567_v63 = vrot.slane %v3565_v33, 5  ;;  %v5536_v59 = vld [vmem:[%s7235_s4 + $0x390] sm:$0xff]  }
 0x16c   : > { %3369 = vmatprep.mubr.bf16.mxu0 %v4761_v34  ;;  %5264 = vmatpush3.bf16.msra.mxu0 %v5520_v45  ;;  %v4861_v43 = vcombine.high %v6904_v16, %v6890_v57  ;;  %v3474_v45 = vld [vmem:[#allocation2 + $0x58] sm:$0x11]  ;;  %v3614_v34 = vrot.slane %v3612_v23, 4  ;;  %v3598_v6 = vshrl.u32 %v3480_v40, 16  ;;  %v3601_v56 = vshll.u32 %v3480_v40, 16  ;;  %v6948_v9 = vld [vmem:[#allocation2 + $0xa8] sm:$0xff] }
 0x16d   : > { %v5075_v18 = vpop.f32.mrf.mxu1  ;;  %5265 = vmatprep.subr.bf16.mxu0 %v5523_v38  ;;  %v3563_v38 = vrot.slane %v3562_v58, 4  ;;  %v3649_v25 = vshll.u32 %v3489_v1, 16  ;;  %v3696_v10 = vshrl.u32 %v6837_v29, 16  ;;  %v3699_v20 = vshll.u32 %v6837_v29, 16  ;;  %v3482_v12 = vld [vmem:[#allocation2 + $0x98] sm:$0x11] }
 0x16e   : > { %v6877_v42 = vadd.f32 %v5075_v18, %v5074_v50  ;;  %5298 = vmatpush3.bf16.msra.mxu1 %v5522_v41  ;;  %v3617_v41 = vrot.slane %v3615_v49, 5  ;;  %v3591_v50 = vrot.slane %v3590_v4, 4  ;;  %v4763_v60 = vcombine.high %v6741_v47, %v6924_v62  ;;  %v3478_v19 = vld [vmem:[#allocation2 + $0x78] sm:$0x11]  ;;  %v3497_v33 = vld [vmem:[#allocation2 + $0x110] sm:$0x11] }
 0x16f   : > { %5299 = vmatprep.subr.bf16.mxu1 %v5525_v36  ;;  %v3551_v36 = vshll.u32 %v3474_v45, 16  ;;  %v3549_v30 = vrot.slane %v3548_v35, 4  ;;  %v3573_v3 = vshll.u32 %v6914_v27, 16  ;;  %v3621_v58 = vshll.u32 %v3485_v55, 16  ;;  %v3493_v45 = vld [vmem:[#allocation2 + $0xf0] sm:$0x11] }
 0x170   : > { %5266 = vmatpush3.bf16.msra.mxu0 %v5524_v51  ;;  %v3523_v51 = vshll.u32 %v3470_v37, 16  ;;  %v6934_v18 = vsel %vm6474_vm5, %v3591_v50, %v3595_v44  ;;  %v3618_v0 = vor.u32 %v3617_v41, %v3614_v34  ;;  %v3600_v14 = vrot.slane %v3598_v6, 4  ;;  %v5539_v35 = vld [vmem:[%s7235_s4 + $0x3c0] sm:$0xff]  }
 0x171   : > { %3419 = vmatmul.mubr.bf16.gmra.mxu1 %v4754_v7  ;;  %5267 = vmatprep.subr.bf16.mxu0 %v5527_v5  ;;  %v5535_v5 = vld [vmem:[%s7235_s4 + $0x3d0] sm:$0xff]   ;;  %v4860_v7 = vcombine.low %v6904_v16, %v6890_v57  ;;  %v3553_v46 = vrot.slane %v3551_v36, 5  ;;  %v3603_v57 = vrot.slane %v3601_v56, 5  ;;  %v3698_v23 = vrot.slane %v3696_v10, 4 }
 0x172   : > { %5300 = vmatpush3.bf16.msra.mxu1 %v5526_v8  ;;  %3426 = vmatprep.mubr.bf16.mxu1 %v4759_v54  ;;  %v3568_v8 = vsel %vm6474_vm5, %v3563_v38, %v3567_v63  ;;  %v5537_v54 = vld [vmem:[%s7235_s4 + $0x3c8] sm:$0xff]   ;;  %v3701_v49 = vrot.slane %v3699_v20, 5  ;;  %v3572_v16 = vrot.slane %v3570_v28, 4  ;;  %v3626_v27 = vshrl.u32 %v6948_v9, 16 }
 0x173   : > { %3370 = vmatmul.mubr.bf16.gmra.mxu0 %v4760_v24  ;;  %5301 = vmatprep.subr.bf16.mxu1 %v5529_v52  ;;  %v4865_v29 = vcombine.high %v3568_v8, %v6934_v18  ;;  %v3525_v52 = vrot.slane %v3523_v51, 5  ;;  %v3521_v24 = vrot.slane %v3520_v32, 4  ;;  %v6959_v4 = vsel %vm6474_vm5, %v3549_v30, %v3553_v46  ;;  %v3490_v51 = vld [vmem:[#allocation2 + $0xd8] sm:$0x11] }
 0x174   : > { %5268 = vmatpush3.bf16.msra.mxu0 %v5528_v21  ;;  %4076 = vmatprep.mubr.bf16.mxu0 %v4861_v43  ;;  %v3651_v21 = vrot.slane %v3649_v25, 5  ;;  %v3623_v43 = vrot.slane %v3621_v58, 5  ;;  %v3619_v37 = vrot.slane %v3618_v0, 4  ;;  %v3579_v32 = vshll.u32 %v3478_v19, 16 }
 0x175   : > { %5269 = vmatprep.subr.bf16.mxu0 %v5531_v15  ;;  %v3575_v15 = vrot.slane %v3573_v3, 5  ;;  %v3526_v44 = vsel %vm6474_vm5, %v3521_v24, %v3525_v52  ;;  %v3604_v40 = vor.u32 %v3603_v57, %v3600_v14  ;;  %v3702_v1 = vor.u32 %v3701_v49, %v3698_v23 }
 0x176   : > { %5302 = vmatpush3.bf16.msra.mxu1 %v5530_v26  ;;  %v3607_v26 = vshll.u32 %v3482_v12, 16  ;;  %v3652_v38 = vsel %vm6474_vm5, %v6747_v17, %v3651_v21  ;;  %v3705_v34 = vshll.u32 %v3497_v33, 16  ;;  %v4863_v41 = vcombine.high %v3526_v44, %v6959_v4 }
 0x177   : > { %5303 = vmatprep.subr.bf16.mxu1 %v5533_v61  ;;  %v5538_v61 = vld [vmem:[%s7235_s4 + $0x388] sm:$0xff]   ;;  %v3576_v63 = vor.u32 %v3575_v15, %v3572_v16  ;;  %v3677_v50 = vshll.u32 %v3493_v45, 16  ;;  %v3629_v36 = vshll.u32 %v6948_v9, 16  ;;  %v4864_v28 = vcombine.low %v3568_v8, %v6934_v18 }
 0x178   : > { %5270 = vmatpush3.bf16.msra.mxu0 %v5532_v11  ;;  %v4762_v11 = vcombine.low %v6741_v47, %v6924_v62  ;;  %v3624_v47 = vsel %vm6474_vm5, %v3619_v37, %v3623_v43  ;;  %v3581_v6 = vrot.slane %v3579_v32, 5  ;;  %v3605_v56 = vrot.slane %v3604_v40, 4  ;;  %v3494_v32 = vld [vmem:[#allocation2 + $0xf8] sm:$0x11] }
 0x179   : > { %3427 = vmatmul.mubr.bf16.gmra.mxu1 %v4758_v48  ;;  %v3609_v48 = vrot.slane %v3607_v26, 5  ;;  %v4869_v17 = vcombine.high %v3624_v47, %v3652_v38  ;;  %v3707_v25 = vrot.slane %v3705_v34, 5  ;;  %v3577_v10 = vrot.slane %v3576_v63, 4 }
 0x17a   : > { %5304 = vmatpush3.bf16.msra.mxu1 %v5534_v53  ;;  %3434 = vmatprep.mubr.bf16.mxu1 %v4763_v60  ;;  %v5540_v53 = vld [vmem:[%s7235_s4 + $0x380] sm:$0xff]   ;;  %v3679_v20 = vrot.slane %v3677_v50, 5  ;;  %v3486_v60 = vld [vmem:[#allocation2 + $0xb8] sm:$0x11]  ;;  %v3628_v30 = vrot.slane %v3626_v27, 4  ;;  %v3631_v0 = vrot.slane %v3629_v36, 5  ;;  %v4862_v9 = vcombine.low %v3526_v44, %v6959_v4 }
 0x17b   : > { %4077 = vmatmul.mubr.bf16.vlgmr.msra.gmra.mxu0 %v4860_v7  ;;  %5305 = vmatprep.subr.bf16.mxu1 %v5535_v5  ;;  %v3703_v5 = vrot.slane %v3702_v1, 4  ;;  %v3610_v7 = vsel %vm6474_vm5, %v3605_v56, %v3609_v48  ;;  %v3663_v8 = vshll.u32 %v3490_v51, 16  ;;  %v3710_v46 = vshrl.u32 %v6924_v62, 16  ;;  %v3498_v27 = vld [vmem:[#allocation2 + $0x118] sm:$0x11] }
 0x17c   : > { %4084 = vmatprep.mubr.bf16.mxu0 %v4865_v29  ;;  %v3713_v58 = vshll.u32 %v6924_v62, 16  ;;  %v3582_v14 = vsel %vm6474_vm5, %v3577_v10, %v3581_v6  ;;  %v4868_v23 = vcombine.low %v3624_v47, %v3652_v38  ;;  %v3680_v62 = vsel %vm6474_vm5, %v6749_v22, %v3679_v20 }
 0x17d   : > { %v3708_v57 = vsel %vm6474_vm5, %v3703_v5, %v3707_v25  ;;  %v4867_v19 = vcombine.high %v3582_v14, %v3610_v7  ;;  %v3632_v49 = vor.u32 %v3631_v0, %v3628_v30  ;;  %v3665_v15 = vrot.slane %v3663_v8, 5 }
 0x17e   : > { %5306 = vmatpush3.bf16.msra.mxu1 %v5536_v59  ;;  %v3712_v33 = vrot.slane %v3710_v46, 4  ;;  %v3715_v4 = vrot.slane %v3713_v58, 5  ;;  %v4873_v45 = vcombine.high %v3680_v62, %v3708_v57  ;;  %v3719_v38 = vshll.u32 %v3498_v27, 16 }
 0x17f   : > { %5307 = vmatprep.subr.bf16.mxu1 %v5537_v54  ;;  %v3635_v54 = vshll.u32 %v3486_v60, 16  ;;  %v3633_v22 = vrot.slane %v3632_v49, 4  ;;  %v3666_v40 = vsel %vm6474_vm5, %v6788_v13, %v3665_v15  ;;  %v4866_v34 = vcombine.low %v3582_v14, %v3610_v7 }
 0x180   : > { %v3691_v63 = vshll.u32 %v3494_v32, 16  ;;  %v3721_v48 = vrot.slane %v3719_v38, 5 }
 0x181   : > { %3435 = vmatmul.mubr.bf16.gmra.mxu1 %v4762_v11  ;;  %v3637_v44 = vrot.slane %v3635_v54, 5  ;;  %v3716_v11 = vor.u32 %v3715_v4, %v3712_v33 }
 0x182   : > { %5308 = vmatpush3.bf16.msra.mxu1 %v5538_v61  ;;  %4141 = vmatprep.mubr.bf16.mxu1 %v4863_v41 }
 0x183   : > { %v5077_v55 = vpop.f32.mrf.mxu1  ;;  %4085 = vmatmul.mubr.bf16.gmra.mxu0 %v4864_v28  ;;  %5309 = vmatprep.subr.bf16.mxu1 %v5539_v35  ;;  %v3638_v41 = vsel %vm6474_vm5, %v3633_v22, %v3637_v44  ;;  %v3717_v47 = vrot.slane %v3716_v11, 4 }
 0x184   : > { %v5031_v18 = vpop.f32.mrf.mxu0  ;;  %4092 = vmatprep.mubr.bf16.mxu0 %v4869_v17  ;;  %v4871_v36 = vcombine.high %v3638_v41, %v3666_v40  ;;  %v4870_v25 = vcombine.low %v3638_v41, %v3666_v40 }
 0x185   : > { %v5078_v3 = vpop.f32.mrf.mxu1  ;;  %v3722_v6 = vsel %vm6474_vm5, %v3717_v47, %v3721_v48 }
 0x186   : > { %v5079_v29 = vadd.f32 %v5078_v3, %v5077_v55  ;;  %5310 = vmatpush3.bf16.msra.mxu1 %v5540_v53  ;;  %v5032_v59 = vpop.f32.mrf.mxu0  ;;  %v3693_v53 = vrot.slane %v3691_v63, 5 }
 0x187   : > { %v5033_v52 = vadd.f32 %v5032_v59, %v5031_v18  ;;  %v5080_v12 = vpop.f32.mrf.mxu1 }
 0x188   : > { %v5034_v21 = vpop.f32.mrf.mxu0  ;;  %v3694_v18 = vsel %vm6474_vm5, %v6790_v31, %v3693_v53 }
 0x189   : > { %v6996_v24 = vadd.f32 %v6855_v2, %v5033_v52  ;;  %v5081_v16 = vpop.f32.mrf.mxu1  ;;  %4142 = vmatmul.mubr.bf16.vlgmr.msra.gmra.mxu1 %v4862_v9  ;;  %v4875_v20 = vcombine.high %v3694_v18, %v3722_v6  ;;  %v4874_v46 = vcombine.low %v3694_v18, %v3722_v6 }
 0x18a   : > { %v5082_v43 = vadd.f32 %v5081_v16, %v5080_v12  ;;  %v5035_v26 = vpop.f32.mrf.mxu0  ;;  %4149 = vmatprep.mubr.bf16.mxu1 %v4867_v19 }
 0x18b   : > { %v5036_v61 = vadd.f32 %v5035_v26, %v5034_v21  ;;  %4093 = vmatmul.mubr.bf16.gmra.mxu0 %v4868_v23 }
 0x18c   : > { %v5037_v37 = vpop.f32.mrf.mxu0  ;;  %4100 = vmatprep.mubr.bf16.mxu0 %v4873_v45 }
 0x18d   : > { %v6999_v2 = vadd.f32 %v6877_v42, %v5036_v61  ;;  %v4872_v42 = vcombine.low %v3680_v62, %v3708_v57 }
 0x18e   : > { %v5038_v35 = vpop.f32.mrf.mxu0 }
 0x18f   : > { %v5039_v1 = vadd.f32 %v5038_v35, %v5037_v37 }
 0x190   : > { %v5040_v50 = vpop.f32.mrf.mxu0 }
 0x191   : > { %v7006_v28 = vadd.f32 %v5079_v29, %v5039_v1  ;;  %4150 = vmatmul.mubr.bf16.gmra.mxu1 %v4866_v34 }
 0x192   : > { %v5041_v17 = vpop.f32.mrf.mxu0  ;;  %4157 = vmatprep.mubr.bf16.mxu1 %v4871_v36 }
 0x193   : > { %v5042_v13 = vadd.f32 %v5041_v17, %v5040_v50  ;;  %4101 = vmatmul.mubr.bf16.gmra.mxu0 %v4872_v42 }
 0x194   : > { %v5043_v51 = vpop.f32.mrf.mxu0 }
 0x195   : > { %v7008_v55 = vadd.f32 %v5082_v43, %v5042_v13 }
 0x196   : > { %v5044_v56 = vpop.f32.mrf.mxu0 }
 0x197   : > { %v5045_v5 = vadd.f32 %v5044_v56, %v5043_v51 }
 0x198   : > { %v5046_v10 = vpop.f32.mrf.mxu0 }
 0x199   : > { %4158 = vmatmul.mubr.bf16.gmra.mxu1 %v4870_v25 }
 0x19a   : > { %v5047_v60 = vpop.f32.mrf.mxu0  ;;  %4165 = vmatprep.mubr.bf16.mxu1 %v4875_v20 }
 0x19b   : > { %v5048_v30 = vadd.f32 %v5047_v60, %v5046_v10  ;;  %v5083_v0 = vpop.f32.mrf.mxu1 }
 0x19d   : > { %v5084_v3 = vpop.f32.mrf.mxu1 }
 0x19e   : > { %v5085_v7 = vadd.f32 %v5084_v3, %v5083_v0 }
 0x19f   : > { %v5086_v8 = vpop.f32.mrf.mxu1 }
 0x1a0   : > { %v7015_v58 = vadd.f32 %v5085_v7, %v5045_v5 }
 0x1a1   : > { %v5087_v9 = vpop.f32.mrf.mxu1  ;;  %4166 = vmatmul.mubr.bf16.gmra.mxu1 %v4874_v46 }
 0x1a2   : > { %7242 = vst [vmem:[#allocation4_spill] sm:$0xff] %v7015_v58  ;;  %v5088_v29 = vadd.f32 %v5087_v9, %v5086_v8 }
 0x1a4   : > { %v7017_v59 = vadd.f32 %v5088_v29, %v5048_v30 }
 0x1a6   : > { %7243 = vst [vmem:[#allocation5_spill] sm:$0xff] %v7017_v59 }
 0x1a9   : > { %v5049_v39 = vpop.f32.mrf.mxu0 }
 0x1ab   : > { %v5050_v31 = vpop.f32.mrf.mxu0 }
 0x1ac   : > { %v5051_v52 = vadd.f32 %v5050_v31, %v5049_v39 }
 0x1ad   : > { %v5052_v12 = vpop.f32.mrf.mxu0 }
 0x1af   : > { %v5053_v14 = vpop.f32.mrf.mxu0 }
 0x1b0   : > { %v5054_v57 = vadd.f32 %v5053_v14, %v5052_v12 }
 0x1b3   : > { %v5089_v54 = vpop.f32.mrf.mxu1 }
 0x1b5   : > { %v5090_v21 = vpop.f32.mrf.mxu1 }
 0x1b6   : > { %v5091_v19 = vadd.f32 %v5090_v21, %v5089_v54 }
 0x1b7   : > { %v5092_v23 = vpop.f32.mrf.mxu1 }
 0x1b8   : > { %v7019_v62 = vadd.f32 %v5091_v19, %v5051_v52 }
 0x1b9   : > { %v5093_v49 = vpop.f32.mrf.mxu1 }
 0x1ba   : > { %7244 = vst [vmem:[#allocation6_spill] sm:$0xff] %v7019_v62  ;;  %v5094_v16 = vadd.f32 %v5093_v49, %v5092_v23 }
 0x1bc   : > { %v7021_v15 = vadd.f32 %v5094_v16, %v5054_v57 }
 0x1be   : > { %7245 = vst [vmem:[#allocation7_spill] sm:$0xff] %v7021_v15 }
 0x1c7   : > { %v7023_v33 = vpop.f32.mrf.mxu0 }
 0x1c9   : > { %v7025_v4 = vpop.f32.mrf.mxu0 }
 0x1cb   : > { %v7027_v43 = vpop.f32.mrf.mxu0 }
 0x1cd   : > { %v7029_v26 = vpop.f32.mrf.mxu0 }
 0x1d5   : > { %v7031_v45 = vpop.f32.mrf.mxu1 }
 0x1d7   : > { %v5152_v61 = vpop.f32.mrf.mxu1 }
 0x1d9   : > { %v7037_v37 = vpop.f32.mrf.mxu1 }
 0x1db   : > { %v5155_v32 = vpop.f32.mrf.mxu1 }
 0x1dc   : > { %v5156_v59 = vadd.f32 %v5155_v32, %v7037_v37 }
 0x1df   : > { %v7033_v27 = vpop.f32.mrf.mxu0 }
 0x1e1   : > { %v7035_v44 = vpop.f32.mrf.mxu0 }
 0x1e3   : > { %v7039_v22 = vpop.f32.mrf.mxu0 }
 0x1e5   : > { %v7041_v40 = vpop.f32.mrf.mxu0 }
 0x1ed   : > { %v7043_v11 = vpop.f32.mrf.mxu1 }
 0x1ef   : > { %v7047_v35 = vpop.f32.mrf.mxu1 }
 0x1f1   : > { %v7051_v34 = vpop.f32.mrf.mxu1 }
 0x1f3   : > { %v7055_v63 = vpop.f32.mrf.mxu1 }
 0x1fb   : > { %v7045_v38 = vpop.f32.mrf.mxu0 }
 0x1fd   : > { %v7049_v1 = vpop.f32.mrf.mxu0 }
 0x1ff   : > { %v7053_v41 = vpop.f32.mrf.mxu0 }
 0x201   : > { %v7057_v50 = vpop.f32.mrf.mxu0 }
 0x205   : > { %v7059_v36 = vpop.f32.mrf.mxu1 }
 0x207   : > { %v7065_v48 = vpop.f32.mrf.mxu1 }
 0x209   : > { %v7071_v53 = vpop.f32.mrf.mxu1 }
 0x20b   : > { %v7073_v56 = vpop.f32.mrf.mxu1 }
 0x213   : > { %v7061_v42 = vpop.f32.mrf.mxu0 }
 0x214   : > { %7246 = vst [vmem:[#allocation8_spill] sm:$0xff] %v7061_v42 }
 0x215   : > { %v7063_v47 = vpop.f32.mrf.mxu0 }
 0x216   : > { %7247 = vst [vmem:[#allocation9_spill] sm:$0xff] %v7063_v47 }
 0x217   : > { %v7067_v17 = vpop.f32.mrf.mxu0 }
 0x218   : > { %7248 = vst [vmem:[#allocation10_spill] sm:$0xff] %v7067_v17 }
 0x219   : > { %v7069_v13 = vpop.f32.mrf.mxu0 }
 0x21a   : > { %7249 = vst [vmem:[#allocation11_spill] sm:$0xff] %v7069_v13 }
 0x21b   : > { %v5191_v51 = vpop.f32.mrf.mxu0 }
 0x21d   : > { %v5192_v6 = vpop.f32.mrf.mxu0 }
 0x21e   : > { %v5193_v58 = vadd.f32 %v5192_v6, %v5191_v51 }
 0x21f   : > { %v5194_v5 = vpop.f32.mrf.mxu0 }
 0x221   : > { %v7075_v25 = vpop.f32.mrf.mxu1  ;;  %v5195_v18 = vpop.f32.mrf.mxu0 }
 0x222   : > { %7250 = vst [vmem:[#allocation12_spill] sm:$0xff] %v7075_v25  ;;  %v5196_v51 = vadd.f32 %v5195_v18, %v5194_v5 }
 0x223   : > { %v7077_v10 = vpop.f32.mrf.mxu1  ;;  %v7079_v20 = vpop.f32.mrf.mxu0 }
 0x224   : > { %7251 = vst [vmem:[#allocation13_spill] sm:$0xff] %v7077_v10  ;;  %v5113_v10 = vadd.f32 %v7025_v4, %v7023_v33  ;;  %v5119_v4 = vadd.f32 %v7035_v44, %v7033_v27  ;;  %v5162_v27 = vadd.f32 %v7055_v63, %v7051_v34  ;;  %v5165_v34 = vadd.f32 %v7065_v48, %v7059_v36 }
 0x225   : > { %v7081_v60 = vpop.f32.mrf.mxu1  ;;  %v7083_v30 = vpop.f32.mrf.mxu0 }
 0x226   : > { %7252 = vst [vmem:[#allocation14_spill] sm:$0xff] %v7081_v60 }
 0x227   : > { %v7085_v0 = vpop.f32.mrf.mxu1  ;;  %v7087_v3 = vpop.f32.mrf.mxu0 }
 0x228   : > { %7253 = vst [vmem:[#allocation15_spill] sm:$0xff] %v7085_v0 }
 0x229   : > { %v7089_v7 = vpop.f32.mrf.mxu0  ;;  %v5231_v8 = vpop.f32.mrf.mxu1 }
 0x22b   : > { %v7091_v46 = vpop.f32.mrf.mxu0  ;;  %v5232_v9 = vpop.f32.mrf.mxu1 }
 0x22c   : > { %7254 = vst [vmem:[#allocation16_spill] sm:$0xff] %v7091_v46  ;;  %v5233_v25 = vadd.f32 %v5232_v9, %v5231_v8 }
 0x22d   : > { %v7093_v29 = vpop.f32.mrf.mxu0  ;;  %v5234_v39 = vpop.f32.mrf.mxu1 }
 0x22e   : > { %7255 = vst [vmem:[#allocation17_spill] sm:$0xff] %v7093_v29  ;;  %v3413_v29 = vadd.f32 %v5233_v25, %v5193_v58 }
 0x22f   : > { %v7095_v31 = vpop.f32.mrf.mxu0  ;;  %v5235_v52 = vpop.f32.mrf.mxu1 }
 0x230   : > { %7256 = vst [vmem:[#allocation18_spill] sm:$0xff] %v7095_v31  ;;  %v5236_v46 = vadd.f32 %v5235_v52, %v5234_v39 }
 0x231   : > { %v7097_v12 = vpop.f32.mrf.mxu0  ;;  %v5237_v14 = vpop.f32.mrf.mxu1 }
 0x232   : > { %7257 = vst [vmem:[#allocation19_spill] sm:$0xff] %v7097_v12  ;;  %v5153_v12 = vadd.f32 %v5152_v61, %v7031_v45  ;;  %v5159_v45 = vadd.f32 %v7047_v35, %v7043_v11  ;;  %v3416_v9 = vadd.f32 %v5236_v46, %v5196_v51  ;;  %v7269_v51 = vld [vmem:[#allocation4_spill] sm:$0xff] }
 0x233   : > { %v7099_v57 = vpop.f32.mrf.mxu0  ;;  %v5238_v54 = vpop.f32.mrf.mxu1 }
 0x234   : > { %7258 = vst [vmem:[#allocation20_spill] sm:$0xff] %v7099_v57  ;;  %v5239_v58 = vadd.f32 %v5238_v54, %v5237_v14  ;;  %v5168_v14 = vadd.f32 %v7073_v56, %v7071_v53 }
 0x235   : > { %v7101_v21 = vpop.f32.mrf.mxu0  ;;  %v5240_v19 = vpop.f32.mrf.mxu1 }
 0x236   : > { %7259 = vst [vmem:[#allocation21_spill] sm:$0xff] %v7101_v21 }
 0x237   : > { %v7103_v23 = vpop.f32.mrf.mxu0  ;;  %v5241_v49 = vpop.f32.mrf.mxu1 }
 0x238   : > { %7260 = vst [vmem:[#allocation22_spill] sm:$0xff] %v7103_v23  ;;  %v5242_v63 = vadd.f32 %v5241_v49, %v5240_v19 }
 0x239   : > { %v7105_v16 = vpop.f32.mrf.mxu0  ;;  %v7107_v15 = vpop.f32.mrf.mxu1 }
 0x23a   : > { %7261 = vst [vmem:[#allocation23_spill] sm:$0xff] %v7105_v16 }
 0x23b   : > { %v7109_v62 = vpop.f32.mrf.mxu1  ;;  %v5271_v13 = vpop.f32.mrf.mxu0 }
 0x23d   : > { %v7111_v17 = vpop.f32.mrf.mxu1  ;;  %v5272_v0 = vpop.f32.mrf.mxu0 }
 0x23e   : > { %7262 = vst [vmem:[#allocation24_spill] sm:$0xff] %v7111_v17  ;;  %v5273_v6 = vadd.f32 %v5272_v0, %v5271_v13 }
 0x23f   : > { %v7113_v60 = vpop.f32.mrf.mxu1  ;;  %v5274_v57 = vpop.f32.mrf.mxu0 }
 0x240   : > { %7263 = vst [vmem:[#allocation25_spill] sm:$0xff] %v7113_v60 }
 0x241   : > { %v7115_v47 = vpop.f32.mrf.mxu1  ;;  %v5275_v21 = vpop.f32.mrf.mxu0 }
 0x242   : > { %7264 = vst [vmem:[#allocation26_spill] sm:$0xff] %v7115_v47  ;;  %v2905_v47 = vadd.f32 %v5153_v12, %v5113_v10  ;;  %v5125_v12 = vadd.f32 %v7049_v1, %v7045_v38  ;;  %v5245_v38 = vadd.f32 %v7109_v62, %v7107_v15 }
 0x243   : > { %v7117_v42 = vpop.f32.mrf.mxu1  ;;  %v5277_v23 = vpop.f32.mrf.mxu0 }
 0x244   : > { %7265 = vst [vmem:[#allocation27_spill] sm:$0xff] %v7117_v42  ;;  %v5116_v42 = vadd.f32 %v7029_v26, %v7027_v43  ;;  %v2943_v10 = vadd.f32 %v2905_v47, %v6996_v24  ;;  %v2913_v43 = vadd.f32 %v5159_v45, %v5119_v4  ;;  %v7146_v24 = vld [vmem:[%s7236_s5] ss:$0 sm:$0xff]  ;;  %v5276_v47 = vadd.f32 %v5275_v21, %v5274_v57  ;;  %v7268_v45 = vld [vmem:[#allocation17_spill] sm:$0xff] }
 0x245   : > { %v7120_v16 = vpop.f32.mrf.mxu1  ;;  %v5278_v31 = vpop.f32.mrf.mxu0  ;;  %v5128_v21 = vadd.f32 %v7057_v50, %v7053_v41  ;;  %v2921_v19 = vadd.f32 %v5165_v34, %v5125_v12 }
 0x246   : > { %7266 = vst [vmem:[#allocation28_spill] sm:$0xff] %v7120_v16  ;;  %v2908_v33 = vadd.f32 %v5156_v59, %v5116_v42  ;;  %v3451_v35 = vadd.f32 %v3413_v29, %v2943_v10  ;;  %v5199_v42 = vadd.f32 %v7083_v30, %v7079_v20  ;;  %v2945_v0 = vadd.f32 %v2913_v43, %v7006_v28 }
 0x247   : > { %v7125_v17 = vpop.f32.mrf.mxu1  ;;  %v7127_v60 = vpop.f32.mrf.mxu0  ;;  %v5202_v28 = vadd.f32 %v7089_v7, %v7087_v3 }
 0x248   : > { %v2944_v59 = vadd.f32 %v2908_v33, %v6999_v2  ;;  %v5122_v2 = vadd.f32 %v7041_v40, %v7039_v22  ;;  %v3421_v39 = vadd.f32 %v5239_v58, %v5199_v42  ;;  %v5279_v40 = vadd.f32 %v5278_v31, %v5277_v23  ;;  %v7267_v23 = vld [vmem:[#allocation16_spill] sm:$0xff]  ;;  %v7274_v42 = vld [vmem:[#allocation13_spill] sm:$0xff] }
 0x249   : > { %v5281_v61 = vpop.f32.mrf.mxu0  ;;  %v5311_v16 = vpop.f32.mrf.mxu1  ;;  %v3424_v49 = vadd.f32 %v5242_v63, %v5202_v28  ;;  %v2924_v31 = vadd.f32 %v5168_v14, %v5128_v21  ;;  %v5205_v33 = vadd.f32 %v7268_v45, %v7267_v23 }
 0x24a   : > { %v3452_v29 = vadd.f32 %v3416_v9, %v2944_v59  ;;  %v2916_v30 = vadd.f32 %v5162_v27, %v5122_v2  ;;  %v5282_v41 = vadd.f32 %v5281_v61, %v7127_v60  ;;  %v7272_v59 = vld [vmem:[#allocation5_spill] sm:$0xff] }
 0x24b   : > { %v7135_v37 = vpop.f32.mrf.mxu0  ;;  %v5312_v32 = vpop.f32.mrf.mxu1  ;;  %v3429_v43 = vadd.f32 %v5245_v38, %v5205_v33  ;;  %v2948_v27 = vadd.f32 %v2924_v31, %v7272_v59  ;;  %v7282_v38 = vld [vmem:[#allocation15_spill] sm:$0xff] }
 0x24c   : > { %v5313_v8 = vadd.f32 %v5312_v32, %v5311_v16  ;;  %v3453_v16 = vadd.f32 %v3421_v39, %v2945_v0  ;;  %v2946_v7 = vadd.f32 %v2916_v30, %v7008_v55  ;;  %v7271_v55 = vld [vmem:[#allocation25_spill] sm:$0xff] }
 0x24d   : > { %v7138_v26 = vpop.f32.mrf.mxu0  ;;  %v5314_v11 = vpop.f32.mrf.mxu1  ;;  %v7278_v30 = vld [vmem:[#allocation9_spill] sm:$0xff] }
 0x24e   : > { %v4144_v25 = vadd.f32 %v5313_v8, %v5273_v6  ;;  %v2947_v6 = vadd.f32 %v2921_v19, %v7269_v51  ;;  %v3454_v8 = vadd.f32 %v3424_v49, %v2946_v7  ;;  %v5285_v0 = vadd.f32 %v7138_v26, %v7135_v37  ;;  %v7281_v49 = vld [vmem:[#allocation14_spill] sm:$0xff]  ;;  %v7287_v51 = vld [vmem:[#allocation28_spill] sm:$0xff] }
 0x24f   : > { %v5315_v44 = vpop.f32.mrf.mxu1  ;;  %v7150_v5 = vpop.f32.mrf.mxu0 }
 0x250   : > { %v4182_v13 = vadd.f32 %v4144_v25, %v3451_v35  ;;  %v5316_v18 = vadd.f32 %v5315_v44, %v5314_v11  ;;  %v7270_v11 = vld [vmem:[#allocation24_spill] sm:$0xff]  ;;  %v3455_v14 = vadd.f32 %v3429_v43, %v2947_v6  ;;  %v5254_v6 = vadd.f32 %v7125_v17, %v7287_v51 }
 0x251   : > { %v5317_v46 = vpop.f32.mrf.mxu1  ;;  %v5287_v57 = vpop.f32.mrf.mxu0  ;;  %v5248_v35 = vadd.f32 %v7271_v55, %v7270_v11  ;;  %v7273_v44 = vld [vmem:[#allocation12_spill] sm:$0xff]  ;;  %v7288_v55 = vld [vmem:[#allocation6_spill] sm:$0xff] }
 0x252   : > { %v4213_v52 = vadd.f32 %v7146_v24, %v4182_v13  ;;  %v4147_v20 = vadd.f32 %v5316_v18, %v5276_v47  ;;  %v5171_v47 = vadd.f32 %v7274_v42, %v7273_v44  ;;  %v7275_v13 = vld [vmem:[#allocation18_spill] sm:$0xff]  ;;  %v7276_v18 = vld [vmem:[#allocation19_spill] sm:$0xff] }
 0x253   : > { %v5318_v22 = vpop.f32.mrf.mxu1  ;;  %v5289_v10 = vpop.f32.mrf.mxu0  ;;  %v5208_v2 = vadd.f32 %v7276_v18, %v7275_v13 }
 0x254   : > { %v4221_v36 = vmax.f32 %v4213_v52, 0.0  ;;  %v4183_v48 = vadd.f32 %v4147_v20, %v3452_v29  ;;  %v5319_v54 = vadd.f32 %v5318_v22, %v5317_v46  ;;  %v7277_v20 = vld [vmem:[#allocation8_spill] sm:$0xff]  ;;  %v7279_v22 = vld [vmem:[#allocation26_spill] sm:$0xff] }
 0x255   : > { %v5320_v1 = vpop.f32.mrf.mxu1  ;;  %v5290_v29 = vpop.f32.mrf.mxu0  ;;  %v5131_v12 = vadd.f32 %v7278_v30, %v7277_v20  ;;  %v3432_v28 = vadd.f32 %v5248_v35, %v5208_v2 }
 0x256   : > { %v5007_v53 = vpack.c.bf16 %v4221_v36, %v4221_v36  ;;  %v4214_v56 = vadd.f32 %v7146_v24, %v4183_v48  ;;  %v4152_v3 = vadd.f32 %v5319_v54, %v5279_v40  ;;  %v7280_v40 = vld [vmem:[#allocation27_spill] sm:$0xff] }
 0x257   : > { %v5321_v50 = vpop.f32.mrf.mxu1  ;;  %v5251_v36 = vadd.f32 %v7280_v40, %v7279_v22  ;;  %v2929_v19 = vadd.f32 %v5171_v47, %v5131_v12  ;;  %v5292_v23 = vpop.f32.mrf.mxu0 }
 0x258   : > { %v4281_v4 = vrot.slane %v5007_v53, 7  ;;  %v4222_v32 = vmax.f32 %v4214_v56, 0.0  ;;  %v4184_v62 = vadd.f32 %v4152_v3, %v3453_v16  ;;  %v5322_v15 = vadd.f32 %v5321_v50, %v5320_v1  ;;  %v7283_v16 = vld [vmem:[#allocation20_spill] sm:$0xff]  ;;  %v7284_v53 = vld [vmem:[#allocation21_spill] sm:$0xff]  ;;  %v7285_v50 = vld [vmem:[#allocation10_spill] sm:$0xff] }
 0x259   : > { %v5323_v9 = vpop.f32.mrf.mxu1  ;;  %v5174_v1 = vadd.f32 %v7282_v38, %v7281_v49  ;;  %v5211_v56 = vadd.f32 %v7284_v53, %v7283_v16  ;;  %v5288_v3 = vadd.f32 %v5287_v57, %v7150_v5  ;;  %v2949_v35 = vadd.f32 %v2929_v19, %v7288_v55  ;;  %v5293_v17 = vpop.f32.mrf.mxu0 }
 0x25a   : > { %v4282_v58 = vrot.slane %v4281_v4, 4  ;;  %4917 = vst [vmem:[%s5676_s12 + $0x8] sm:$0xe] %v4281_v4  ;;  %v5008_v25 = vpack.c.bf16 %v4222_v32, %v4222_v32  ;;  %v4215_v60 = vadd.f32 %v7146_v24, %v4184_v62  ;;  %v4155_v61 = vadd.f32 %v5322_v15, %v5282_v41  ;;  %v7286_v4 = vld [vmem:[#allocation11_spill] sm:$0xff] }
 0x25b   : > { %v5324_v34 = vpop.f32.mrf.mxu1  ;;  %v5134_v32 = vadd.f32 %v7286_v4, %v7285_v50  ;;  %v3456_v62 = vadd.f32 %v3432_v28, %v2948_v27  ;;  %v3437_v15 = vadd.f32 %v5251_v36, %v5211_v56 }
 0x25c   : > { %4918 = vst [vmem:[%s5676_s12 + $0xc] sm:$0x1] %v4282_v58  ;;  %v4283_v63 = vrot.slane %v5008_v25, 7  ;;  %v4223_v46 = vmax.f32 %v4215_v60, 0.0  ;;  %v4185_v39 = vadd.f32 %v4155_v61, %v3454_v8  ;;  %v5325_v52 = vadd.f32 %v5324_v34, %v5323_v9  ;;  %v7289_v58 = vld [vmem:[#allocation22_spill] sm:$0xff]  ;;  %v7290_v25 = vld [vmem:[#allocation23_spill] sm:$0xff] }
 0x25d   : > { %v5326_v48 = vpop.f32.mrf.mxu1  ;;  %v2932_v9 = vadd.f32 %v5174_v1, %v5134_v32  ;;  %v5214_v60 = vadd.f32 %v7290_v25, %v7289_v58  ;;  %v5291_v61 = vadd.f32 %v5290_v29, %v5289_v10  ;;  %v3457_v13 = vadd.f32 %v3437_v15, %v2949_v35  ;;  %v7291_v10 = vld [vmem:[#allocation7_spill] sm:$0xff] }
 0x25e   : > { %v4284_v54 = vrot.slane %v4283_v63, 4  ;;  %4919 = vst [vmem:[%s5676_s12 + $0x10] sm:$0xe] %v4283_v63  ;;  %v5009_v37 = vpack.c.bf16 %v4223_v46, %v4223_v46  ;;  %v4216_v26 = vadd.f32 %v7146_v24, %v4185_v39  ;;  %v4160_v21 = vadd.f32 %v5325_v52, %v5285_v0 }
 0x25f   : > { %v5327_v7 = vpop.f32.mrf.mxu1  ;;  %v3440_v18 = vadd.f32 %v5254_v6, %v5214_v60  ;;  %v2950_v29 = vadd.f32 %v2932_v9, %v7291_v10  ;;  %v5294_v39 = vadd.f32 %v5293_v17, %v5292_v23 }
 0x260   : > { %4920 = vst [vmem:[%s5676_s12 + $0x14] sm:$0x1] %v4284_v54  ;;  %v4285_v31 = vrot.slane %v5009_v37, 7  ;;  %v4224_v45 = vmax.f32 %v4216_v26, 0.0  ;;  %v4186_v33 = vadd.f32 %v4160_v21, %v3455_v14  ;;  %v5328_v41 = vadd.f32 %v5327_v7, %v5326_v48 }
 0x261   : > { %v5329_v8 = vpop.f32.mrf.mxu1  ;;  %v3458_v28 = vadd.f32 %v3440_v18, %v2950_v29 }
 0x262   : > { %v4286_v43 = vrot.slane %v4285_v31, 4  ;;  %4921 = vst [vmem:[%s5676_s12 + $0x18] sm:$0xe] %v4285_v31  ;;  %v5010_v5 = vpack.c.bf16 %v4224_v45, %v4224_v45  ;;  %v4217_v57 = vadd.f32 %v7146_v24, %v4186_v33  ;;  %v4163_v11 = vadd.f32 %v5328_v41, %v5288_v3 }
 0x263   : > { %v5330_v59 = vpop.f32.mrf.mxu1 }
 0x264   : > { %4922 = vst [vmem:[%s5676_s12 + $0x1c] sm:$0x1] %v4286_v43  ;;  %v4287_v27 = vrot.slane %v5010_v5, 7  ;;  %v4225_v44 = vmax.f32 %v4217_v57, 0.0  ;;  %v4187_v42 = vadd.f32 %v4163_v11, %v3456_v62  ;;  %v5331_v47 = vadd.f32 %v5330_v59, %v5329_v8 }
 0x265   : > { %v5332_v2 = vpop.f32.mrf.mxu1 }
 0x266   : > { %v4288_v0 = vrot.slane %v4287_v27, 4  ;;  %4923 = vst [vmem:[%s5676_s12 + $0x20] sm:$0xe] %v4287_v27  ;;  %v5011_v34 = vpack.c.bf16 %v4225_v44, %v4225_v44  ;;  %v4218_v63 = vadd.f32 %v7146_v24, %v4187_v42  ;;  %v4168_v46 = vadd.f32 %v5331_v47, %v5291_v61 }
 0x267   : > { %v5333_v52 = vpop.f32.mrf.mxu1 }
 0x268   : > { %4924 = vst [vmem:[%s5676_s12 + $0x24] sm:$0x1] %v4288_v0  ;;  %v4289_v20 = vrot.slane %v5011_v34, 7  ;;  %v4226_v30 = vmax.f32 %v4218_v63, 0.0  ;;  %v4188_v12 = vadd.f32 %v4168_v46, %v3457_v13  ;;  %v5334_v14 = vadd.f32 %v5333_v52, %v5332_v2 }
 0x26a   : > { %v4290_v22 = vrot.slane %v4289_v20, 4  ;;  %4925 = vst [vmem:[%s5676_s12 + $0x28] sm:$0xe] %v4289_v20  ;;  %v5012_v40 = vpack.c.bf16 %v4226_v30, %v4226_v30  ;;  %v4219_v36 = vadd.f32 %v7146_v24, %v4188_v12  ;;  %v4171_v48 = vadd.f32 %v5334_v14, %v5294_v39 }
 0x26c   : > { %4926 = vst [vmem:[%s5676_s12 + $0x2c] sm:$0x1] %v4290_v22  ;;  %v4291_v54 = vrot.slane %v5012_v40, 7  ;;  %v4227_v37 = vmax.f32 %v4219_v36, 0.0  ;;  %v4189_v26 = vadd.f32 %v4171_v48, %v3458_v28 }
 0x26e   : > { %v4292_v21 = vrot.slane %v4291_v54, 4  ;;  %4927 = vst [vmem:[%s5676_s12 + $0x30] sm:$0xe] %v4291_v54  ;;  %v5013_v19 = vpack.c.bf16 %v4227_v37, %v4227_v37  ;;  %v4220_v49 = vadd.f32 %v7146_v24, %v4189_v26 }
 0x270   : > { %4928 = vst [vmem:[%s5676_s12 + $0x34] sm:$0x1] %v4292_v21  ;;  %v4293_v38 = vrot.slane %v5013_v19, 7  ;;  %v4228_v1 = vmax.f32 %v4220_v49, 0.0 }
 0x272   : > { %v4294_v16 = vrot.slane %v4293_v38, 4  ;;  %4929 = vst [vmem:[%s5676_s12 + $0x38] sm:$0xe] %v4293_v38  ;;  %v5014_v53 = vpack.c.bf16 %v4228_v1, %v4228_v1 }
 0x274   : > { %4930 = vst [vmem:[%s5676_s12 + $0x3c] sm:$0x1] %v4294_v16  ;;  %v4295_v56 = vrot.slane %v5014_v53, 7 }
 0x276   : > { %v4296_v3 = vrot.slane %v4295_v56, 4  ;;  %4931 = vst [vmem:[%s5676_s12 + $0x40] sm:$0xe] %v4295_v56 }
 0x278   : > { %4932 = vst [vmem:[%s5676_s12 + $0x44] sm:$0x1] %v4296_v3 }
 0x279 PF: > { %s16_s23 = sadd.s32 1, %s5587_s23   ;;  %s7292_s21 = smov %s5583_s22 }
 0x27a   : > { %p13_p5 = scmp.ge.s32.totalorder %s16_s23, 4   ;;  %s7293_s22 = smov %s7295_s24 }
 0x27c   :  { %15 = sbr.rel (!%p13_p5) target bundleno = 2 (0x2), region = 89 }

</bundles_post_ra>
